<compile_context>
chip_gen: v7x
topology: tpu7x:2x2x1
jax: 0.10.0
libtpu: 0.0.40
codegen_flags: <defaults>
</compile_context>

<pallas_src>
import math

import jax
import jax.numpy as jnp
from jax.experimental import pallas as pl
from jax.experimental.pallas import tpu as pltpu

N_SPLIT = 2    # split fc4's output features over 2 grid steps (v7x: 2 TCs)
LANE = 128


def _dann_gen_kernel(x_ref, w1_ref, b1_ref, w2_ref, b2_ref, w3_ref, b3_ref,
                     o_ref):
    # fc1 + ReLU   (Dropout is identity in eval mode)
    h = jnp.dot(x_ref[...].astype(jnp.bfloat16), w1_ref[...],
                preferred_element_type=jnp.float32) + b1_ref[...]
    h = jnp.maximum(h, 0.0)
    # fc3 + ReLU   (Dropout is identity in eval mode)
    h = jnp.dot(h.astype(jnp.bfloat16), w2_ref[...],
                preferred_element_type=jnp.float32) + b2_ref[...]
    h = jnp.maximum(h, 0.0)
    # fc4 + ReLU   (this grid step's slice of the output features)
    h = jnp.dot(h.astype(jnp.bfloat16), w3_ref[...],
                preferred_element_type=jnp.float32) + b3_ref[...]
    o_ref[...] = jnp.maximum(h, 0.0).astype(o_ref.dtype)
    # TODO(synk): training-mode Dropout(p=0.5) not implemented (eval semantics
    # used); could be added with pltpu.prng_seed / pltpu.stateful_bernoulli.


def prepare_params(params):
    """One-time prep: cast weights to bf16 (halves the HBM weight stream) and
    pad fc4's output dim to a multiple of N_SPLIT*128 so the N-split across
    grid steps / TensorCores stays lane-dense. Biases stay f32."""
    w1, b1, w2, b2, w3, b3 = params
    num_features = w3.shape[1]
    pad_to = N_SPLIT * LANE
    n_pad = (-num_features) % pad_to
    w3p = jnp.pad(w3, ((0, 0), (0, n_pad)))
    b3p = jnp.pad(b3, ((0, 0), (0, n_pad)))
    prepared = (w1.astype(jnp.bfloat16), b1.astype(jnp.float32),
                w2.astype(jnp.bfloat16), b2.astype(jnp.float32),
                w3p.astype(jnp.bfloat16), b3p.astype(jnp.float32))
    return prepared, num_features


def dann_source_generator(x, prepared_params, num_features, n_channels):
    """x: (B, z_dim) float32. Returns (B, n_channels, img_size, img_size)."""
    w1, b1, w2, b2, w3, b3 = prepared_params
    B, z_dim = x.shape
    h1 = w1.shape[1]            # 1024
    h2 = w2.shape[1]            # 1024
    n_pad_total = w3.shape[1]   # padded num_features (multiple of 256)
    n_blk = n_pad_total // N_SPLIT

    # Constant index_maps: fetched once, resident across the 2 grid steps.
    const = lambda shape: pl.BlockSpec(shape, lambda j: tuple(0 for _ in shape))
    # Split along the output-feature (lane) dimension.
    split = lambda shape: pl.BlockSpec(shape, lambda j: (0, j))

    out_flat = pl.pallas_call(
        _dann_gen_kernel,
        out_shape=jax.ShapeDtypeStruct((B, n_pad_total), jnp.float32),
        grid=(N_SPLIT,),
        in_specs=[
            const((B, z_dim)),
            const((z_dim, h1)), const((1, h1)),
            const((h1, h2)), const((1, h2)),
            split((h2, n_blk)), split((1, n_blk)),
        ],
        out_specs=split((B, n_blk)),
        compiler_params=pltpu.CompilerParams(
            dimension_semantics=("parallel",),
            vmem_limit_bytes=32 << 20,   # fits v5e/v6e/v7x (v7x has 64 MiB)
        ),
    )(x, w1, b1, w2, b2, w3, b3)

    # Drop the lane padding, then mirror PyTorch's view(b, n_channels, s, s).
    out_flat = out_flat[:, :num_features]
    per_chan = num_features // n_channels
    assert per_chan * n_channels == num_features, \
        "num_features must be divisible by n_channels"
    img_size = int(math.sqrt(per_chan))
    assert img_size * img_size == per_chan, \
        "num_features / n_channels must be a perfect square"
    return out_flat.reshape(B, n_channels, img_size, img_size)


def init_params(key, z_dim, num_features, hidden=1024):
    """Deterministic parameter init, (in_features, out_features) layout, fp32."""
    ks = jax.random.split(key, 6)

    def lin(kw, kb, fan_in, fan_out):
        # PyTorch-style uniform(-1/sqrt(fan_in), 1/sqrt(fan_in))
        bound = 1.0 / math.sqrt(fan_in)
        w = jax.random.uniform(kw, (fan_in, fan_out), jnp.float32,
                               minval=-bound, maxval=bound)
        b = jax.random.uniform(kb, (1, fan_out), jnp.float32,
                               minval=-bound, maxval=bound)
        return w, b

    w1, b1 = lin(ks[0], ks[1], z_dim, hidden)
    w2, b2 = lin(ks[2], ks[3], hidden, hidden)
    w3, b3 = lin(ks[4], ks[5], hidden, num_features)
    return (w1, b1, w2, b2, w3, b3)


if __name__ == "__main__":
    # Small, consistent shapes: num_features must equal n_channels * s * s.
    # 1568 = 32 * 7 * 7, so n_channels=32 keeps the default num_features valid.
    batch = 2
    z_dim = 32
    n_channels = 32
    num_features = 1568   # -> img_size = 7 (padded to 1792 inside)

    key = jax.random.PRNGKey(0)
    k_x, k_p = jax.random.split(key)
    x = jax.random.normal(k_x, (batch, z_dim), jnp.float32)
    params_f32 = init_params(k_p, z_dim, num_features)
    prepared, nf = prepare_params(params_f32)

    out = dann_source_generator(x, prepared, nf, n_channels)
    out = jax.block_until_ready(out)

    assert out.shape == (batch, n_channels, 7, 7), out.shape
    assert out.dtype == jnp.float32
    assert bool(jnp.all(out >= 0.0))  # final ReLU

    # Sanity check against a pure-JAX fp32 reference (bf16 weights -> loose tol).
    w1, b1, w2, b2, w3, b3 = params_f32
    ref = jnp.maximum(x @ w1 + b1, 0.0)
    ref = jnp.maximum(ref @ w2 + b2, 0.0)
    ref = jnp.maximum(ref @ w3 + b3, 0.0).reshape(batch, n_channels, 7, 7)
    err = float(jnp.max(jnp.abs(out - ref)))
    assert err < 5e-2, f"max abs err vs fp32 reference too large: {err}"

    print("KERNEL_OK")
</pallas_src>

<mosaic_0001>
module attributes {stable_mosaic.version = 11 : i64} {
  func.func @_dann_gen_kernel(%arg0: i32, %arg1: memref<2x32xf32, #tpu.memory_space<vmem>>, %arg2: memref<32x1024xbf16, #tpu.memory_space<vmem>>, %arg3: memref<1x1024xf32, #tpu.memory_space<vmem>>, %arg4: memref<1024x1024xbf16, #tpu.memory_space<vmem>>, %arg5: memref<1x1024xf32, #tpu.memory_space<vmem>>, %arg6: memref<1024x896xbf16, #tpu.memory_space<vmem>>, %arg7: memref<1x896xf32, #tpu.memory_space<vmem>>, %arg8: memref<2x896xf32, #tpu.memory_space<vmem>>) attributes {dimension_semantics = [#tpu.dimension_semantics<parallel>], iteration_bounds = array<i64: 2>, scalar_prefetch = 0 : i64, scratch_operands = 0 : i64, tpu.core_type = #tpu.core_type<tc>, window_params = [{pipeline_mode = #tpu.pipeline_mode<synchronous>, transform_indices = @transform_0, window_bounds = array<i64: 2, 32>}, {pipeline_mode = #tpu.pipeline_mode<synchronous>, transform_indices = @transform_1, window_bounds = array<i64: 32, 1024>}, {pipeline_mode = #tpu.pipeline_mode<synchronous>, transform_indices = @transform_2, window_bounds = array<i64: 1, 1024>}, {pipeline_mode = #tpu.pipeline_mode<synchronous>, transform_indices = @transform_3, window_bounds = array<i64: 1024, 1024>}, {pipeline_mode = #tpu.pipeline_mode<synchronous>, transform_indices = @transform_4, window_bounds = array<i64: 1, 1024>}, {transform_indices = @transform_5, window_bounds = array<i64: 1024, 896>}, {transform_indices = @transform_6, window_bounds = array<i64: 1, 896>}, {transform_indices = @transform_7, window_bounds = array<i64: 2, 896>}]} {
    %c0 = arith.constant 0 : index
    %c0_0 = arith.constant 0 : index
    %0 = vector.load %arg1[%c0, %c0_0] : memref<2x32xf32, #tpu.memory_space<vmem>>, vector<2x32xf32>
    %1 = arith.truncf %0 : vector<2x32xf32> to vector<2x32xbf16>
    %c0_1 = arith.constant 0 : index
    %c0_2 = arith.constant 0 : index
    %2 = vector.load %arg2[%c0_1, %c0_2] : memref<32x1024xbf16, #tpu.memory_space<vmem>>, vector<32x1024xbf16>
    %cst = arith.constant dense<0.000000e+00> : vector<2x1024xf32>
    %3 = tpu.matmul %1, %2, %cst {dimension_numbers = #tpu.dot_dimension_numbers<[1], [0], [0], [1], [0, 0, 1, 1], [], []>} : vector<2x32xbf16>, vector<32x1024xbf16>, vector<2x1024xf32> -> vector<2x1024xf32>
    %c0_3 = arith.constant 0 : index
    %c0_4 = arith.constant 0 : index
    %4 = vector.load %arg3[%c0_3, %c0_4] : memref<1x1024xf32, #tpu.memory_space<vmem>>, vector<1x1024xf32>
    %5 = vector.broadcast %4 : vector<1x1024xf32> to vector<2x1024xf32>
    %6 = arith.addf %3, %5 : vector<2x1024xf32>
    %cst_5 = arith.constant 0.000000e+00 : f32
    %7 = vector.broadcast %cst_5 : f32 to vector<2x1024xf32>
    %8 = arith.maximumf %6, %7 : vector<2x1024xf32>
    %9 = arith.truncf %8 : vector<2x1024xf32> to vector<2x1024xbf16>
    %c0_6 = arith.constant 0 : index
    %c0_7 = arith.constant 0 : index
    %10 = vector.load %arg4[%c0_6, %c0_7] : memref<1024x1024xbf16, #tpu.memory_space<vmem>>, vector<1024x1024xbf16>
    %cst_8 = arith.constant dense<0.000000e+00> : vector<2x1024xf32>
    %11 = tpu.matmul %9, %10, %cst_8 {dimension_numbers = #tpu.dot_dimension_numbers<[1], [0], [0], [1], [0, 0, 1, 1], [], []>} : vector<2x1024xbf16>, vector<1024x1024xbf16>, vector<2x1024xf32> -> vector<2x1024xf32>
    %c0_9 = arith.constant 0 : index
    %c0_10 = arith.constant 0 : index
    %12 = vector.load %arg5[%c0_9, %c0_10] : memref<1x1024xf32, #tpu.memory_space<vmem>>, vector<1x1024xf32>
    %13 = vector.broadcast %12 : vector<1x1024xf32> to vector<2x1024xf32>
    %14 = arith.addf %11, %13 : vector<2x1024xf32>
    %cst_11 = arith.constant 0.000000e+00 : f32
    %15 = vector.broadcast %cst_11 : f32 to vector<2x1024xf32>
    %16 = arith.maximumf %14, %15 : vector<2x1024xf32>
    %17 = arith.truncf %16 : vector<2x1024xf32> to vector<2x1024xbf16>
    %c0_12 = arith.constant 0 : index
    %c0_13 = arith.constant 0 : index
    %18 = vector.load %arg6[%c0_12, %c0_13] : memref<1024x896xbf16, #tpu.memory_space<vmem>>, vector<1024x896xbf16>
    %cst_14 = arith.constant dense<0.000000e+00> : vector<2x896xf32>
    %19 = tpu.matmul %17, %18, %cst_14 {dimension_numbers = #tpu.dot_dimension_numbers<[1], [0], [0], [1], [0, 0, 1, 1], [], []>} : vector<2x1024xbf16>, vector<1024x896xbf16>, vector<2x896xf32> -> vector<2x896xf32>
    %c0_15 = arith.constant 0 : index
    %c0_16 = arith.constant 0 : index
    %20 = vector.load %arg7[%c0_15, %c0_16] : memref<1x896xf32, #tpu.memory_space<vmem>>, vector<1x896xf32>
    %21 = vector.broadcast %20 : vector<1x896xf32> to vector<2x896xf32>
    %22 = arith.addf %19, %21 : vector<2x896xf32>
    %cst_17 = arith.constant 0.000000e+00 : f32
    %23 = vector.broadcast %cst_17 : f32 to vector<2x896xf32>
    %24 = arith.maximumf %22, %23 : vector<2x896xf32>
    %c0_18 = arith.constant 0 : index
    %c0_19 = arith.constant 0 : index
    %25 = vector.load %arg8[%c0_18, %c0_19] : memref<2x896xf32, #tpu.memory_space<vmem>>, vector<2x896xf32>
    tpu.vector_store %arg8[%c0_18, %c0_19], %24 {strides = array<i32>} : memref<2x896xf32, #tpu.memory_space<vmem>>, vector<2x896xf32>,
    return
  }
  func.func @transform_0(%arg0: i32) -> (i32, i32) {
    %c0_i32 = arith.constant 0 : i32
    %c0_i32_0 = arith.constant 0 : i32
    %c0_i32_1 = arith.constant 0 : i32
    return %c0_i32, %c0_i32_0 : i32, i32
  }
  func.func @transform_1(%arg0: i32) -> (i32, i32) {
    %c0_i32 = arith.constant 0 : i32
    %c0_i32_0 = arith.constant 0 : i32
    %c0_i32_1 = arith.constant 0 : i32
    return %c0_i32, %c0_i32_0 : i32, i32
  }
  func.func @transform_2(%arg0: i32) -> (i32, i32) {
    %c0_i32 = arith.constant 0 : i32
    %c0_i32_0 = arith.constant 0 : i32
    %c0_i32_1 = arith.constant 0 : i32
    return %c0_i32, %c0_i32_0 : i32, i32
  }
  func.func @transform_3(%arg0: i32) -> (i32, i32) {
    %c0_i32 = arith.constant 0 : i32
    %c0_i32_0 = arith.constant 0 : i32
    %c0_i32_1 = arith.constant 0 : i32
    return %c0_i32, %c0_i32_0 : i32, i32
  }
  func.func @transform_4(%arg0: i32) -> (i32, i32) {
    %c0_i32 = arith.constant 0 : i32
    %c0_i32_0 = arith.constant 0 : i32
    %c0_i32_1 = arith.constant 0 : i32
    return %c0_i32, %c0_i32_0 : i32, i32
  }
  func.func @transform_5(%arg0: i32) -> (i32, i32) {
    %c0_i32 = arith.constant 0 : i32
    %c0_i32_0 = arith.constant 0 : i32
    return %c0_i32, %arg0 : i32, i32
  }
  func.func @transform_6(%arg0: i32) -> (i32, i32) {
    %c0_i32 = arith.constant 0 : i32
    %c0_i32_0 = arith.constant 0 : i32
    return %c0_i32, %arg0 : i32, i32
  }
  func.func @transform_7(%arg0: i32) -> (i32, i32) {
    %c0_i32 = arith.constant 0 : i32
    %c0_i32_0 = arith.constant 0 : i32
    return %c0_i32, %arg0 : i32, i32
  }
}

</mosaic_0001>

<bundles_post_ra>
// kernel: tpu_custom_call.1
= control target key start
LH: loop header
LB: loop body
LE: loop exit
PB: predicated region body
PF: predicated region fallthrough
CT: control target
= control target key end

     0   :  { %s11495_s0 = inlined_call_operand.hbm [shape: f32[2,32], index: 0, kind: input, shape index: {}]   ;;  %s11496_s1 = inlined_call_operand.hbm [shape: bf16[32,1024], index: 1, kind: input, shape index: {}]   ;;  %s11497_s2 = inlined_call_operand.hbm [shape: f32[1,1024], index: 2, kind: input, shape index: {}]   ;;  %s11498_s3 = inlined_call_operand.hbm [shape: bf16[1024,1024], index: 3, kind: input, shape index: {}]   ;;  %s11499_s4 = inlined_call_operand.hbm [shape: f32[1,1024], index: 4, kind: input, shape index: {}]   ;;  %s11500_s5 = inlined_call_operand.hbm [shape: bf16[1024,1792], index: 5, kind: input, shape index: {}]   ;;  %s11501_s6 = inlined_call_operand.hbm [shape: f32[1,1792], index: 6, kind: input, shape index: {}]   ;;  %s11502_s7 = inlined_call_operand.hbm [shape: f32[2,1792], index: 7, kind: output, shape index: {}]  }
   0x1   :  { %11518 = sst [smem:[#allocation24_spill]] %s11496_s1 }
   0x2   :  { %11519 = sst [smem:[#allocation25_spill]] %s11498_s3 }
   0x3   :  { %11520 = sst [smem:[#allocation26_spill]] %s11500_s5 }
   0x4   :  { %11521 = sst [smem:[#allocation27_spill]] %s11502_s7 }
   0x5   :  { %12 = vsyncpa [#allocation3], 0 }
   0x6   :  { %13 = vsyncpa [#allocation6], 0 }
   0x7   :  { %14 = vsyncpa [#allocation9], 0 }
   0x8   :  { %15 = vsyncpa [#allocation12], 0 }
   0x9   :  { %17 = vsyncpa [#allocation12 + $0x1], 0 }
   0xa   :  { %18 = vsyncpa [#allocation4], 0 }
   0xb   :  { %20 = vsyncpa [#allocation4 + $0x1], 0  ;;  %s10500_s24 = smov 0   ;;  %s10502_s25 = smov 0  }
   0xc   :  { %s10504_s26 = smov 0   ;;  %s10506_s27 = smov 0  }
   0xd LB: > { %11522 = sst [smem:[#allocation20_spill]] %s10431_s24  ;;  %s10521_s28 = sadd.s32 4294967295, %s10443_s27   ;;  %s10443_s27 = sphi %s10506_s27, %s11556_s27   ;;  %s10439_s26 = sphi %s10504_s26, %s11560_s26   ;;  %s10435_s25 = sphi %s10502_s25, %s11559_s25   ;;  %s10431_s24 = sphi %s10500_s24, %s11558_s24  }
   0xe   : > { %s8224_s29 = sadd.s32 4294967294, %s10443_s27   ;;  %p151_p0 = scmp.ne.s32.totalorder %s10435_s25, %s10431_s24 }
   0xf   : > { %p11503_p1 = scmp.eq.s32.totalorder %s10521_s28, 0  ;;  %p207_p3 = scmp.eq.s32.totalorder %s8224_s29, 1 }
  0x10   : > { %p8225_p5 = scmp.ge.s32.totalorder %s10443_s27, 1  ;;  %p214_p7 = scmp.lt.s32.totalorder %s10443_s27, 3 }
  0x11   : > { %p10530_p4 = por %p11503_p1, %p151_p0  ;;  %p10535_p6 = por %p207_p3, %p151_p0 }
  0x12   : > { %p10540_p8 = pnand %p8225_p5, %p214_p7  ;;  %s10445_s10 = smov [#allocation5]  }
  0x13   : > { %s11523_s30 = scalar_select %p10530_p4, 1, 0 }
  0x14   : > { %s11524_s8 = scalar_select %p10535_p6, 1, 0 }
  0x15   : > { %s11526_s9 = scalar_select %p10540_p8, 1, 0 }
  0x16   : > { %11525 = sst [smem:[#allocation21_spill]] %s11524_s8  ;;  %s237_s11 = sshll.u32 %s10445_s10, 4  ;;  %s10544_s11 = int_to_ptr.vmem [resolvable:$true] %s237_s11 }
  0x17   : > { %p9441_p9 = pneg %p10540_p8  ;;  %s10446_s13 = smov [#allocation8]  }
  0x18   : > { %s261_s14 = sshll.u32 %s10446_s13, 4  ;;  %s11528_s1 = sld [smem:[#allocation24_spill]]  ;;  %s10555_s14 = int_to_ptr.vmem [resolvable:$true] %s261_s14 }
  0x19   : > { %p10551_p11 = pnand %p9441_p9, %p11503_p1 }
  0x1b   : > { %s11527_s12 = scalar_select %p10551_p11, 1, 0 }
  0x1c   : > { %p10565_p13 = pneg %p10551_p11 }
  0x1e   : > { %s10165_s17 = scalar_lea.hbm %s11528_s1, 2048 }
  0x1f   : > { %p10166_p12 = scmp.ne.s32.totalorder %s11528_s1, %s10165_s17  ;;  %p10172_p5 = scmp.lt.u32.totalorder %s10165_s17, %s11528_s1 }
  0x21   : > { %p10168_p0 = pnand %p10565_p13, %p10166_p12 }
  0x23   : > { %p10169_p3 = pneg %p10168_p0 }
  0x25   : > { %p10174_p7 = pnand %p10172_p5, %p10169_p3 }
  0x27   : > { %10177 = shalt.err (!%p10174_p7)
}
  0x28   : > { %s10178_s23 = scalar_lea.vmem %s10544_s11, 2048  ;;  %p10186_p2 = scmp.lt.s32.totalorder %s10544_s11, %s10544_s11 }
  0x29   : > { %p10179_p9 = scmp.ne.s32.totalorder %s10544_s11, %s10178_s23  ;;  %p10187_p6 = scmp.lt.s32.totalorder %s10178_s23, %s10178_s23 }
  0x2b   : > { %p10181_p10 = pnand %p10179_p9, %p10565_p13  ;;  %p10188_p12 = por %p10187_p6, %p10186_p2 }
  0x2d   : > { %p10182_p1 = pneg %p10181_p10 }
  0x2f   : > { %p10189_p0 = pnand %p10188_p12, %p10182_p1 }
  0x31   : > { %10192 = shalt.err (!%p10189_p0)
}
  0x32   : > { %s10447_s29 = smov 512   ;;  %s10448_s10 = smov 32  }
  0x33   : > { %9447 = dma.hbm_to_vmem [thread:$0]  (!%p10551_p11), %s11528_s1, 2048, %s10544_s11, [#allocation6], %s10447_s29, %s10447_s29, %s10448_s10  }
  0x34   : > { %s11530_s3 = sld [smem:[#allocation25_spill]] }
  0x3a   : > { %s10193_s18 = scalar_lea.hbm %s11530_s3, 65536 }
  0x3b   : > { %p10194_p2 = scmp.ne.s32.totalorder %s11530_s3, %s10193_s18  ;;  %p10200_p10 = scmp.lt.u32.totalorder %s10193_s18, %s11530_s3 }
  0x3d   : > { %p10196_p1 = pnand %p10194_p2, %p10565_p13 }
  0x3f   : > { %p10197_p6 = pneg %p10196_p1 }
  0x41   : > { %p10202_p3 = pnand %p10200_p10, %p10197_p6 }
  0x43   : > { %10205 = shalt.err (!%p10202_p3)
}
  0x44   : > { %s10206_s11 = scalar_lea.vmem %s10555_s14, 65536  ;;  %p10214_p12 = scmp.lt.s32.totalorder %s10555_s14, %s10555_s14 }
  0x45   : > { %p10207_p5 = scmp.ne.s32.totalorder %s10555_s14, %s10206_s11  ;;  %p10215_p0 = scmp.lt.s32.totalorder %s10206_s11, %s10206_s11 }
  0x47   : > { %p10209_p7 = pnand %p10207_p5, %p10565_p13  ;;  %p10216_p2 = por %p10215_p0, %p10214_p12 }
  0x49   : > { %p10210_p9 = pneg %p10209_p7 }
  0x4b   : > { %p10217_p1 = pnand %p10216_p2, %p10210_p9 }
  0x4d   : > { %10220 = shalt.err (!%p10217_p1)
}
  0x4e   : > { %9453 = dma.hbm_to_vmem [thread:$0]  (!%p10551_p11), %s11530_s3, 65536, %s10555_s14, [#allocation9], %s10447_s29, %s10447_s29, %s10448_s10  }
  0x4f   : > { %s10610_s16 = sadd.s32 1, %s10443_s27   ;;  %s138_s17 = sadd.s32 1, %s10439_s26 }
  0x50   : > { %11531 = sst [smem:[#allocation22_spill]] %s10610_s16  ;;  %s135_s18 = ssub.s32 %s10443_s27, %s10610_s16 }
  0x51   : > { %p145_p6 = scmp.ne.s32.totalorder %s10439_s26, %s10435_s25  ;;  %p136_p10 = scmp.eq.s32.totalorder %s135_s18, 0 }
  0x52   : > { %p146_p3 = scmp.eq.s32.totalorder %s10443_s27, 0  ;;  %p11532_p5 = scmp.eq.s32.totalorder %s10521_s28, 1 }
  0x53   : > { %p9473_p9 = scmp.lt.s32.totalorder %s10443_s27, 2  ;;  %s286_s22 = sand.u32 1, %s10443_s27  }
  0x54   : > { %p10620_p7 = por %p11532_p5, %p145_p6  ;;  %p147_p12 = por %p146_p3, %p145_p6 }
  0x55   : > { %s10626_s21 = scalar_select %p136_p10, %s10439_s26, %s138_s17  }
  0x56   : > { %s11533_s19 = scalar_select %p10620_p7, 1, 0 }
  0x57   : > { %11534 = sst [smem:[#allocation23_spill]] %s10626_s21  ;;  %s11504_s23 = sand.u32 1, %s10439_s26  }
  0x58   : > { %s9410_s14 = smul.u32 3584, %s11504_s23  ;;  %p10632_p0 = pnand %p9473_p9, %p147_p12 }
  0x59   : > { %s9223_s10 = smul.u32 448, %s10443_s27  ;;  %s11536_s5 = sld [smem:[#allocation26_spill]] }
  0x5a   : > { %s11535_s29 = scalar_select %p10632_p0, 1, 0 }
  0x5b   : > { %s290_s17 = scalar_lea.vmem [#allocation11], %s9410_s14  ;;  %s10644_s23 = scalar_lea.sflag [#allocation12], %s286_s22 }
  0x5c   : > { %s297_s18 = sshll.u32 %s290_s17, 4  ;;  %p11515_p1 = pneg %p10632_p0  ;;  %s10642_s18 = int_to_ptr.vmem [resolvable:$true] %s297_s18 }
  0x5f   : > { %s10640_s15 = scalar_lea.hbm %s11536_s5, %s9223_s10  ;;  %s10226_s13 = scalar_lea.hbm %s11536_s5, 114688 }
  0x60   : > { %s10221_s1 = scalar_lea.hbm %s10640_s15, 57344  ;;  %p10227_p3 = scmp.lt.u32.totalorder %s10640_s15, %s11536_s5 }
  0x61   : > { %p10222_p2 = scmp.ne.s32.totalorder %s10640_s15, %s10221_s1  ;;  %p10228_p5 = scmp.lt.u32.totalorder %s10226_s13, %s10221_s1 }
  0x62   : > { %p10230_p12 = scmp.lt.u32.totalorder %s10221_s1, %s10640_s15 }
  0x63   : > { %p10224_p6 = pnand %p11515_p1, %p10222_p2  ;;  %p10229_p9 = por %p10228_p5, %p10227_p3 }
  0x65   : > { %p10225_p10 = pneg %p10224_p6  ;;  %p10231_p7 = por %p10230_p12, %p10229_p9 }
  0x67   : > { %p10232_p4 = pnand %p10231_p7, %p10225_p10 }
  0x69   : > { %10235 = shalt.err (!%p10232_p4)
}
  0x6a   : > { %s10236_s22 = scalar_lea.vmem %s10642_s18, 57344  ;;  %s10449_s14 = smov [#allocation11]  }
  0x6b   : > { %p10237_p2 = scmp.ne.s32.totalorder %s10642_s18, %s10236_s22  ;;  %s10241_s17 = sshll.u32 %s10449_s14, 4  ;;  %s10242_s17 = int_to_ptr.vmem [resolvable:$false] %s10241_s17 }
  0x6c   : > { %s10243_s3 = scalar_lea.vmem %s10242_s17, 114688  ;;  %p10244_p11 = scmp.lt.s32.totalorder %s10642_s18, %s10242_s17 }
  0x6d   : > { %p10239_p6 = pnand %p10237_p2, %p11515_p1  ;;  %p10245_p3 = scmp.lt.s32.totalorder %s10243_s3, %s10236_s22 }
  0x6f   : > { %p10240_p8 = pneg %p10239_p6  ;;  %p10246_p5 = por %p10245_p3, %p10244_p11 }
  0x71   : > { %p10247_p9 = pnand %p10246_p5, %p10240_p8 }
  0x73   : > { %10250 = shalt.err (!%p10247_p9)
}
  0x74   : > { %s10450_s1 = smov 896   ;;  %s10451_s21 = smov 448  }
  0x75   : > { %s10452_s10 = smov 28   ;;  %s10453_s11 = smov [#allocation2]  }
  0x76   : > { %9460 = dma.hbm_to_vmem [thread:$0]  (!%p10632_p0), %s10640_s15, 57344, %s10642_s18, %s10644_s23, %s10450_s1, %s10451_s21, %s10452_s10  }
  0x77   : > { %s227_s13 = sshll.u32 %s10453_s11, 4  ;;  %s10454_s14 = smov [#allocation7]   ;;  %s228_s13 = int_to_ptr.vmem [resolvable:$true] %s227_s13 }
  0x78   : > { %s251_s5 = sshll.u32 %s10454_s14, 4  ;;  %s10251_s3 = scalar_lea.hbm %s11495_s0, 32  ;;  %s252_s5 = int_to_ptr.vmem [resolvable:$true] %s251_s5 }
  0x79   : > { %p10252_p4 = scmp.ne.s32.totalorder %s11495_s0, %s10251_s3  ;;  %p10258_p7 = scmp.lt.u32.totalorder %s10251_s3, %s11495_s0 }
  0x7b   : > { %p10254_p8 = pnand %p10252_p4, %p10565_p13 }
  0x7d   : > { %p10255_p11 = pneg %p10254_p8 }
  0x7f   : > { %p10260_p10 = pnand %p10258_p7, %p10255_p11 }
  0x81   : > { %10263 = shalt.err (!%p10260_p10)
}
  0x82   : > { %s10264_s15 = scalar_lea.vmem %s228_s13, 32  ;;  %p10272_p3 = scmp.lt.s32.totalorder %s228_s13, %s228_s13 }
  0x83   : > { %p10265_p12 = scmp.ne.s32.totalorder %s228_s13, %s10264_s15  ;;  %p10273_p5 = scmp.lt.s32.totalorder %s10264_s15, %s10264_s15 }
  0x85   : > { %p10267_p2 = pnand %p10265_p12, %p10565_p13  ;;  %p10274_p9 = por %p10273_p5, %p10272_p3 }
  0x87   : > { %p10268_p6 = pneg %p10267_p2 }
  0x89   : > { %p10275_p1 = pnand %p10274_p9, %p10268_p6 }
  0x8b   : > { %10278 = shalt.err (!%p10275_p1)
}
  0x8c   : > { %p11537_p4 = scmp.ne.s32.totalorder %s11527_s12, 0  ;;  %s10279_s18 = scalar_lea.hbm %s11497_s2, 128 }
  0x8d   : > { %p10280_p8 = scmp.ne.s32.totalorder %s11497_s2, %s10279_s18  ;;  %p10286_p1 = scmp.lt.u32.totalorder %s10279_s18, %s11497_s2 }
  0x8e   : > { %9444 = dma.hbm_to_vmem [thread:$0]  (!%p11537_p4), %s11495_s0, 32, %s228_s13, [#allocation3]  }
  0x8f   : > { %p10282_p11 = pnand %p10280_p8, %p10565_p13 }
  0x91   : > { %p10283_p7 = pneg %p10282_p11 }
  0x93   : > { %p10288_p10 = pnand %p10286_p1, %p10283_p7 }
  0x95   : > { %10291 = shalt.err (!%p10288_p10)
}
  0x96   : > { %s10292_s14 = scalar_lea.vmem %s252_s5, 128  ;;  %p10300_p3 = scmp.lt.s32.totalorder %s252_s5, %s252_s5 }
  0x97   : > { %p10293_p12 = scmp.ne.s32.totalorder %s252_s5, %s10292_s14  ;;  %p10301_p5 = scmp.lt.s32.totalorder %s10292_s14, %s10292_s14 }
  0x99   : > { %p10295_p2 = pnand %p10293_p12, %p10565_p13  ;;  %p10302_p9 = por %p10301_p5, %p10300_p3 }
  0x9b   : > { %p10296_p6 = pneg %p10295_p2 }
  0x9d   : > { %p10303_p0 = pnand %p10302_p9, %p10296_p6 }
  0x9f   : > { %10306 = shalt.err (!%p10303_p0)
}
  0xa0   : > { %9450 = dma.hbm_to_vmem [thread:$0]  (!%p11537_p4), %s11497_s2, 128, %s252_s5, [#allocation6]  }
  0xa1   : > { %s10455_s22 = smov [#allocation10]   ;;  %s11538_s15 = sand.u32 1, %s10439_s26  }
  0xa2   : > { %s275_s3 = sshll.u32 %s10455_s22, 4  ;;  %s9411_s8 = smul.u32 7, %s11538_s15  ;;  %s276_s3 = int_to_ptr.vmem [resolvable:$true] %s275_s3 }
  0xa3   : > { %s9224_s16 = smul.u32 112, %s10443_s27  ;;  %s10307_s18 = scalar_lea.hbm %s11499_s4, 128 }
  0xa4   : > { %p10308_p0 = scmp.ne.s32.totalorder %s11499_s4, %s10307_s18  ;;  %p10314_p7 = scmp.lt.u32.totalorder %s10307_s18, %s11499_s4 }
  0xa6   : > { %p10310_p8 = pnand %p10308_p0, %p10565_p13 }
  0xa8   : > { %p10311_p11 = pneg %p10310_p8 }
  0xaa   : > { %p10316_p1 = pnand %p10314_p7, %p10311_p11 }
  0xac   : > { %10319 = shalt.err (!%p10316_p1)
}
  0xad   : > { %s10320_s5 = scalar_lea.vmem %s276_s3, 128  ;;  %p10328_p6 = scmp.lt.s32.totalorder %s276_s3, %s276_s3 }
  0xae   : > { %p10321_p10 = scmp.ne.s32.totalorder %s276_s3, %s10320_s5  ;;  %p10329_p3 = scmp.lt.s32.totalorder %s10320_s5, %s10320_s5 }
  0xb0   : > { %p10323_p12 = pnand %p10321_p10, %p10565_p13  ;;  %p10330_p5 = por %p10329_p3, %p10328_p6 }
  0xb2   : > { %p10324_p2 = pneg %p10323_p12 }
  0xb4   : > { %p10331_p9 = pnand %p10330_p5, %p10324_p2 }
  0xb6   : > { %10334 = shalt.err (!%p10331_p9)
}
  0xb7   : > { %9456 = dma.hbm_to_vmem [thread:$0]  (!%p11537_p4), %s11499_s4, 128, %s276_s3, [#allocation9]  }
  0xb8   : > { %s10732_s15 = scalar_lea.hbm %s11501_s6, %s9224_s16  ;;  %s311_s20 = scalar_lea.vmem [#allocation13], %s9411_s8 }
  0xb9   : > { %s319_s7 = sshll.u32 %s311_s20, 4  ;;  %s10335_s24 = scalar_lea.hbm %s10732_s15, 112  ;;  %s320_s7 = int_to_ptr.vmem [resolvable:$true] %s319_s7 }
  0xba   : > { %p10336_p13 = scmp.ne.s32.totalorder %s10732_s15, %s10335_s24  ;;  %p11539_p0 = scmp.ne.s32.totalorder %s11535_s29, 0 }
  0xbb   : > { %s10340_s18 = scalar_lea.hbm %s11501_s6, 224  ;;  %p10341_p4 = scmp.lt.u32.totalorder %s10732_s15, %s11501_s6 }
  0xbc   : > { %p11540_p8 = pneg %p11539_p0  ;;  %p10342_p1 = scmp.lt.u32.totalorder %s10340_s18, %s10335_s24 }
  0xbd   : > { %p10344_p12 = scmp.lt.u32.totalorder %s10335_s24, %s10732_s15 }
  0xbe   : > { %p10338_p11 = pnand %p10336_p13, %p11540_p8  ;;  %p10343_p10 = por %p10342_p1, %p10341_p4 }
  0xc0   : > { %p10339_p7 = pneg %p10338_p11  ;;  %p10345_p2 = por %p10344_p12, %p10343_p10 }
  0xc2   : > { %p10346_p6 = pnand %p10345_p2, %p10339_p7 }
  0xc4   : > { %10349 = shalt.err (!%p10346_p6)
}
  0xc5   : > { %s10350_s8 = scalar_lea.vmem %s320_s7, 112  ;;  %p11541_p5 = pmov %p11540_p8 }
  0xc6   : > { %p10351_p3 = scmp.ne.s32.totalorder %s320_s7, %s10350_s8  ;;  %s10456_s21 = smov [#allocation13]  }
  0xc7   : > { %s10355_s10 = sshll.u32 %s10456_s21, 4  ;;  %s10356_s10 = int_to_ptr.vmem [resolvable:$false] %s10355_s10 }
  0xc8   : > { %p10353_p9 = pnand %p10351_p3, %p11541_p5  ;;  %s10357_s11 = scalar_lea.vmem %s10356_s10, 224 }
  0xc9   : > { %p10358_p8 = scmp.lt.s32.totalorder %s320_s7, %s10356_s10  ;;  %p10359_p11 = scmp.lt.s32.totalorder %s10357_s11, %s10350_s8 }
  0xca   : > { %p10354_p13 = pneg %p10353_p9 }
  0xcb   : > { %p10360_p1 = por %p10359_p11, %p10358_p8 }
  0xcd   : > { %p10361_p4 = pnand %p10360_p1, %p10354_p13 }
  0xcf   : > { %10364 = shalt.err (!%p10361_p4)
}
  0xd0   : > { %9463 = dma.hbm_to_vmem [thread:$0]  (!%p11539_p0), %s10732_s15, 112, %s320_s7, %s10644_s23  }
  0xd1   : > { %p11542_p7 = scmp.ne.s32.totalorder %s11526_s9, 0 }
  0xd2   : > { %p11543_p10 = scmp.eq.s32.totalorder (!%p11542_p7), %s10521_s28, 0 }
  0xd3   : > { %328 = sbr.rel (%p11542_p7) target bundleno = 1687 (0x697), region = 48 }
  0xda   : > { %10410 = dma.done.wait (%p11543_p10), [#allocation3], 32   ;;  %p11544_p12 = pmov %p11543_p10 }
  0xdb   : > { %p11545_p2 = pmov %p11543_p10 }
  0xdc   : > { %10412 = vsyncadd (%p11544_p12), [#allocation3], 4294967264 }
  0xdd   : > { %10414 = dma.done.wait (%p11545_p2), [#allocation6], 2176   ;;  %p11546_p6 = pmov %p11545_p2 }
  0xde   : > { %p11547_p3 = pmov %p11545_p2 }
  0xdf   : > { %10416 = vsyncadd (%p11546_p6), [#allocation6], 4294965120 }
  0xe0   : > { %10418 = dma.done.wait (%p11547_p3), [#allocation9], 65664   ;;  %p11548_p0 = pmov %p11545_p2 }
  0xe1   : > { %s350_s9 = sand.u32 1, %s10521_s28   ;;  %s10770_s23 = sand.u32 1, %s10435_s25  }
  0xe2   : > { %10420 = vsyncadd (%p11548_p0), [#allocation9], 4294901632  ;;  %s9412_s29 = smul.u32 3584, %s10770_s23  ;;  %s351_s5 = scalar_lea.sflag [#allocation12], %s350_s9 }
  0xe3   : > { %p11549_p5 = scmp.ne.s32.totalorder %s11523_s30, 0 }
  0xe4   : > { %s10773_s14 = scalar_lea.vmem [#allocation11], %s9412_s29 }
  0xe5   : > { %10422 = dma.done.wait (%p11549_p5), %s351_s5, 57456  }
  0xe6   : > { %10424 = vsyncadd (%p11549_p5), %s351_s5, 4294909840  ;;  %v10457_v0 = vmov 0   ;;  %v405_v1 = vld [vmem:[#allocation5] sm:$0xff]  ;;  %v406_v3 = vld [vmem:[#allocation5 + $0x8] sm:$0xff]  ;;  %vm543_vm0 = vcmask 261120   ;;  %s9413_s30 = smul.u32 7, %s10770_s23 }
  0xe7   : > { %579 = vmatprep.mubr.bf16.mxu0 %v10457_v0  ;;  %620 = vmatprep.mubr.bf16.mxu1 %v10457_v0  ;;  %v409_v2 = vld [vmem:[#allocation5 + $0x20] sm:$0xff]  ;;  %v410_v5 = vld [vmem:[#allocation5 + $0x28] sm:$0xff]  ;;  %v407_v15 = vld [vmem:[#allocation5 + $0x10] sm:$0xff]  ;;  %s9414_s17 = smul.u32 14, %s10770_s23  ;;  %s11550_s12 = sld [smem:[#allocation27_spill]] }
  0xe8   : > { %v8241_v4 = vcombine.high %v405_v1, %v409_v2  ;;  %v8240_v6 = vcombine.low %v405_v1, %v409_v2  ;;  %v413_v7 = vld [vmem:[#allocation5 + $0x40] sm:$0xff]  ;;  %v8243_v9 = vcombine.high %v406_v3, %v410_v5  ;;  %v8242_v10 = vcombine.low %v406_v3, %v410_v5  ;;  %v414_v12 = vld [vmem:[#allocation5 + $0x48] sm:$0xff]  ;;  %v411_v16 = vld [vmem:[#allocation5 + $0x30] sm:$0xff]  ;;  %s363_s13 = scalar_lea.vmem [#allocation13], %s9413_s30  ;;  %s9225_s15 = smul.u32 224, %s10521_s28 }
  0xe9   : > { %v417_v8 = vld [vmem:[#allocation5 + $0x60] sm:$0xff]  ;;  %v418_v13 = vld [vmem:[#allocation5 + $0x68] sm:$0xff]  ;;  %v403_v18 = vld [vmem:[#allocation2] sm:$0x3]  ;;  %v8245_v22 = vcombine.high %v407_v15, %v411_v16  ;;  %v8244_v27 = vcombine.low %v407_v15, %v411_v16  ;;  %s11436_s22 = scalar_lea.vmem [#allocation14], %s9414_s17  ;;  %s8070_s18 = scalar_lea.sflag [#allocation4], %s10770_s23 }
  0xea   : > { %v8249_v11 = vcombine.high %v413_v7, %v417_v8  ;;  %547 = vmatprep.subr.bf16.mxu0 %v8241_v4  ;;  %v8251_v14 = vcombine.high %v414_v12, %v418_v13  ;;  %588 = vmatprep.subr.bf16.mxu1 %v8243_v9  ;;  %v8248_v17 = vcombine.low %v413_v7, %v417_v8  ;;  %v408_v19 = vld [vmem:[#allocation5 + $0x18] sm:$0xff]  ;;  %v415_v23 = vld [vmem:[#allocation5 + $0x50] sm:$0xff]  ;;  %v855_v32 = vld [vmem:[#allocation8 + $0x400] sm:$0xff]  ;;  %s8084_s20 = sshll.u32 %s11436_s22, 4  ;;  %p11551_p13 = scmp.ne.s32.totalorder %s11533_s19, 0  ;;  %s11452_s20 = int_to_ptr.vmem [resolvable:$true] %s8084_s20 }
  0xeb   : > { %548 = vmatpush1.bf16.msra.mxu0 %v8240_v6  ;;  %v412_v20 = vld [vmem:[#allocation5 + $0x38] sm:$0xff]  ;;  %589 = vmatpush1.bf16.msra.mxu1 %v8242_v10  ;;  %v8250_v21 = vcombine.low %v414_v12, %v418_v13  ;;  %v419_v24 = vld [vmem:[#allocation5 + $0x70] sm:$0xff]  ;;  %v404_v26 = vpack.c.bf16 %v403_v18, %v403_v18  ;;  %v859_v33 = vld [vmem:[#allocation8 + $0x420] sm:$0xff]  ;;  %s10365_s1 = scalar_lea.vmem %s11452_s20, 224  ;;  %s10459_s28 = smov [#allocation14]  }
  0xec   : > { %549 = vmatprep.subr.bf16.mxu0 %v8249_v11  ;;  %590 = vmatprep.subr.bf16.mxu1 %v8251_v14  ;;  %v8247_v25 = vcombine.high %v408_v19, %v412_v20  ;;  %v416_v28 = vld [vmem:[#allocation5 + $0x58] sm:$0xff]  ;;  %v8253_v30 = vcombine.high %v415_v23, %v419_v24  ;;  %v8246_v31 = vcombine.low %v408_v19, %v412_v20  ;;  %v727_v36 = vld [vmem:[#allocation8] sm:$0xff]  ;;  %p10366_p9 = scmp.ne.s32.totalorder %s11452_s20, %s10365_s1  ;;  %s10369_s16 = sshll.u32 %s10459_s28, 4  ;;  %s10370_s16 = int_to_ptr.vmem [resolvable:$false] %s10369_s16 }
  0xed   : > { %v420_v29 = vld [vmem:[#allocation5 + $0x78] sm:$0xff]  ;;  %v8252_v35 = vcombine.low %v415_v23, %v419_v24  ;;  %v731_v37 = vld [vmem:[#allocation8 + $0x20] sm:$0xff]  ;;  %v8389_v38 = vcombine.high %v855_v32, %v859_v33  ;;  %v8388_v43 = vcombine.low %v855_v32, %v859_v33  ;;  %s11450_s3 = scalar_lea.hbm %s11550_s12, %s9225_s15  ;;  %s10371_s8 = scalar_lea.vmem %s10370_s16, 448 }
  0xee   : > { %v8255_v34 = vcombine.high %v416_v28, %v420_v29  ;;  %v8254_v39 = vcombine.low %v416_v28, %v420_v29  ;;  %v863_v40 = vld [vmem:[#allocation8 + $0x440] sm:$0xff]  ;;  %v8261_v42 = vcombine.high %v727_v36, %v731_v37  ;;  %v8260_v47 = vcombine.low %v727_v36, %v731_v37  ;;  %p10367_p8 = pnand %p10366_p9, %p11551_p13  ;;  %p10372_p1 = scmp.lt.s32.totalorder %s11452_s20, %s10370_s16 }
  0xef   : > { %550 = vmatpush1.bf16.msra.mxu0 %v8248_v17  ;;  %591 = vmatpush1.bf16.msra.mxu1 %v8250_v21  ;;  %v867_v41 = vld [vmem:[#allocation8 + $0x460] sm:$0xff]  ;;  %p10373_p4 = scmp.lt.s32.totalorder %s10371_s8, %s10365_s1 }
  0xf0   : > { %629 = vmatprep.subr.bf16.mxu0 %v8245_v22  ;;  %670 = vmatprep.subr.bf16.mxu1 %v8247_v25  ;;  %v735_v44 = vld [vmem:[#allocation8 + $0x40] sm:$0xff]  ;;  %v8397_v46 = vcombine.high %v863_v40, %v867_v41  ;;  %v8396_v51 = vcombine.low %v863_v40, %v867_v41  ;;  %p10368_p11 = pneg %p10367_p8 }
  0xf1   : > { %v739_v45 = vld [vmem:[#allocation8 + $0x60] sm:$0xff]  ;;  %p10374_p7 = por %p10373_p4, %p10372_p1 }
  0xf2   : > { %8256 = vmatmul.mubr.msk.bf16.vlgmr.msra.gmra.mrb[0].mxu0 %vm543_vm0, %v404_v26  ;;  %8257 = vmatmul.mubr.msk.bf16.vlgmr.msra.gmra.mrb[0].mxu1 %vm543_vm0, %v404_v26  ;;  %v871_v48 = vld [vmem:[#allocation8 + $0x480] sm:$0xff]  ;;  %v8269_v50 = vcombine.high %v735_v44, %v739_v45  ;;  %v8268_v55 = vcombine.low %v735_v44, %v739_v45 }
  0xf3   : > { %630 = vmatpush1.bf16.msra.mxu0 %v8244_v27  ;;  %661 = vmatprep.mubr.bf16.mxu0 %v10457_v0  ;;  %v875_v49 = vld [vmem:[#allocation8 + $0x4a0] sm:$0xff]  ;;  %p10375_p10 = pnand %p10374_p7, %p10368_p11 }
  0xf4   : > { %631 = vmatprep.subr.bf16.mxu0 %v8253_v30  ;;  %671 = vmatpush1.bf16.msra.mxu1 %v8246_v31  ;;  %v743_v52 = vld [vmem:[#allocation8 + $0x80] sm:$0xff]  ;;  %v8405_v54 = vcombine.high %v871_v48, %v875_v49  ;;  %v8404_v61 = vcombine.low %v871_v48, %v875_v49 }
  0xf5   : > { %702 = vmatprep.mubr.bf16.mxu1 %v10457_v0  ;;  %672 = vmatprep.subr.bf16.mxu1 %v8255_v34  ;;  %v747_v53 = vld [vmem:[#allocation8 + $0xa0] sm:$0xff] }
  0xf6   : > { %v879_v56 = vld [vmem:[#allocation8 + $0x4c0] sm:$0xff]  ;;  %v8277_v58 = vcombine.high %v743_v52, %v747_v53  ;;  %v8276_v1 = vcombine.low %v743_v52, %v747_v53 }
  0xf7   : > { %632 = vmatpush1.bf16.msra.mxu0 %v8252_v35  ;;  %v883_v57 = vld [vmem:[#allocation8 + $0x4e0] sm:$0xff] }
  0xf8   : > { %3882 = vmatprep.subr.bf16.mxu0 %v8389_v38  ;;  %673 = vmatpush1.bf16.msra.mxu1 %v8254_v39  ;;  %v751_v59 = vld [vmem:[#allocation8 + $0xc0] sm:$0xff]  ;;  %v8413_v0 = vcombine.high %v879_v56, %v883_v57  ;;  %v8412_v5 = vcombine.low %v879_v56, %v883_v57 }
  0xf9   : > { %3841 = vmatprep.subr.bf16.mxu1 %v8261_v42  ;;  %v755_v60 = vld [vmem:[#allocation8 + $0xe0] sm:$0xff] }
  0xfa   : > { %8258 = vmatmul.mubr.msk.bf16.vlgmr.msra.gmra.mrb[4].mxu0 %vm543_vm0, %v404_v26  ;;  %v887_v62 = vld [vmem:[#allocation8 + $0x500] sm:$0xff]  ;;  %v8285_v4 = vcombine.high %v751_v59, %v755_v60  ;;  %v8284_v9 = vcombine.low %v751_v59, %v755_v60 }
  0xfb   : > { %3883 = vmatpush1.bf16.msra.mxu0 %v8388_v43  ;;  %8259 = vmatmul.mubr.msk.bf16.vlgmr.msra.gmra.mrb[4].mxu1 %vm543_vm0, %v404_v26  ;;  %v891_v63 = vld [vmem:[#allocation8 + $0x520] sm:$0xff] }
  0xfc   : > { %3884 = vmatprep.subr.bf16.mxu0 %v8397_v46  ;;  %3842 = vmatpush1.bf16.msra.mxu1 %v8260_v47  ;;  %v759_v2 = vld [vmem:[#allocation8 + $0x100] sm:$0xff]  ;;  %v8421_v8 = vcombine.high %v887_v62, %v891_v63  ;;  %v8420_v13 = vcombine.low %v887_v62, %v891_v63 }
  0xfd   : > { %3843 = vmatprep.subr.bf16.mxu1 %v8269_v50  ;;  %v763_v3 = vld [vmem:[#allocation8 + $0x120] sm:$0xff] }
  0xfe   : > { %v895_v6 = vld [vmem:[#allocation8 + $0x540] sm:$0xff]  ;;  %v8293_v12 = vcombine.high %v759_v2, %v763_v3  ;;  %v8292_v17 = vcombine.low %v759_v2, %v763_v3 }
  0xff   : > { %3885 = vmatpush1.bf16.msra.mxu0 %v8396_v51  ;;  %v899_v7 = vld [vmem:[#allocation8 + $0x560] sm:$0xff] }
 0x100   : > { %3886 = vmatprep.subr.bf16.mxu0 %v8405_v54  ;;  %3844 = vmatpush1.bf16.msra.mxu1 %v8268_v55  ;;  %v767_v10 = vld [vmem:[#allocation8 + $0x140] sm:$0xff]  ;;  %v8429_v16 = vcombine.high %v895_v6, %v899_v7  ;;  %v8428_v21 = vcombine.low %v895_v6, %v899_v7 }
 0x101   : > { %3845 = vmatprep.subr.bf16.mxu1 %v8277_v58  ;;  %v771_v11 = vld [vmem:[#allocation8 + $0x160] sm:$0xff] }
 0x102   : > { %v903_v14 = vld [vmem:[#allocation8 + $0x580] sm:$0xff]  ;;  %v8301_v20 = vcombine.high %v767_v10, %v771_v11  ;;  %v8300_v25 = vcombine.low %v767_v10, %v771_v11 }
 0x103   : > { %3887 = vmatpush1.bf16.msra.mxu0 %v8404_v61  ;;  %v907_v15 = vld [vmem:[#allocation8 + $0x5a0] sm:$0xff] }
 0x104   : > { %3888 = vmatprep.subr.bf16.mxu0 %v8413_v0  ;;  %3846 = vmatpush1.bf16.msra.mxu1 %v8276_v1  ;;  %v775_v18 = vld [vmem:[#allocation8 + $0x180] sm:$0xff]  ;;  %v8437_v24 = vcombine.high %v903_v14, %v907_v15  ;;  %v8436_v29 = vcombine.low %v903_v14, %v907_v15 }
 0x105   : > { %3847 = vmatprep.subr.bf16.mxu1 %v8285_v4  ;;  %v779_v19 = vld [vmem:[#allocation8 + $0x1a0] sm:$0xff] }
 0x106   : > { %v911_v22 = vld [vmem:[#allocation8 + $0x5c0] sm:$0xff]  ;;  %v8309_v28 = vcombine.high %v775_v18, %v779_v19  ;;  %v8308_v33 = vcombine.low %v775_v18, %v779_v19 }
 0x107   : > { %3889 = vmatpush1.bf16.msra.mxu0 %v8412_v5  ;;  %v915_v23 = vld [vmem:[#allocation8 + $0x5e0] sm:$0xff] }
 0x108   : > { %3890 = vmatprep.subr.bf16.mxu0 %v8421_v8  ;;  %3848 = vmatpush1.bf16.msra.mxu1 %v8284_v9  ;;  %v783_v26 = vld [vmem:[#allocation8 + $0x1c0] sm:$0xff]  ;;  %v8445_v32 = vcombine.high %v911_v22, %v915_v23  ;;  %v8444_v37 = vcombine.low %v911_v22, %v915_v23 }
 0x109   : > { %3849 = vmatprep.subr.bf16.mxu1 %v8293_v12  ;;  %v787_v27 = vld [vmem:[#allocation8 + $0x1e0] sm:$0xff] }
 0x10a   : > { %v919_v30 = vld [vmem:[#allocation8 + $0x600] sm:$0xff]  ;;  %v8317_v36 = vcombine.high %v783_v26, %v787_v27  ;;  %v8316_v41 = vcombine.low %v783_v26, %v787_v27 }
 0x10b   : > { %3891 = vmatpush1.bf16.msra.mxu0 %v8420_v13  ;;  %v923_v31 = vld [vmem:[#allocation8 + $0x620] sm:$0xff] }
 0x10c   : > { %3892 = vmatprep.subr.bf16.mxu0 %v8429_v16  ;;  %3850 = vmatpush1.bf16.msra.mxu1 %v8292_v17  ;;  %v791_v34 = vld [vmem:[#allocation8 + $0x200] sm:$0xff]  ;;  %v8453_v40 = vcombine.high %v919_v30, %v923_v31  ;;  %v8452_v45 = vcombine.low %v919_v30, %v923_v31 }
 0x10d   : > { %3851 = vmatprep.subr.bf16.mxu1 %v8301_v20  ;;  %v795_v35 = vld [vmem:[#allocation8 + $0x220] sm:$0xff] }
 0x10e   : > { %v927_v38 = vld [vmem:[#allocation8 + $0x640] sm:$0xff]  ;;  %v8325_v44 = vcombine.high %v791_v34, %v795_v35  ;;  %v8324_v49 = vcombine.low %v791_v34, %v795_v35 }
 0x10f   : > { %3893 = vmatpush1.bf16.msra.mxu0 %v8428_v21  ;;  %v931_v39 = vld [vmem:[#allocation8 + $0x660] sm:$0xff] }
 0x110   : > { %3894 = vmatprep.subr.bf16.mxu0 %v8437_v24  ;;  %3852 = vmatpush1.bf16.msra.mxu1 %v8300_v25  ;;  %v799_v42 = vld [vmem:[#allocation8 + $0x240] sm:$0xff]  ;;  %v8461_v48 = vcombine.high %v927_v38, %v931_v39  ;;  %v8460_v53 = vcombine.low %v927_v38, %v931_v39  ;;  %v732_v39 = vld [vmem:[#allocation8 + $0x28] sm:$0xff] }
 0x111   : > { %3853 = vmatprep.subr.bf16.mxu1 %v8309_v28  ;;  %v803_v43 = vld [vmem:[#allocation8 + $0x260] sm:$0xff] }
 0x112   : > { %v935_v46 = vld [vmem:[#allocation8 + $0x680] sm:$0xff]  ;;  %v8333_v52 = vcombine.high %v799_v42, %v803_v43  ;;  %v8332_v57 = vcombine.low %v799_v42, %v803_v43  ;;  %v423_v43 = vlaneseq }
 0x113   : > { %3895 = vmatpush1.bf16.msra.mxu0 %v8436_v29  ;;  %v939_v47 = vld [vmem:[#allocation8 + $0x6a0] sm:$0xff] }
 0x114   : > { %3896 = vmatprep.subr.bf16.mxu0 %v8445_v32  ;;  %3854 = vmatpush1.bf16.msra.mxu1 %v8308_v33  ;;  %v807_v50 = vld [vmem:[#allocation8 + $0x280] sm:$0xff]  ;;  %v8469_v56 = vcombine.high %v935_v46, %v939_v47  ;;  %v8468_v61 = vcombine.low %v935_v46, %v939_v47 }
 0x115   : > { %3855 = vmatprep.subr.bf16.mxu1 %v8317_v36  ;;  %v811_v51 = vld [vmem:[#allocation8 + $0x2a0] sm:$0xff] }
 0x116   : > { %v943_v54 = vld [vmem:[#allocation8 + $0x6c0] sm:$0xff]  ;;  %v8341_v60 = vcombine.high %v807_v50, %v811_v51  ;;  %v8340_v1 = vcombine.low %v807_v50, %v811_v51 }
 0x117   : > { %3897 = vmatpush1.bf16.msra.mxu0 %v8444_v37  ;;  %v947_v55 = vld [vmem:[#allocation8 + $0x6e0] sm:$0xff]  ;;  %v728_v37 = vld [vmem:[#allocation8 + $0x8] sm:$0xff] }
 0x118   : > { %3898 = vmatprep.subr.bf16.mxu0 %v8453_v40  ;;  %3856 = vmatpush1.bf16.msra.mxu1 %v8316_v41  ;;  %v815_v58 = vld [vmem:[#allocation8 + $0x2c0] sm:$0xff]  ;;  %v8477_v0 = vcombine.high %v943_v54, %v947_v55  ;;  %v8476_v5 = vcombine.low %v943_v54, %v947_v55  ;;  %v8262_v41 = vcombine.low %v728_v37, %v732_v39 }
 0x119   : > { %3857 = vmatprep.subr.bf16.mxu1 %v8325_v44  ;;  %v819_v59 = vld [vmem:[#allocation8 + $0x2e0] sm:$0xff]  ;;  %v8263_v42 = vcombine.high %v728_v37, %v732_v39  ;;  %v10791_v44 = vshrl.u32 %v423_v43, 7 }
 0x11a   : > { %v951_v62 = vld [vmem:[#allocation8 + $0x700] sm:$0xff]  ;;  %v8349_v4 = vcombine.high %v815_v58, %v819_v59  ;;  %v8348_v9 = vcombine.low %v815_v58, %v819_v59 }
 0x11b   : > { %3899 = vmatpush1.bf16.msra.mxu0 %v8452_v45  ;;  %v955_v63 = vld [vmem:[#allocation8 + $0x720] sm:$0xff]  ;;  %v10793_v45 = vld [vmem:[#allocation7] sm:$0xff]  ;;  %v10796_v46 = vsub.s32 0, %v10791_v44  ;;  %v10799_v47 = vsub.s32 2, %v10791_v44  ;;  %v10816_v55 = vsub.s32 5, %v10791_v44 }
 0x11c   : > { %3900 = vmatprep.subr.bf16.mxu0 %v8461_v48  ;;  %3858 = vmatpush1.bf16.msra.mxu1 %v8324_v49  ;;  %v823_v2 = vld [vmem:[#allocation8 + $0x300] sm:$0xff]  ;;  %v8485_v8 = vcombine.high %v951_v62, %v955_v63  ;;  %v8484_v13 = vcombine.low %v951_v62, %v955_v63  ;;  %v10802_v48 = vsub.s32 1, %v10791_v44  ;;  %v10805_v49 = vsub.s32 3, %v10791_v44 }
 0x11d   : > { %3859 = vmatprep.subr.bf16.mxu1 %v8333_v52  ;;  %v827_v3 = vld [vmem:[#allocation8 + $0x320] sm:$0xff]  ;;  %v426_v50 = vrot.slane %v10793_v45, %v10796_v46  ;;  %v434_v51 = vrot.slane %v10793_v45, %v10799_v47 }
 0x11e   : > { %v959_v6 = vld [vmem:[#allocation8 + $0x740] sm:$0xff]  ;;  %v8357_v12 = vcombine.high %v823_v2, %v827_v3  ;;  %v8356_v15 = vcombine.low %v823_v2, %v827_v3  ;;  %v430_v52 = vrot.slane %v10793_v45, %v10802_v48 }
 0x11f   : > { %3901 = vmatpush1.bf16.msra.mxu0 %v8460_v53  ;;  %v963_v7 = vld [vmem:[#allocation8 + $0x760] sm:$0xff]  ;;  %v438_v53 = vrot.slane %v10793_v45, %v10805_v49 }
 0x120   : > { %3902 = vmatprep.subr.bf16.mxu0 %v8469_v56  ;;  %3860 = vmatpush1.bf16.msra.mxu1 %v8332_v57  ;;  %v831_v10 = vld [vmem:[#allocation8 + $0x340] sm:$0xff]  ;;  %v8493_v14 = vcombine.high %v959_v6, %v963_v7  ;;  %v8492_v17 = vcombine.low %v959_v6, %v963_v7 }
 0x121   : > { %3861 = vmatprep.subr.bf16.mxu1 %v8341_v60  ;;  %v835_v11 = vld [vmem:[#allocation8 + $0x360] sm:$0xff] }
 0x122   : > { %v8365_v16 = vcombine.high %v831_v10, %v835_v11  ;;  %v8364_v18 = vcombine.low %v831_v10, %v835_v11  ;;  %v839_v19 = vld [vmem:[#allocation8 + $0x380] sm:$0xff] }
 0x123   : > { %3903 = vmatpush1.bf16.msra.mxu0 %v8468_v61  ;;  %v843_v20 = vld [vmem:[#allocation8 + $0x3a0] sm:$0xff] }
 0x124   : > { %3904 = vmatprep.subr.bf16.mxu0 %v8477_v0  ;;  %3862 = vmatpush1.bf16.msra.mxu1 %v8340_v1  ;;  %v967_v21 = vld [vmem:[#allocation8 + $0x780] sm:$0xff]  ;;  %v8373_v22 = vcombine.high %v839_v19, %v843_v20  ;;  %v8372_v24 = vcombine.low %v839_v19, %v843_v20 }
 0x125   : > { %3863 = vmatprep.subr.bf16.mxu1 %v8349_v4  ;;  %v971_v23 = vld [vmem:[#allocation8 + $0x7a0] sm:$0xff]  ;;  %v736_v4 = vld [vmem:[#allocation8 + $0x48] sm:$0xff] }
 0x126   : > { %v8500_v25 = vcombine.low %v967_v21, %v971_v23  ;;  %v8501_v26 = vcombine.high %v967_v21, %v971_v23  ;;  %v847_v27 = vld [vmem:[#allocation8 + $0x3c0] sm:$0xff]  ;;  %v748_v21 = vld [vmem:[#allocation8 + $0xa8] sm:$0xff] }
 0x127   : > { %3905 = vmatpush1.bf16.msra.mxu0 %v8476_v5  ;;  %v851_v28 = vld [vmem:[#allocation8 + $0x3e0] sm:$0xff] }
 0x128   : > { %3906 = vmatprep.subr.bf16.mxu0 %v8485_v8  ;;  %3864 = vmatpush1.bf16.msra.mxu1 %v8348_v9  ;;  %v975_v29 = vld [vmem:[#allocation8 + $0x7c0] sm:$0xff]  ;;  %v8381_v30 = vcombine.high %v847_v27, %v851_v28  ;;  %v8380_v32 = vcombine.low %v847_v27, %v851_v28  ;;  %v740_v8 = vld [vmem:[#allocation8 + $0x68] sm:$0xff] }
 0x129   : > { %3865 = vmatprep.subr.bf16.mxu1 %v8357_v12  ;;  %v979_v31 = vld [vmem:[#allocation8 + $0x7e0] sm:$0xff]  ;;  %v8271_v20 = vcombine.high %v736_v4, %v740_v8 }
 0x12a   : > { %v8508_v33 = vcombine.low %v975_v29, %v979_v31  ;;  %v8509_v34 = vcombine.high %v975_v29, %v979_v31  ;;  %v10783_v35 = vld [vmem:[#allocation8 + $0x800] sm:$0xff] }
 0x12b   : > { %3907 = vmatpush1.bf16.msra.mxu0 %v8484_v13  ;;  %v10785_v36 = vld [vmem:[#allocation8 + $0x820] sm:$0xff]  ;;  %v446_v13 = vrot.slane %v10793_v45, %v10816_v55 }
 0x12c   : > { %3908 = vmatprep.subr.bf16.mxu0 %v8493_v14  ;;  %3866 = vmatpush1.bf16.msra.mxu1 %v8356_v15  ;;  %v8517_v38 = vcombine.high %v10783_v35, %v10785_v36  ;;  %v8516_v40 = vcombine.low %v10783_v35, %v10785_v36  ;;  %v991_v2 = vld [vmem:[#allocation8 + $0x840] sm:$0xff]  ;;  %v756_v35 = vld [vmem:[#allocation8 + $0xe8] sm:$0xff] }
 0x12d   : > { %3867 = vmatprep.subr.bf16.mxu1 %v8365_v16  ;;  %v995_v3 = vld [vmem:[#allocation8 + $0x860] sm:$0xff] }
 0x12e   : > { %v999_v16 = vld [vmem:[#allocation8 + $0x880] sm:$0xff]  ;;  %v8525_v19 = vcombine.high %v991_v2, %v995_v3  ;;  %v8524_v28 = vcombine.low %v991_v2, %v995_v3 }
 0x12f   : > { %3909 = vmatpush1.bf16.msra.mxu0 %v8492_v17  ;;  %v1003_v17 = vld [vmem:[#allocation8 + $0x8a0] sm:$0xff] }
 0x130   : > { %3868 = vmatpush1.bf16.msra.mxu1 %v8364_v18  ;;  %3910 = vmatprep.subr.bf16.mxu0 %v8501_v26  ;;  %v744_v18 = vld [vmem:[#allocation8 + $0x88] sm:$0xff]  ;;  %v1031_v3 = vld [vmem:[#allocation8 + $0x980] sm:$0xff] }
 0x131   : > { %3869 = vmatprep.subr.bf16.mxu1 %v8373_v22  ;;  %v8279_v29 = vcombine.high %v744_v18, %v748_v21 }
 0x133   : > { %3911 = vmatpush1.bf16.msra.mxu0 %v8500_v25 }
 0x134   : > { %3870 = vmatpush1.bf16.msra.mxu1 %v8372_v24  ;;  %3912 = vmatprep.subr.bf16.mxu0 %v8509_v34  ;;  %v8270_v24 = vcombine.low %v736_v4, %v740_v8  ;;  %v752_v34 = vld [vmem:[#allocation8 + $0xc8] sm:$0xff] }
 0x135   : > { %3871 = vmatprep.subr.bf16.mxu1 %v8381_v30  ;;  %v8287_v43 = vcombine.high %v752_v34, %v756_v35  ;;  %v776_v4 = vld [vmem:[#allocation8 + $0x188] sm:$0xff] }
 0x137   : > { %3913 = vmatpush1.bf16.msra.mxu0 %v8508_v33  ;;  %v1007_v33 = vld [vmem:[#allocation8 + $0x8c0] sm:$0xff] }
 0x138   : > { %3872 = vmatpush1.bf16.msra.mxu1 %v8380_v32  ;;  %3923 = vmatprep.subr.bf16.mxu0 %v8517_v38  ;;  %v8533_v32 = vcombine.high %v999_v16, %v1003_v17  ;;  %v1011_v38 = vld [vmem:[#allocation8 + $0x8e0] sm:$0xff] }
 0x139   : > { %4005 = vmatprep.subr.bf16.mxu1 %v8263_v42  ;;  %v8532_v42 = vcombine.low %v999_v16, %v1003_v17  ;;  %v784_v16 = vld [vmem:[#allocation8 + $0x1c8] sm:$0xff] }
 0x13a   : > { %v788_v17 = vld [vmem:[#allocation8 + $0x1e8] sm:$0xff] }
 0x1c5   : > { %v581_v54 = vpop.f32.mrb[0].mxu0  ;;  %v622_v57 = vpop.f32.mrb[0].mxu1 }
 0x1c6   : > { %v582_v56 = vadd.f32 %v581_v54, %v426_v50  ;;  %v583_v58 = vpop.f32.mrb[1].mxu0  ;;  %v623_v59 = vadd.f32 %v622_v57, %v434_v51  ;;  %v624_v61 = vpop.f32.mrb[1].mxu1  ;;  %v1015_v50 = vld [vmem:[#allocation8 + $0x900] sm:$0xff]  ;;  %v764_v54 = vld [vmem:[#allocation8 + $0x128] sm:$0xff]  ;;  %v8540_v57 = vcombine.low %v1007_v33, %v1011_v38 }
 0x1c7   : > { %v584_v60 = vadd.f32 %v583_v58, %v430_v52  ;;  %v585_v62 = vpop.f32.mrb[2].mxu0  ;;  %v625_v0 = vadd.f32 %v624_v61, %v438_v53  ;;  %v626_v5 = vpop.f32.mrb[2].mxu1  ;;  %v1019_v51 = vld [vmem:[#allocation8 + $0x920] sm:$0xff]  ;;  %v760_v52 = vld [vmem:[#allocation8 + $0x108] sm:$0xff]  ;;  %v8541_v53 = vcombine.high %v1007_v33, %v1011_v38 }
 0x1c8   : > { %v711_v63 = vmax.f32 %v582_v56, 0.0  ;;  %v586_v1 = vpop.f32.mrb[3].mxu0  ;;  %v713_v6 = vmax.f32 %v623_v59, 0.0  ;;  %v627_v9 = vpop.f32.mrb[3].mxu1  ;;  %v8286_v56 = vcombine.low %v752_v34, %v756_v35  ;;  %v8295_v58 = vcombine.high %v760_v52, %v764_v54  ;;  %v1023_v59 = vld [vmem:[#allocation8 + $0x940] sm:$0xff]  ;;  %v768_v61 = vld [vmem:[#allocation8 + $0x148] sm:$0xff] }
 0x1c9   : > { %v712_v7 = vmax.f32 %v584_v60, 0.0  ;;  %v714_v10 = vmax.f32 %v625_v0, 0.0  ;;  %v1027_v60 = vld [vmem:[#allocation8 + $0x960] sm:$0xff]  ;;  %v8549_v62 = vcombine.high %v1015_v50, %v1019_v51  ;;  %v8294_v0 = vcombine.low %v760_v52, %v764_v54  ;;  %v800_v35 = vld [vmem:[#allocation8 + $0x248] sm:$0xff] }
 0x1ca   : > { %v10818_v11 = vpack.c.bf16 %v713_v6, %v713_v6  ;;  %v10824_v14 = vpack.c.bf16 %v711_v63, %v711_v63  ;;  %v772_v63 = vld [vmem:[#allocation8 + $0x168] sm:$0xff]  ;;  %v8548_v1 = vcombine.low %v1015_v50, %v1019_v51  ;;  %v8557_v5 = vcombine.high %v1023_v59, %v1027_v60  ;;  %v1059_v38 = vld [vmem:[#allocation8 + $0xa60] sm:$0xff] }
 0x1cb   : > { %v10820_v12 = vpack.c.bf16 %v712_v7, %v712_v7  ;;  %v10826_v15 = vpack.c.bf16 %v714_v10, %v714_v10  ;;  %v8303_v2 = vcombine.high %v768_v61, %v772_v63  ;;  %v780_v6 = vld [vmem:[#allocation8 + $0x1a8] sm:$0xff]  ;;  %v1035_v7 = vld [vmem:[#allocation8 + $0x9a0] sm:$0xff]  ;;  %v8302_v8 = vcombine.low %v768_v61, %v772_v63 }
 0x1cc   : > { %v8556_v9 = vcombine.low %v1023_v59, %v1027_v60  ;;  %v8311_v10 = vcombine.high %v776_v4, %v780_v6  ;;  %v808_v50 = vld [vmem:[#allocation8 + $0x288] sm:$0xff]  ;;  %v1063_v52 = vld [vmem:[#allocation8 + $0xa80] sm:$0xff] }
 0x1cd   : > { %3873 = vmatprep.mubr.bf16.mxu1 %v10820_v12  ;;  %v10829_v22 = vpop.f32.mrb[4].mxu0  ;;  %3914 = vmatprep.mubr.bf16.mxu0 %v10826_v15  ;;  %v812_v51 = vld [vmem:[#allocation8 + $0x2a8] sm:$0xff]  ;;  %v1071_v61 = vld [vmem:[#allocation8 + $0xac0] sm:$0xff] }
 0x1ce   : > { %3874 = vmatmul.mubr.bf16.vlgmr.msra.gmra.mrb[8].mxu1 %v10824_v14  ;;  %v665_v23 = vpop.f32.mrb[5].mxu0  ;;  %3915 = vmatmul.mubr.bf16.vlgmr.msra.gmra.mrb[8].mxu0 %v10818_v11  ;;  %v10834_v27 = vpop.f32.mrb[4].mxu1  ;;  %v816_v59 = vld [vmem:[#allocation8 + $0x2c8] sm:$0xff]  ;;  %v8342_v63 = vcombine.low %v808_v50, %v812_v51 }
 0x1cf   : > { %4006 = vmatpush1.bf16.msra.mxu1 %v8262_v41  ;;  %v666_v25 = vadd.f32 %v665_v23, %v446_v13  ;;  %v667_v26 = vpop.f32.mrb[6].mxu0  ;;  %3924 = vmatpush1.bf16.msra.mxu0 %v8516_v40  ;;  %v10837_v31 = vpop.f32.mrb[5].mxu1  ;;  %v8278_v41 = vcombine.low %v744_v18, %v748_v21  ;;  %v8565_v13 = vcombine.high %v1031_v3, %v1035_v7  ;;  %v1039_v18 = vld [vmem:[#allocation8 + $0x9c0] sm:$0xff]  ;;  %v820_v60 = vld [vmem:[#allocation8 + $0x2e8] sm:$0xff] }
 0x1d0   : > { %4037 = vmatprep.mubr.bf16.mxu1 %v10820_v12  ;;  %v668_v30 = vpop.f32.mrb[7].mxu0  ;;  %3925 = vmatprep.subr.bf16.mxu0 %v8525_v19  ;;  %v708_v37 = vpop.f32.mrb[6].mxu1  ;;  %v1043_v19 = vld [vmem:[#allocation8 + $0x9e0] sm:$0xff]  ;;  %v8564_v21 = vcombine.low %v1031_v3, %v1035_v7  ;;  %v8319_v23 = vcombine.high %v784_v16, %v788_v17  ;;  %v796_v26 = vld [vmem:[#allocation8 + $0x228] sm:$0xff]  ;;  %v8350_v7 = vcombine.low %v816_v59, %v820_v60 }
 0x1d1   : > { %4007 = vmatprep.subr.bf16.mxu1 %v8271_v20  ;;  %v716_v36 = vmax.f32 %v666_v25, 0.0  ;;  %v709_v39 = vpop.f32.mrb[7].mxu1  ;;  %v8310_v20 = vcombine.low %v776_v4, %v780_v6  ;;  %v792_v25 = vld [vmem:[#allocation8 + $0x208] sm:$0xff]  ;;  %v8318_v30 = vcombine.low %v784_v16, %v788_v17  ;;  %v1055_v37 = vld [vmem:[#allocation8 + $0xa40] sm:$0xff] }
 0x1d2   : > { %v8327_v33 = vcombine.high %v792_v25, %v796_v26  ;;  %v8326_v39 = vcombine.low %v792_v25, %v796_v26  ;;  %v824_v3 = vld [vmem:[#allocation8 + $0x308] sm:$0xff]  ;;  %v1083_v6 = vld [vmem:[#allocation8 + $0xb20] sm:$0xff] }
 0x1d3   : > { %4008 = vmatpush1.bf16.msra.mxu1 %v8270_v24  ;;  %v10839_v40 = vpack.c.bf16 %v716_v36, %v716_v36  ;;  %3926 = vmatpush1.bf16.msra.mxu0 %v8524_v28  ;;  %v8573_v24 = vcombine.high %v1039_v18, %v1043_v19  ;;  %v1047_v28 = vld [vmem:[#allocation8 + $0xa00] sm:$0xff]  ;;  %v804_v36 = vld [vmem:[#allocation8 + $0x268] sm:$0xff] }
 0x1d4   : > { %4009 = vmatprep.subr.bf16.mxu1 %v8279_v29  ;;  %3927 = vmatprep.subr.bf16.mxu0 %v8533_v32  ;;  %v1051_v29 = vld [vmem:[#allocation8 + $0xa20] sm:$0xff]  ;;  %v8572_v32 = vcombine.low %v1039_v18, %v1043_v19  ;;  %v8334_v54 = vcombine.low %v800_v35, %v804_v36  ;;  %v828_v4 = vld [vmem:[#allocation8 + $0x328] sm:$0xff] }
 0x1d5   : > { %3955 = vmatprep.mubr.bf16.mxu0 %v10839_v40  ;;  %v8581_v34 = vcombine.high %v1047_v28, %v1051_v29  ;;  %v836_v16 = vld [vmem:[#allocation8 + $0x368] sm:$0xff]  ;;  %v1087_v17 = vld [vmem:[#allocation8 + $0xb40] sm:$0xff]  ;;  %v8358_v19 = vcombine.low %v824_v3, %v828_v4 }
 0x1d6   : > { %v1091_v18 = vld [vmem:[#allocation8 + $0xb60] sm:$0xff]  ;;  %v840_v25 = vld [vmem:[#allocation8 + $0x388] sm:$0xff] }
 0x1d7   : > { %4010 = vmatpush1.bf16.msra.mxu1 %v8278_v41  ;;  %3928 = vmatpush1.bf16.msra.mxu0 %v8532_v42  ;;  %v8580_v41 = vcombine.low %v1047_v28, %v1051_v29  ;;  %v8335_v42 = vcombine.high %v800_v35, %v804_v36  ;;  %v844_v26 = vld [vmem:[#allocation8 + $0x3a8] sm:$0xff]  ;;  %v1095_v28 = vld [vmem:[#allocation8 + $0xb80] sm:$0xff] }
 0x1d8   : > { %4011 = vmatprep.subr.bf16.mxu1 %v8287_v43  ;;  %3929 = vmatprep.subr.bf16.mxu0 %v8541_v53  ;;  %v8589_v43 = vcombine.high %v1055_v37, %v1059_v38  ;;  %v1067_v53 = vld [vmem:[#allocation8 + $0xaa0] sm:$0xff]  ;;  %v8375_v35 = vcombine.high %v840_v25, %v844_v26 }
 0x1d9   : > { %v1099_v29 = vld [vmem:[#allocation8 + $0xba0] sm:$0xff] }
 0x1da   : > { %v8629_v36 = vcombine.high %v1095_v28, %v1099_v29 }
 0x1db   : > { %4012 = vmatpush1.bf16.msra.mxu1 %v8286_v56  ;;  %3930 = vmatpush1.bf16.msra.mxu0 %v8540_v57  ;;  %v8588_v56 = vcombine.low %v1055_v37, %v1059_v38  ;;  %v8343_v57 = vcombine.high %v808_v50, %v812_v51  ;;  %v848_v37 = vld [vmem:[#allocation8 + $0x3c8] sm:$0xff]  ;;  %v8374_v50 = vcombine.low %v840_v25, %v844_v26  ;;  %v1135_v26 = vld [vmem:[#allocation8 + $0xcc0] sm:$0xff] }
 0x1dc   : > { %4013 = vmatprep.subr.bf16.mxu1 %v8295_v58  ;;  %3931 = vmatprep.subr.bf16.mxu0 %v8549_v62  ;;  %v8597_v58 = vcombine.high %v1063_v52, %v1067_v53  ;;  %v1075_v62 = vld [vmem:[#allocation8 + $0xae0] sm:$0xff]  ;;  %v852_v38 = vld [vmem:[#allocation8 + $0x3e8] sm:$0xff]  ;;  %v8628_v51 = vcombine.low %v1095_v28, %v1099_v29 }
 0x1dd   : > { %v884_v25 = vld [vmem:[#allocation8 + $0x4e8] sm:$0xff]  ;;  %v1139_v28 = vld [vmem:[#allocation8 + $0xce0] sm:$0xff] }
 0x1df   : > { %4014 = vmatpush1.bf16.msra.mxu1 %v8294_v0  ;;  %3932 = vmatpush1.bf16.msra.mxu0 %v8548_v1  ;;  %v8596_v0 = vcombine.low %v1063_v52, %v1067_v53  ;;  %v8351_v1 = vcombine.high %v816_v59, %v820_v60  ;;  %v8383_v52 = vcombine.high %v848_v37, %v852_v38 }
 0x1e0   : > { %4015 = vmatprep.subr.bf16.mxu1 %v8303_v2  ;;  %3933 = vmatprep.subr.bf16.mxu0 %v8557_v5  ;;  %v8605_v2 = vcombine.high %v1071_v61, %v1075_v62  ;;  %v1079_v5 = vld [vmem:[#allocation8 + $0xb00] sm:$0xff] }
 0x1e3   : > { %4016 = vmatpush1.bf16.msra.mxu1 %v8302_v8  ;;  %3934 = vmatpush1.bf16.msra.mxu0 %v8556_v9  ;;  %v8604_v8 = vcombine.low %v1071_v61, %v1075_v62  ;;  %v8359_v9 = vcombine.high %v824_v3, %v828_v4  ;;  %v8382_v61 = vcombine.low %v848_v37, %v852_v38  ;;  %v868_v3 = vld [vmem:[#allocation8 + $0x468] sm:$0xff]  ;;  %v1143_v37 = vld [vmem:[#allocation8 + $0xd00] sm:$0xff] }
 0x1e4   : > { %4017 = vmatprep.subr.bf16.mxu1 %v8311_v10  ;;  %3935 = vmatprep.subr.bf16.mxu0 %v8565_v13  ;;  %v8613_v10 = vcombine.high %v1079_v5, %v1083_v6  ;;  %v832_v13 = vld [vmem:[#allocation8 + $0x348] sm:$0xff]  ;;  %v1147_v38 = vld [vmem:[#allocation8 + $0xd20] sm:$0xff] }
 0x1e7   : > { %4018 = vmatpush1.bf16.msra.mxu1 %v8310_v20  ;;  %3936 = vmatpush1.bf16.msra.mxu0 %v8564_v21  ;;  %v10843_v20 = vsub.s32 4, %v10791_v44  ;;  %v8612_v21 = vcombine.low %v1079_v5, %v1083_v6 }
 0x1e8   : > { %4019 = vmatprep.subr.bf16.mxu1 %v8319_v23  ;;  %3937 = vmatprep.subr.bf16.mxu0 %v8573_v24  ;;  %v8367_v23 = vcombine.high %v832_v13, %v836_v16  ;;  %v8621_v24 = vcombine.high %v1087_v17, %v1091_v18 }
 0x1eb   : > { %4020 = vmatpush1.bf16.msra.mxu1 %v8318_v30  ;;  %3938 = vmatpush1.bf16.msra.mxu0 %v8572_v32  ;;  %v453_v30 = vsub.s32 7, %v10791_v44  ;;  %v8366_v32 = vcombine.low %v832_v13, %v836_v16  ;;  %v1127_v13 = vld [vmem:[#allocation8 + $0xc80] sm:$0xff] }
 0x1ec   : > { %4021 = vmatprep.subr.bf16.mxu1 %v8327_v33  ;;  %3939 = vmatprep.subr.bf16.mxu0 %v8581_v34  ;;  %v442_v33 = vrot.slane %v10793_v45, %v10843_v20  ;;  %v8620_v34 = vcombine.low %v1087_v17, %v1091_v18  ;;  %v1131_v16 = vld [vmem:[#allocation8 + $0xca0] sm:$0xff] }
 0x1ef   : > { %4022 = vmatpush1.bf16.msra.mxu1 %v8326_v39  ;;  %3940 = vmatpush1.bf16.msra.mxu0 %v8580_v41  ;;  %v1103_v39 = vld [vmem:[#allocation8 + $0xbc0] sm:$0xff] }
 0x1f0   : > { %4023 = vmatprep.subr.bf16.mxu1 %v8335_v42  ;;  %3941 = vmatprep.subr.bf16.mxu0 %v8589_v43  ;;  %v1107_v41 = vld [vmem:[#allocation8 + $0xbe0] sm:$0xff]  ;;  %v454_v42 = vrot.slane %v10793_v45, %v453_v30  ;;  %v664_v43 = vadd.f32 %v10829_v22, %v442_v33 }
 0x1f1   : > { %v8637_v53 = vcombine.high %v1103_v39, %v1107_v41  ;;  %v8636_v62 = vcombine.low %v1103_v39, %v1107_v41  ;;  %v8668_v41 = vcombine.low %v1135_v26, %v1139_v28 }
 0x1f2   : > { %v707_v59 = vadd.f32 %v10837_v31, %v454_v42  ;;  %v715_v60 = vmax.f32 %v664_v43, 0.0  ;;  %v8677_v43 = vcombine.high %v1143_v37, %v1147_v38 }
 0x1f3   : > { %4024 = vmatpush1.bf16.msra.mxu1 %v8334_v54  ;;  %3942 = vmatpush1.bf16.msra.mxu0 %v8588_v56  ;;  %v856_v54 = vld [vmem:[#allocation8 + $0x408] sm:$0xff] }
 0x1f4   : > { %4025 = vmatprep.subr.bf16.mxu1 %v8343_v57  ;;  %3943 = vmatprep.subr.bf16.mxu0 %v8597_v58  ;;  %v860_v56 = vld [vmem:[#allocation8 + $0x428] sm:$0xff]  ;;  %v1111_v57 = vld [vmem:[#allocation8 + $0xc00] sm:$0xff]  ;;  %v718_v4 = vmax.f32 %v707_v59, 0.0  ;;  %v10853_v5 = vpack.c.bf16 %v715_v60, %v715_v60 }
 0x1f5   : > { %v1115_v58 = vld [vmem:[#allocation8 + $0xc20] sm:$0xff]  ;;  %v8391_v22 = vcombine.high %v856_v54, %v860_v56  ;;  %v8390_v6 = vcombine.low %v856_v54, %v860_v56  ;;  %v8676_v56 = vcombine.low %v1143_v37, %v1147_v38  ;;  %v904_v59 = vld [vmem:[#allocation8 + $0x588] sm:$0xff] }
 0x1f6   : > { %v8644_v31 = vcombine.low %v1111_v57, %v1115_v58  ;;  %v10856_v17 = vpack.c.bf16 %v718_v4, %v718_v4  ;;  %v908_v60 = vld [vmem:[#allocation8 + $0x5a8] sm:$0xff]  ;;  %v1167_v4 = vld [vmem:[#allocation8 + $0xdc0] sm:$0xff] }
 0x1f7   : > { %4026 = vmatpush1.bf16.msra.mxu1 %v8342_v63  ;;  %3944 = vmatpush1.bf16.msra.mxu0 %v8596_v0  ;;  %v8645_v63 = vcombine.high %v1111_v57, %v1115_v58  ;;  %v1119_v0 = vld [vmem:[#allocation8 + $0xc40] sm:$0xff]  ;;  %v940_v37 = vld [vmem:[#allocation8 + $0x6a8] sm:$0xff] }
 0x1f8   : > { %4027 = vmatprep.subr.bf16.mxu1 %v8351_v1  ;;  %3945 = vmatprep.subr.bf16.mxu0 %v8605_v2  ;;  %v1123_v1 = vld [vmem:[#allocation8 + $0xc60] sm:$0xff]  ;;  %v864_v2 = vld [vmem:[#allocation8 + $0x448] sm:$0xff] }
 0x1f9   : > { %v8398_v18 = vcombine.low %v864_v2, %v868_v3  ;;  %v1191_v38 = vld [vmem:[#allocation8 + $0xe80] sm:$0xff] }
 0x1fb   : > { %4028 = vmatpush1.bf16.msra.mxu1 %v8350_v7  ;;  %3946 = vmatpush1.bf16.msra.mxu0 %v8604_v8  ;;  %v8653_v7 = vcombine.high %v1119_v0, %v1123_v1  ;;  %v8399_v8 = vcombine.high %v864_v2, %v868_v3  ;;  %v912_v2 = vld [vmem:[#allocation8 + $0x5c8] sm:$0xff] }
 0x1fc   : > { %4029 = vmatprep.subr.bf16.mxu1 %v8359_v9  ;;  %3947 = vmatprep.subr.bf16.mxu0 %v8613_v10  ;;  %v872_v9 = vld [vmem:[#allocation8 + $0x488] sm:$0xff] }
 0x1fd   : > { %v876_v10 = vld [vmem:[#allocation8 + $0x4a8] sm:$0xff] }
 0x1fe   : > { %v8406_v29 = vcombine.low %v872_v9, %v876_v10  ;;  %v916_v3 = vld [vmem:[#allocation8 + $0x5e8] sm:$0xff] }
 0x1ff   : > { %4030 = vmatpush1.bf16.msra.mxu1 %v8358_v19  ;;  %3948 = vmatpush1.bf16.msra.mxu0 %v8612_v21  ;;  %v8652_v19 = vcombine.low %v1119_v0, %v1123_v1  ;;  %v8407_v21 = vcombine.high %v872_v9, %v876_v10  ;;  %v8439_v0 = vcombine.high %v904_v59, %v908_v60  ;;  %v920_v10 = vld [vmem:[#allocation8 + $0x608] sm:$0xff] }
 0x200   : > { %4031 = vmatprep.subr.bf16.mxu1 %v8367_v23  ;;  %3949 = vmatprep.subr.bf16.mxu0 %v8621_v24  ;;  %v8661_v23 = vcombine.high %v1127_v13, %v1131_v16  ;;  %v880_v24 = vld [vmem:[#allocation8 + $0x4c8] sm:$0xff] }
 0x201   : > { %v8415_v33 = vcombine.high %v880_v24, %v884_v25  ;;  %v8414_v39 = vcombine.low %v880_v24, %v884_v25  ;;  %v928_v25 = vld [vmem:[#allocation8 + $0x648] sm:$0xff] }
 0x203   : > { %4032 = vmatpush1.bf16.msra.mxu1 %v8366_v32  ;;  %3950 = vmatpush1.bf16.msra.mxu0 %v8620_v34  ;;  %v8660_v32 = vcombine.low %v1127_v13, %v1131_v16  ;;  %v8669_v34 = vcombine.high %v1135_v26, %v1139_v28  ;;  %v924_v13 = vld [vmem:[#allocation8 + $0x628] sm:$0xff]  ;;  %v1175_v16 = vld [vmem:[#allocation8 + $0xe00] sm:$0xff] }
 0x204   : > { %4033 = vmatprep.subr.bf16.mxu1 %v8375_v35  ;;  %3951 = vmatprep.subr.bf16.mxu0 %v8629_v36  ;;  %v888_v35 = vld [vmem:[#allocation8 + $0x508] sm:$0xff]  ;;  %v1183_v28 = vld [vmem:[#allocation8 + $0xe40] sm:$0xff] }
 0x205   : > { %v892_v36 = vld [vmem:[#allocation8 + $0x528] sm:$0xff] }
 0x206   : > { %v8423_v42 = vcombine.high %v888_v35, %v892_v36  ;;  %v8422_v54 = vcombine.low %v888_v35, %v892_v36  ;;  %v932_v26 = vld [vmem:[#allocation8 + $0x668] sm:$0xff] }
 0x207   : > { %4034 = vmatpush1.bf16.msra.mxu1 %v8374_v50  ;;  %3952 = vmatpush1.bf16.msra.mxu0 %v8628_v51  ;;  %v896_v50 = vld [vmem:[#allocation8 + $0x548] sm:$0xff] }
 0x208   : > { %4035 = vmatprep.subr.bf16.mxu1 %v8383_v52  ;;  %3953 = vmatprep.subr.bf16.mxu0 %v8637_v53  ;;  %v900_v51 = vld [vmem:[#allocation8 + $0x568] sm:$0xff]  ;;  %v1151_v52 = vld [vmem:[#allocation8 + $0xd40] sm:$0xff] }
 0x209   : > { %v1155_v53 = vld [vmem:[#allocation8 + $0xd60] sm:$0xff]  ;;  %v8431_v57 = vcombine.high %v896_v50, %v900_v51  ;;  %v936_v36 = vld [vmem:[#allocation8 + $0x688] sm:$0xff] }
 0x20a   : > { %v8685_v58 = vcombine.high %v1151_v52, %v1155_v53 }
 0x20b   : > { %4036 = vmatpush1.bf16.msra.mxu1 %v8382_v61  ;;  %3954 = vmatpush1.bf16.msra.mxu0 %v8636_v62  ;;  %v1159_v61 = vld [vmem:[#allocation8 + $0xd80] sm:$0xff] }
 0x20c   : > { %4046 = vmatprep.subr.bf16.mxu1 %v8391_v22  ;;  %3964 = vmatprep.subr.bf16.mxu0 %v8645_v63  ;;  %v1163_v62 = vld [vmem:[#allocation8 + $0xda0] sm:$0xff]  ;;  %v8430_v22 = vcombine.low %v896_v50, %v900_v51  ;;  %v8684_v63 = vcombine.low %v1151_v52, %v1155_v53  ;;  %v944_v51 = vld [vmem:[#allocation8 + $0x6c8] sm:$0xff] }
 0x20d   : > { %v8693_v1 = vcombine.high %v1159_v61, %v1163_v62  ;;  %v948_v52 = vld [vmem:[#allocation8 + $0x6e8] sm:$0xff]  ;;  %v1199_v53 = vld [vmem:[#allocation8 + $0xec0] sm:$0xff] }
 0x20e   : > { %4038 = vmatmul.mubr.bf16.vlgmr.msra.gmra.mrb[12].mxu1 %v10824_v14  ;;  %3956 = vmatmul.mubr.bf16.vlgmr.msra.gmra.mrb[8].mxu0 %v10853_v5 }
 0x20f   : > { %4047 = vmatpush1.bf16.msra.mxu1 %v8390_v6  ;;  %3965 = vmatpush1.bf16.msra.mxu0 %v8644_v31  ;;  %v1171_v6 = vld [vmem:[#allocation8 + $0xde0] sm:$0xff]  ;;  %v8438_v31 = vcombine.low %v904_v59, %v908_v60  ;;  %v952_v60 = vld [vmem:[#allocation8 + $0x708] sm:$0xff] }
 0x210   : > { %4078 = vmatprep.mubr.bf16.mxu1 %v10826_v15  ;;  %3966 = vmatprep.subr.bf16.mxu0 %v8653_v7  ;;  %v8692_v7 = vcombine.low %v1159_v61, %v1163_v62  ;;  %v8701_v9 = vcombine.high %v1167_v4, %v1171_v6  ;;  %v956_v61 = vld [vmem:[#allocation8 + $0x728] sm:$0xff]  ;;  %v1207_v62 = vld [vmem:[#allocation8 + $0xf00] sm:$0xff] }
 0x211   : > { %4048 = vmatprep.subr.bf16.mxu1 %v8399_v8  ;;  %3996 = vmatprep.mubr.bf16.mxu0 %v10856_v17  ;;  %v8447_v8 = vcombine.high %v912_v2, %v916_v3 }
 0x213   : > { %4049 = vmatpush1.bf16.msra.mxu1 %v8398_v18  ;;  %3967 = vmatpush1.bf16.msra.mxu0 %v8652_v19  ;;  %v1179_v18 = vld [vmem:[#allocation8 + $0xe20] sm:$0xff]  ;;  %v8446_v19 = vcombine.low %v912_v2, %v916_v3  ;;  %v960_v3 = vld [vmem:[#allocation8 + $0x748] sm:$0xff] }
 0x214   : > { %4050 = vmatprep.subr.bf16.mxu1 %v8407_v21  ;;  %3968 = vmatprep.subr.bf16.mxu0 %v8661_v23  ;;  %v8700_v21 = vcombine.low %v1167_v4, %v1171_v6  ;;  %v8455_v23 = vcombine.high %v920_v10, %v924_v13  ;;  %v8709_v24 = vcombine.high %v1175_v16, %v1179_v18  ;;  %v964_v4 = vld [vmem:[#allocation8 + $0x768] sm:$0xff]  ;;  %v1215_v6 = vld [vmem:[#allocation8 + $0xf40] sm:$0xff] }
 0x217   : > { %4051 = vmatpush1.bf16.msra.mxu1 %v8406_v29  ;;  %3969 = vmatpush1.bf16.msra.mxu0 %v8660_v32  ;;  %v1187_v29 = vld [vmem:[#allocation8 + $0xe60] sm:$0xff]  ;;  %v8454_v32 = vcombine.low %v920_v10, %v924_v13  ;;  %v8495_v10 = vcombine.high %v960_v3, %v964_v4 }
 0x218   : > { %4052 = vmatprep.subr.bf16.mxu1 %v8415_v33  ;;  %3970 = vmatprep.subr.bf16.mxu0 %v8669_v34  ;;  %v8708_v33 = vcombine.low %v1175_v16, %v1179_v18  ;;  %v8463_v34 = vcombine.high %v928_v25, %v932_v26  ;;  %v8717_v35 = vcombine.high %v1183_v28, %v1187_v29  ;;  %v968_v16 = vld [vmem:[#allocation8 + $0x788] sm:$0xff] }
 0x219   : > { %v972_v18 = vld [vmem:[#allocation8 + $0x7a8] sm:$0xff] }
 0x21b   : > { %4053 = vmatpush1.bf16.msra.mxu1 %v8414_v39  ;;  %3971 = vmatpush1.bf16.msra.mxu0 %v8668_v41  ;;  %v1195_v39 = vld [vmem:[#allocation8 + $0xea0] sm:$0xff]  ;;  %v8462_v41 = vcombine.low %v928_v25, %v932_v26  ;;  %v8503_v26 = vcombine.high %v968_v16, %v972_v18 }
 0x21c   : > { %4054 = vmatprep.subr.bf16.mxu1 %v8423_v42  ;;  %3972 = vmatprep.subr.bf16.mxu0 %v8677_v43  ;;  %v8716_v42 = vcombine.low %v1183_v28, %v1187_v29  ;;  %v8471_v43 = vcombine.high %v936_v36, %v940_v37  ;;  %v8725_v50 = vcombine.high %v1191_v38, %v1195_v39  ;;  %v976_v29 = vld [vmem:[#allocation8 + $0x7c8] sm:$0xff] }
 0x21f   : > { %4055 = vmatpush1.bf16.msra.mxu1 %v8422_v54  ;;  %3973 = vmatpush1.bf16.msra.mxu0 %v8676_v56  ;;  %v1203_v54 = vld [vmem:[#allocation8 + $0xee0] sm:$0xff]  ;;  %v8470_v56 = vcombine.low %v936_v36, %v940_v37  ;;  %v8502_v36 = vcombine.low %v968_v16, %v972_v18 }
 0x220   : > { %4056 = vmatprep.subr.bf16.mxu1 %v8431_v57  ;;  %3974 = vmatprep.subr.bf16.mxu0 %v8685_v58  ;;  %v8724_v57 = vcombine.low %v1191_v38, %v1195_v39  ;;  %v8479_v58 = vcombine.high %v944_v51, %v948_v52  ;;  %v8733_v59 = vcombine.high %v1199_v53, %v1203_v54  ;;  %v984_v39 = vld [vmem:[#allocation8 + $0x808] sm:$0xff] }
 0x223   : > { %4057 = vmatpush1.bf16.msra.mxu1 %v8430_v22  ;;  %3975 = vmatpush1.bf16.msra.mxu0 %v8684_v63  ;;  %v1211_v22 = vld [vmem:[#allocation8 + $0xf20] sm:$0xff]  ;;  %v8478_v63 = vcombine.low %v944_v51, %v948_v52 }
 0x224   : > { %4058 = vmatprep.subr.bf16.mxu1 %v8439_v0  ;;  %3976 = vmatprep.subr.bf16.mxu0 %v8693_v1  ;;  %v8732_v0 = vcombine.low %v1199_v53, %v1203_v54  ;;  %v8487_v1 = vcombine.high %v952_v60, %v956_v61  ;;  %v8741_v2 = vcombine.high %v1207_v62, %v1211_v22  ;;  %v992_v54 = vld [vmem:[#allocation8 + $0x848] sm:$0xff] }
 0x227   : > { %4059 = vmatpush1.bf16.msra.mxu1 %v8438_v31  ;;  %3977 = vmatpush1.bf16.msra.mxu0 %v8692_v7  ;;  %v1219_v31 = vld [vmem:[#allocation8 + $0xf60] sm:$0xff]  ;;  %v8486_v7 = vcombine.low %v952_v60, %v956_v61  ;;  %v741_v60 = vld [vmem:[#allocation8 + $0x70] sm:$0xff] }
 0x228   : > { %4060 = vmatprep.subr.bf16.mxu1 %v8447_v8  ;;  %3978 = vmatprep.subr.bf16.mxu0 %v8701_v9  ;;  %v10862_v8 = vsub.s32 6, %v10791_v44  ;;  %v8740_v9 = vcombine.low %v1207_v62, %v1211_v22  ;;  %v8749_v13 = vcombine.high %v1215_v6, %v1219_v31  ;;  %v8748_v25 = vcombine.low %v1215_v6, %v1219_v31  ;;  %v1000_v22 = vld [vmem:[#allocation8 + $0x888] sm:$0xff] }
 0x22b   : > { %4061 = vmatpush1.bf16.msra.mxu1 %v8446_v19  ;;  %3979 = vmatpush1.bf16.msra.mxu0 %v8700_v21  ;;  %v1223_v19 = vld [vmem:[#allocation8 + $0xf80] sm:$0xff] }
 0x22c   : > { %4062 = vmatprep.subr.bf16.mxu1 %v8455_v23  ;;  %3980 = vmatprep.subr.bf16.mxu0 %v8709_v24  ;;  %v1227_v21 = vld [vmem:[#allocation8 + $0xfa0] sm:$0xff]  ;;  %v8494_v23 = vcombine.low %v960_v3, %v964_v4  ;;  %v450_v24 = vrot.slane %v10793_v45, %v10862_v8 }
 0x22d   : > { %v8757_v28 = vcombine.high %v1223_v19, %v1227_v21  ;;  %v8756_v37 = vcombine.low %v1223_v19, %v1227_v21 }
 0x22f   : > { %4063 = vmatpush1.bf16.msra.mxu1 %v8454_v32  ;;  %3981 = vmatpush1.bf16.msra.mxu0 %v8708_v33  ;;  %v980_v32 = vld [vmem:[#allocation8 + $0x7e8] sm:$0xff]  ;;  %v1231_v33 = vld [vmem:[#allocation8 + $0xfc0] sm:$0xff] }
 0x230   : > { %4064 = vmatprep.subr.bf16.mxu1 %v8463_v34  ;;  %3982 = vmatprep.subr.bf16.mxu0 %v8717_v35  ;;  %v1235_v34 = vld [vmem:[#allocation8 + $0xfe0] sm:$0xff]  ;;  %v705_v35 = vadd.f32 %v10834_v27, %v450_v24  ;;  %v8511_v38 = vcombine.high %v976_v29, %v980_v32  ;;  %v8510_v51 = vcombine.low %v976_v29, %v980_v32  ;;  %v1020_v24 = vld [vmem:[#allocation8 + $0x928] sm:$0xff] }
 0x231   : > { %v8765_v45 = vcombine.high %v1231_v33, %v1235_v34  ;;  %v8764_v52 = vcombine.low %v1231_v33, %v1235_v34  ;;  %v1024_v34 = vld [vmem:[#allocation8 + $0x948] sm:$0xff] }
 0x233   : > { %4065 = vmatpush1.bf16.msra.mxu1 %v8462_v41  ;;  %3983 = vmatpush1.bf16.msra.mxu0 %v8716_v42  ;;  %v988_v41 = vld [vmem:[#allocation8 + $0x828] sm:$0xff]  ;;  %v729_v42 = vld [vmem:[#allocation8 + $0x10] sm:$0xff] }
 0x234   : > { %4066 = vmatprep.subr.bf16.mxu1 %v8471_v43  ;;  %3984 = vmatprep.subr.bf16.mxu0 %v8725_v50  ;;  %v733_v43 = vld [vmem:[#allocation8 + $0x30] sm:$0xff]  ;;  %v717_v50 = vmax.f32 %v705_v35, 0.0  ;;  %v8519_v53 = vcombine.high %v984_v39, %v988_v41  ;;  %v1028_v35 = vld [vmem:[#allocation8 + $0x968] sm:$0xff] }
 0x235   : > { %v8265_v27 = vcombine.high %v729_v42, %v733_v43  ;;  %v8264_v61 = vcombine.low %v729_v42, %v733_v43  ;;  %v1032_v42 = vld [vmem:[#allocation8 + $0x988] sm:$0xff] }
 0x236   : > { %v1036_v43 = vld [vmem:[#allocation8 + $0x9a8] sm:$0xff] }
 0x237   : > { %4067 = vmatpush1.bf16.msra.mxu1 %v8470_v56  ;;  %3985 = vmatpush1.bf16.msra.mxu0 %v8724_v57  ;;  %v996_v56 = vld [vmem:[#allocation8 + $0x868] sm:$0xff]  ;;  %v10867_v57 = vpack.c.bf16 %v717_v50, %v717_v50  ;;  %v777_v50 = vld [vmem:[#allocation8 + $0x190] sm:$0xff] }
 0x238   : > { %4068 = vmatprep.subr.bf16.mxu1 %v8479_v58  ;;  %3986 = vmatprep.subr.bf16.mxu0 %v8733_v59  ;;  %v8518_v58 = vcombine.low %v984_v39, %v988_v41  ;;  %v737_v59 = vld [vmem:[#allocation8 + $0x50] sm:$0xff]  ;;  %v8527_v62 = vcombine.high %v992_v54, %v996_v56  ;;  %v8526_v3 = vcombine.low %v992_v54, %v996_v56  ;;  %v1040_v56 = vld [vmem:[#allocation8 + $0x9c8] sm:$0xff] }
 0x239   : > { %v8272_v4 = vcombine.low %v737_v59, %v741_v60  ;;  %v8559_v39 = vcombine.high %v1024_v34, %v1028_v35 }
 0x23b   : > { %4069 = vmatpush1.bf16.msra.mxu1 %v8478_v63  ;;  %3987 = vmatpush1.bf16.msra.mxu0 %v8732_v0  ;;  %v1004_v63 = vld [vmem:[#allocation8 + $0x8a8] sm:$0xff]  ;;  %v8273_v0 = vcombine.high %v737_v59, %v741_v60  ;;  %v785_v59 = vld [vmem:[#allocation8 + $0x1d0] sm:$0xff] }
 0x23c   : > { %4070 = vmatprep.subr.bf16.mxu1 %v8487_v1  ;;  %3988 = vmatprep.subr.bf16.mxu0 %v8741_v2  ;;  %v745_v1 = vld [vmem:[#allocation8 + $0x90] sm:$0xff]  ;;  %v8535_v6 = vcombine.high %v1000_v22, %v1004_v63  ;;  %v8534_v16 = vcombine.low %v1000_v22, %v1004_v63 }
 0x23d   : > { %v749_v2 = vld [vmem:[#allocation8 + $0xb0] sm:$0xff] }
 0x23e   : > { %v8281_v31 = vcombine.high %v745_v1, %v749_v2  ;;  %v8280_v18 = vcombine.low %v745_v1, %v749_v2  ;;  %v789_v60 = vld [vmem:[#allocation8 + $0x1f0] sm:$0xff]  ;;  %v1052_v1 = vld [vmem:[#allocation8 + $0xa28] sm:$0xff] }
 0x23f   : > { %4071 = vmatpush1.bf16.msra.mxu1 %v8486_v7  ;;  %3989 = vmatpush1.bf16.msra.mxu0 %v8740_v9  ;;  %v1008_v7 = vld [vmem:[#allocation8 + $0x8c8] sm:$0xff]  ;;  %v8321_v63 = vcombine.high %v785_v59, %v789_v60  ;;  %v793_v2 = vld [vmem:[#allocation8 + $0x210] sm:$0xff] }
 0x240   : > { %4072 = vmatprep.subr.bf16.mxu1 %v8495_v10  ;;  %3990 = vmatprep.subr.bf16.mxu0 %v8749_v13  ;;  %v1012_v9 = vld [vmem:[#allocation8 + $0x8e8] sm:$0xff]  ;;  %v753_v10 = vld [vmem:[#allocation8 + $0xd0] sm:$0xff] }
 0x241   : > { %v757_v13 = vld [vmem:[#allocation8 + $0xf0] sm:$0xff]  ;;  %v8543_v19 = vcombine.high %v1008_v7, %v1012_v9 }
 0x242   : > { %v8289_v21 = vcombine.high %v753_v10, %v757_v13  ;;  %v8288_v29 = vcombine.low %v753_v10, %v757_v13  ;;  %v1060_v10 = vld [vmem:[#allocation8 + $0xa68] sm:$0xff]  ;;  %v801_v13 = vld [vmem:[#allocation8 + $0x250] sm:$0xff] }
 0x243   : > { %4073 = vmatpush1.bf16.msra.mxu1 %v8494_v23  ;;  %3991 = vmatpush1.bf16.msra.mxu0 %v8748_v25  ;;  %v1016_v23 = vld [vmem:[#allocation8 + $0x908] sm:$0xff]  ;;  %v761_v25 = vld [vmem:[#allocation8 + $0x110] sm:$0xff] }
 0x244   : > { %4074 = vmatprep.subr.bf16.mxu1 %v8503_v26  ;;  %3992 = vmatprep.subr.bf16.mxu0 %v8757_v28  ;;  %v765_v26 = vld [vmem:[#allocation8 + $0x130] sm:$0xff]  ;;  %v8542_v28 = vcombine.low %v1008_v7, %v1012_v9  ;;  %v8551_v32 = vcombine.high %v1016_v23, %v1020_v24  ;;  %v1056_v9 = vld [vmem:[#allocation8 + $0xa48] sm:$0xff] }
 0x245   : > { %v8297_v33 = vcombine.high %v761_v25, %v765_v26 }
 0x247   : > { %4075 = vmatpush1.bf16.msra.mxu1 %v8502_v36  ;;  %3993 = vmatpush1.bf16.msra.mxu0 %v8756_v37  ;;  %v769_v36 = vld [vmem:[#allocation8 + $0x150] sm:$0xff] }
 0x248   : > { %4076 = vmatprep.subr.bf16.mxu1 %v8511_v38  ;;  %3994 = vmatprep.subr.bf16.mxu0 %v8765_v45  ;;  %v773_v37 = vld [vmem:[#allocation8 + $0x170] sm:$0xff]  ;;  %v8550_v38 = vcombine.low %v1016_v23, %v1020_v24  ;;  %v8296_v45 = vcombine.low %v761_v25, %v765_v26  ;;  %v1064_v24 = vld [vmem:[#allocation8 + $0xa88] sm:$0xff] }
 0x249   : > { %v8305_v41 = vcombine.high %v769_v36, %v773_v37  ;;  %v1068_v25 = vld [vmem:[#allocation8 + $0xaa8] sm:$0xff]  ;;  %v809_v26 = vld [vmem:[#allocation8 + $0x290] sm:$0xff] }
 0x24b   : > { %4077 = vmatpush1.bf16.msra.mxu1 %v8510_v51  ;;  %3995 = vmatpush1.bf16.msra.mxu0 %v8764_v52  ;;  %v781_v51 = vld [vmem:[#allocation8 + $0x1b0] sm:$0xff]  ;;  %v8558_v52 = vcombine.low %v1024_v34, %v1028_v35  ;;  %v1072_v35 = vld [vmem:[#allocation8 + $0xac8] sm:$0xff] }
 0x24c   : > { %4087 = vmatprep.subr.bf16.mxu1 %v8519_v53  ;;  %4169 = vmatprep.subr.bf16.mxu0 %v8265_v27  ;;  %v8304_v53 = vcombine.low %v769_v36, %v773_v37  ;;  %v8567_v27 = vcombine.high %v1032_v42, %v1036_v43  ;;  %v8313_v54 = vcombine.high %v777_v50, %v781_v51  ;;  %v1076_v36 = vld [vmem:[#allocation8 + $0xae8] sm:$0xff]  ;;  %v817_v37 = vld [vmem:[#allocation8 + $0x2d0] sm:$0xff] }
 0x24e   : > { %4079 = vmatmul.mubr.bf16.vlgmr.msra.gmra.mrb[12].mxu1 %v10818_v11  ;;  %3997 = vmatmul.mubr.bf16.vlgmr.msra.gmra.mrb[8].mxu0 %v10867_v57 }
 0x24f   : > { %4088 = vmatpush1.bf16.msra.mxu1 %v8518_v58  ;;  %4119 = vmatprep.mubr.bf16.mxu1 %v10839_v40  ;;  %v1044_v58 = vld [vmem:[#allocation8 + $0x9e8] sm:$0xff] }
 0x250   : > { %4170 = vmatpush1.bf16.msra.mxu0 %v8264_v61  ;;  %4201 = vmatprep.mubr.bf16.mxu0 %v10820_v12  ;;  %v8566_v61 = vcombine.low %v1032_v42, %v1036_v43  ;;  %v8575_v22 = vcombine.high %v1040_v56, %v1044_v58  ;;  %v1080_v43 = vld [vmem:[#allocation8 + $0xb08] sm:$0xff] }
 0x251   : > { %4089 = vmatprep.subr.bf16.mxu1 %v8527_v62  ;;  %4171 = vmatprep.subr.bf16.mxu0 %v8273_v0  ;;  %v8312_v62 = vcombine.low %v777_v50, %v781_v51  ;;  %v1048_v0 = vld [vmem:[#allocation8 + $0xa08] sm:$0xff]  ;;  %v825_v51 = vld [vmem:[#allocation8 + $0x310] sm:$0xff] }
 0x252   : > { %v1084_v50 = vld [vmem:[#allocation8 + $0xb28] sm:$0xff] }
 0x253   : > { %4090 = vmatpush1.bf16.msra.mxu1 %v8526_v3  ;;  %v797_v3 = vld [vmem:[#allocation8 + $0x230] sm:$0xff] }
 0x254   : > { %4172 = vmatpush1.bf16.msra.mxu0 %v8272_v4  ;;  %4091 = vmatprep.subr.bf16.mxu1 %v8535_v6  ;;  %v8574_v4 = vcombine.low %v1040_v56, %v1044_v58  ;;  %v8320_v6 = vcombine.low %v785_v59, %v789_v60  ;;  %v8329_v7 = vcombine.high %v793_v2, %v797_v3  ;;  %v1088_v58 = vld [vmem:[#allocation8 + $0xb48] sm:$0xff]  ;;  %v833_v60 = vld [vmem:[#allocation8 + $0x350] sm:$0xff] }
 0x255   : > { %4173 = vmatprep.subr.bf16.mxu0 %v8281_v31  ;;  %v8583_v31 = vcombine.high %v1048_v0, %v1052_v1  ;;  %v1092_v59 = vld [vmem:[#allocation8 + $0xb68] sm:$0xff] }
 0x257   : > { %4092 = vmatpush1.bf16.msra.mxu1 %v8534_v16  ;;  %v805_v16 = vld [vmem:[#allocation8 + $0x270] sm:$0xff] }
 0x258   : > { %4174 = vmatpush1.bf16.msra.mxu0 %v8280_v18  ;;  %4093 = vmatprep.subr.bf16.mxu1 %v8543_v19  ;;  %v8582_v18 = vcombine.low %v1048_v0, %v1052_v1  ;;  %v8328_v19 = vcombine.low %v793_v2, %v797_v3  ;;  %v8337_v23 = vcombine.high %v801_v13, %v805_v16  ;;  %v1096_v1 = vld [vmem:[#allocation8 + $0xb88] sm:$0xff]  ;;  %v841_v3 = vld [vmem:[#allocation8 + $0x390] sm:$0xff] }
 0x259   : > { %4175 = vmatprep.subr.bf16.mxu0 %v8289_v21  ;;  %v8591_v21 = vcombine.high %v1056_v9, %v1060_v10  ;;  %v1100_v2 = vld [vmem:[#allocation8 + $0xba8] sm:$0xff] }
 0x25b   : > { %4094 = vmatpush1.bf16.msra.mxu1 %v8542_v28  ;;  %v813_v28 = vld [vmem:[#allocation8 + $0x2b0] sm:$0xff] }
 0x25c   : > { %4176 = vmatpush1.bf16.msra.mxu0 %v8288_v29  ;;  %4095 = vmatprep.subr.bf16.mxu1 %v8551_v32  ;;  %v8590_v29 = vcombine.low %v1056_v9, %v1060_v10  ;;  %v8336_v32 = vcombine.low %v801_v13, %v805_v16  ;;  %v8345_v34 = vcombine.high %v809_v26, %v813_v28  ;;  %v1104_v10 = vld [vmem:[#allocation8 + $0xbc8] sm:$0xff]  ;;  %v849_v16 = vld [vmem:[#allocation8 + $0x3d0] sm:$0xff] }
 0x25d   : > { %4177 = vmatprep.subr.bf16.mxu0 %v8297_v33  ;;  %v8599_v33 = vcombine.high %v1064_v24, %v1068_v25  ;;  %v1108_v13 = vld [vmem:[#allocation8 + $0xbe8] sm:$0xff] }
 0x25f   : > { %4096 = vmatpush1.bf16.msra.mxu1 %v8550_v38  ;;  %v821_v38 = vld [vmem:[#allocation8 + $0x2f0] sm:$0xff] }
 0x260   : > { %4178 = vmatpush1.bf16.msra.mxu0 %v8296_v45  ;;  %4097 = vmatprep.subr.bf16.mxu1 %v8559_v39  ;;  %v8598_v45 = vcombine.low %v1064_v24, %v1068_v25  ;;  %v8344_v39 = vcombine.low %v809_v26, %v813_v28  ;;  %v8353_v42 = vcombine.high %v817_v37, %v821_v38  ;;  %v1112_v25 = vld [vmem:[#allocation8 + $0xc08] sm:$0xff]  ;;  %v857_v28 = vld [vmem:[#allocation8 + $0x410] sm:$0xff] }
 0x261   : > { %4179 = vmatprep.subr.bf16.mxu0 %v8305_v41  ;;  %v8607_v41 = vcombine.high %v1072_v35, %v1076_v36  ;;  %v1116_v26 = vld [vmem:[#allocation8 + $0xc28] sm:$0xff] }
 0x263   : > { %4098 = vmatpush1.bf16.msra.mxu1 %v8558_v52  ;;  %v829_v52 = vld [vmem:[#allocation8 + $0x330] sm:$0xff] }
 0x264   : > { %4180 = vmatpush1.bf16.msra.mxu0 %v8304_v53  ;;  %4099 = vmatprep.subr.bf16.mxu1 %v8567_v27  ;;  %v8606_v53 = vcombine.low %v1072_v35, %v1076_v36  ;;  %v8352_v27 = vcombine.low %v817_v37, %v821_v38  ;;  %v8361_v56 = vcombine.high %v825_v51, %v829_v52  ;;  %v1120_v36 = vld [vmem:[#allocation8 + $0xc48] sm:$0xff] }
 0x265   : > { %4181 = vmatprep.subr.bf16.mxu0 %v8313_v54  ;;  %v8615_v54 = vcombine.high %v1080_v43, %v1084_v50  ;;  %v1124_v37 = vld [vmem:[#allocation8 + $0xc68] sm:$0xff]  ;;  %v8646_v38 = vcombine.low %v1112_v25, %v1116_v26 }
 0x267   : > { %4100 = vmatpush1.bf16.msra.mxu1 %v8566_v61  ;;  %v837_v61 = vld [vmem:[#allocation8 + $0x370] sm:$0xff] }
 0x268   : > { %4182 = vmatpush1.bf16.msra.mxu0 %v8312_v62  ;;  %4101 = vmatprep.subr.bf16.mxu1 %v8575_v22  ;;  %v8614_v62 = vcombine.low %v1080_v43, %v1084_v50  ;;  %v8360_v22 = vcombine.low %v825_v51, %v829_v52  ;;  %v8369_v0 = vcombine.high %v833_v60, %v837_v61  ;;  %v1128_v43 = vld [vmem:[#allocation8 + $0xc88] sm:$0xff]  ;;  %v873_v52 = vld [vmem:[#allocation8 + $0x490] sm:$0xff] }
 0x269   : > { %4183 = vmatprep.subr.bf16.mxu0 %v8321_v63  ;;  %v8623_v63 = vcombine.high %v1088_v58, %v1092_v59  ;;  %v1132_v50 = vld [vmem:[#allocation8 + $0xca8] sm:$0xff] }
 0x26b   : > { %4102 = vmatpush1.bf16.msra.mxu1 %v8574_v4  ;;  %v845_v4 = vld [vmem:[#allocation8 + $0x3b0] sm:$0xff] }
 0x26c   : > { %4184 = vmatpush1.bf16.msra.mxu0 %v8320_v6  ;;  %4103 = vmatprep.subr.bf16.mxu1 %v8583_v31  ;;  %v8622_v6 = vcombine.low %v1088_v58, %v1092_v59  ;;  %v8368_v31 = vcombine.low %v833_v60, %v837_v61  ;;  %v8377_v9 = vcombine.high %v841_v3, %v845_v4  ;;  %v1136_v59 = vld [vmem:[#allocation8 + $0xcc8] sm:$0xff]  ;;  %v881_v61 = vld [vmem:[#allocation8 + $0x4d0] sm:$0xff] }
 0x26d   : > { %4185 = vmatprep.subr.bf16.mxu0 %v8329_v7  ;;  %v8631_v7 = vcombine.high %v1096_v1, %v1100_v2  ;;  %v1140_v60 = vld [vmem:[#allocation8 + $0xce8] sm:$0xff] }
 0x26f   : > { %4104 = vmatpush1.bf16.msra.mxu1 %v8582_v18  ;;  %v853_v18 = vld [vmem:[#allocation8 + $0x3f0] sm:$0xff] }
 0x270   : > { %4186 = vmatpush1.bf16.msra.mxu0 %v8328_v19  ;;  %4105 = vmatprep.subr.bf16.mxu1 %v8591_v21  ;;  %v8630_v19 = vcombine.low %v1096_v1, %v1100_v2  ;;  %v8376_v21 = vcombine.low %v841_v3, %v845_v4  ;;  %v8385_v24 = vcombine.high %v849_v16, %v853_v18  ;;  %v1144_v2 = vld [vmem:[#allocation8 + $0xd08] sm:$0xff]  ;;  %v889_v4 = vld [vmem:[#allocation8 + $0x510] sm:$0xff] }
 0x271   : > { %4187 = vmatprep.subr.bf16.mxu0 %v8337_v23  ;;  %v8639_v23 = vcombine.high %v1104_v10, %v1108_v13  ;;  %v1148_v3 = vld [vmem:[#allocation8 + $0xd28] sm:$0xff] }
 0x273   : > { %4106 = vmatpush1.bf16.msra.mxu1 %v8590_v29  ;;  %v861_v29 = vld [vmem:[#allocation8 + $0x430] sm:$0xff] }
 0x274   : > { %4188 = vmatpush1.bf16.msra.mxu0 %v8336_v32  ;;  %4107 = vmatprep.subr.bf16.mxu1 %v8599_v33  ;;  %v8638_v32 = vcombine.low %v1104_v10, %v1108_v13  ;;  %v8384_v33 = vcombine.low %v849_v16, %v853_v18  ;;  %v8393_v35 = vcombine.high %v857_v28, %v861_v29  ;;  %v1152_v13 = vld [vmem:[#allocation8 + $0xd48] sm:$0xff]  ;;  %v897_v18 = vld [vmem:[#allocation8 + $0x550] sm:$0xff] }
 0x275   : > { %4189 = vmatprep.subr.bf16.mxu0 %v8345_v34  ;;  %v8647_v34 = vcombine.high %v1112_v25, %v1116_v26  ;;  %v1156_v16 = vld [vmem:[#allocation8 + $0xd68] sm:$0xff] }
 0x276   : > { %v1160_v26 = vld [vmem:[#allocation8 + $0xd88] sm:$0xff] }
 0x277   : > { %4108 = vmatpush1.bf16.msra.mxu1 %v8598_v45  ;;  %v865_v45 = vld [vmem:[#allocation8 + $0x450] sm:$0xff] }
 0x278   : > { %4190 = vmatpush1.bf16.msra.mxu0 %v8344_v39  ;;  %4109 = vmatprep.subr.bf16.mxu1 %v8607_v41  ;;  %v869_v39 = vld [vmem:[#allocation8 + $0x470] sm:$0xff]  ;;  %v8392_v41 = vcombine.low %v857_v28, %v861_v29  ;;  %v1164_v28 = vld [vmem:[#allocation8 + $0xda8] sm:$0xff] }
 0x279   : > { %4191 = vmatprep.subr.bf16.mxu0 %v8353_v42  ;;  %v8655_v42 = vcombine.high %v1120_v36, %v1124_v37  ;;  %v8401_v51 = vcombine.high %v865_v45, %v869_v39  ;;  %v905_v29 = vld [vmem:[#allocation8 + $0x590] sm:$0xff] }
 0x27b   : > { %4110 = vmatpush1.bf16.msra.mxu1 %v8606_v53  ;;  %v877_v53 = vld [vmem:[#allocation8 + $0x4b0] sm:$0xff] }
 0x27c   : > { %4192 = vmatpush1.bf16.msra.mxu0 %v8352_v27  ;;  %4111 = vmatprep.subr.bf16.mxu1 %v8615_v54  ;;  %v8654_v27 = vcombine.low %v1120_v36, %v1124_v37  ;;  %v8400_v54 = vcombine.low %v865_v45, %v869_v39  ;;  %v8409_v58 = vcombine.high %v873_v52, %v877_v53  ;;  %v1172_v45 = vld [vmem:[#allocation8 + $0xde8] sm:$0xff] }
 0x27d   : > { %4193 = vmatprep.subr.bf16.mxu0 %v8361_v56  ;;  %v8663_v56 = vcombine.high %v1128_v43, %v1132_v50 }
 0x27f   : > { %4112 = vmatpush1.bf16.msra.mxu1 %v8614_v62  ;;  %v885_v62 = vld [vmem:[#allocation8 + $0x4f0] sm:$0xff] }
 0x280   : > { %4194 = vmatpush1.bf16.msra.mxu0 %v8360_v22  ;;  %4113 = vmatprep.subr.bf16.mxu1 %v8623_v63  ;;  %v8662_v22 = vcombine.low %v1128_v43, %v1132_v50  ;;  %v8408_v63 = vcombine.low %v873_v52, %v877_v53  ;;  %v8417_v1 = vcombine.high %v881_v61, %v885_v62 }
 0x281   : > { %4195 = vmatprep.subr.bf16.mxu0 %v8369_v0  ;;  %v8671_v0 = vcombine.high %v1136_v59, %v1140_v60  ;;  %v8694_v50 = vcombine.low %v1160_v26, %v1164_v28 }
 0x283   : > { %4114 = vmatpush1.bf16.msra.mxu1 %v8622_v6  ;;  %v893_v6 = vld [vmem:[#allocation8 + $0x530] sm:$0xff] }
 0x284   : > { %4196 = vmatpush1.bf16.msra.mxu0 %v8368_v31  ;;  %4115 = vmatprep.subr.bf16.mxu1 %v8631_v7  ;;  %v8670_v31 = vcombine.low %v1136_v59, %v1140_v60  ;;  %v8416_v7 = vcombine.low %v881_v61, %v885_v62  ;;  %v8425_v10 = vcombine.high %v889_v4, %v893_v6  ;;  %v925_v59 = vld [vmem:[#allocation8 + $0x630] sm:$0xff] }
 0x285   : > { %4197 = vmatprep.subr.bf16.mxu0 %v8377_v9  ;;  %v8679_v9 = vcombine.high %v1144_v2, %v1148_v3 }
 0x287   : > { %4116 = vmatpush1.bf16.msra.mxu1 %v8630_v19  ;;  %v901_v19 = vld [vmem:[#allocation8 + $0x570] sm:$0xff] }
 0x288   : > { %4198 = vmatpush1.bf16.msra.mxu0 %v8376_v21  ;;  %4117 = vmatprep.subr.bf16.mxu1 %v8639_v23  ;;  %v8678_v21 = vcombine.low %v1144_v2, %v1148_v3  ;;  %v8424_v23 = vcombine.low %v889_v4, %v893_v6  ;;  %v8433_v25 = vcombine.high %v897_v18, %v901_v19  ;;  %v933_v2 = vld [vmem:[#allocation8 + $0x670] sm:$0xff] }
 0x289   : > { %4199 = vmatprep.subr.bf16.mxu0 %v8385_v24  ;;  %v8687_v24 = vcombine.high %v1152_v13, %v1156_v16 }
 0x28b   : > { %4118 = vmatpush1.bf16.msra.mxu1 %v8638_v32  ;;  %v909_v32 = vld [vmem:[#allocation8 + $0x5b0] sm:$0xff] }
 0x28c   : > { %4200 = vmatpush1.bf16.msra.mxu0 %v8384_v33  ;;  %4128 = vmatprep.subr.bf16.mxu1 %v8647_v34  ;;  %v8686_v33 = vcombine.low %v1152_v13, %v1156_v16  ;;  %v8432_v34 = vcombine.low %v897_v18, %v901_v19  ;;  %v8441_v37 = vcombine.high %v905_v29, %v909_v32  ;;  %v941_v13 = vld [vmem:[#allocation8 + $0x6b0] sm:$0xff] }
 0x28d   : > { %4210 = vmatprep.subr.bf16.mxu0 %v8393_v35  ;;  %v8695_v35 = vcombine.high %v1160_v26, %v1164_v28  ;;  %v8440_v52 = vcombine.low %v905_v29, %v909_v32  ;;  %v949_v26 = vld [vmem:[#allocation8 + $0x6f0] sm:$0xff] }
 0x28e   : > { %4120 = vmatmul.mubr.bf16.vlgmr.msra.gmra.mrb[12].mxu1 %v10853_v5 }
 0x28f   : > { %4202 = vmatmul.mubr.bf16.vlgmr.msra.gmra.mrb[12].mxu0 %v10824_v14  ;;  %4129 = vmatpush1.bf16.msra.mxu1 %v8646_v38  ;;  %v1168_v38 = vld [vmem:[#allocation8 + $0xdc8] sm:$0xff] }
 0x290   : > { %4160 = vmatprep.mubr.bf16.mxu1 %v10856_v17  ;;  %4211 = vmatpush1.bf16.msra.mxu0 %v8392_v41  ;;  %v913_v41 = vld [vmem:[#allocation8 + $0x5d0] sm:$0xff]  ;;  %v8703_v53 = vcombine.high %v1168_v38, %v1172_v45  ;;  %v8702_v60 = vcombine.low %v1168_v38, %v1172_v45 }
 0x291   : > { %4242 = vmatprep.mubr.bf16.mxu0 %v10826_v15  ;;  %4130 = vmatprep.subr.bf16.mxu1 %v8655_v42  ;;  %v917_v42 = vld [vmem:[#allocation8 + $0x5f0] sm:$0xff] }
 0x292   : > { %4212 = vmatprep.subr.bf16.mxu0 %v8401_v51  ;;  %v8448_v61 = vcombine.low %v913_v41, %v917_v42  ;;  %v957_v38 = vld [vmem:[#allocation8 + $0x730] sm:$0xff] }
 0x293   : > { %4131 = vmatpush1.bf16.msra.mxu1 %v8654_v27  ;;  %v8449_v27 = vcombine.high %v913_v41, %v917_v42 }
 0x294   : > { %4213 = vmatpush1.bf16.msra.mxu0 %v8400_v54  ;;  %4132 = vmatprep.subr.bf16.mxu1 %v8663_v56  ;;  %v1176_v54 = vld [vmem:[#allocation8 + $0xe08] sm:$0xff] }
 0x295   : > { %4214 = vmatprep.subr.bf16.mxu0 %v8409_v58  ;;  %v1180_v56 = vld [vmem:[#allocation8 + $0xe28] sm:$0xff]  ;;  %v921_v58 = vld [vmem:[#allocation8 + $0x610] sm:$0xff] }
 0x296   : > { %v8711_v62 = vcombine.high %v1176_v54, %v1180_v56  ;;  %v8710_v3 = vcombine.low %v1176_v54, %v1180_v56  ;;  %v8456_v4 = vcombine.low %v921_v58, %v925_v59 }
 0x297   : > { %4133 = vmatpush1.bf16.msra.mxu1 %v8662_v22  ;;  %v8457_v22 = vcombine.high %v921_v58, %v925_v59  ;;  %v1224_v59 = vld [vmem:[#allocation8 + $0xf88] sm:$0xff] }
 0x298   : > { %4215 = vmatpush1.bf16.msra.mxu0 %v8408_v63  ;;  %4134 = vmatprep.subr.bf16.mxu1 %v8671_v0  ;;  %v1184_v63 = vld [vmem:[#allocation8 + $0xe48] sm:$0xff] }
 0x299   : > { %4216 = vmatprep.subr.bf16.mxu0 %v8417_v1  ;;  %v1188_v0 = vld [vmem:[#allocation8 + $0xe68] sm:$0xff]  ;;  %v929_v1 = vld [vmem:[#allocation8 + $0x650] sm:$0xff] }
 0x29a   : > { %v8719_v6 = vcombine.high %v1184_v63, %v1188_v0  ;;  %v8718_v16 = vcombine.low %v1184_v63, %v1188_v0  ;;  %v8464_v18 = vcombine.low %v929_v1, %v933_v2 }
 0x29b   : > { %4135 = vmatpush1.bf16.msra.mxu1 %v8670_v31  ;;  %v8465_v31 = vcombine.high %v929_v1, %v933_v2  ;;  %v1232_v2 = vld [vmem:[#allocation8 + $0xfc8] sm:$0xff] }
 0x29c   : > { %4217 = vmatpush1.bf16.msra.mxu0 %v8416_v7  ;;  %4136 = vmatprep.subr.bf16.mxu1 %v8679_v9  ;;  %v1192_v7 = vld [vmem:[#allocation8 + $0xe88] sm:$0xff] }
 0x29d   : > { %4218 = vmatprep.subr.bf16.mxu0 %v8425_v10  ;;  %v1196_v9 = vld [vmem:[#allocation8 + $0xea8] sm:$0xff]  ;;  %v937_v10 = vld [vmem:[#allocation8 + $0x690] sm:$0xff] }
 0x29e   : > { %v8727_v19 = vcombine.high %v1192_v7, %v1196_v9  ;;  %v8726_v28 = vcombine.low %v1192_v7, %v1196_v9  ;;  %v8472_v29 = vcombine.low %v937_v10, %v941_v13 }
 0x29f   : > { %4137 = vmatpush1.bf16.msra.mxu1 %v8678_v21  ;;  %v8473_v21 = vcombine.high %v937_v10, %v941_v13  ;;  %v730_v13 = vld [vmem:[#allocation8 + $0x18] sm:$0xff] }
 0x2a0   : > { %4219 = vmatpush1.bf16.msra.mxu0 %v8424_v23  ;;  %4138 = vmatprep.subr.bf16.mxu1 %v8687_v24  ;;  %v1200_v23 = vld [vmem:[#allocation8 + $0xec8] sm:$0xff] }
 0x2a1   : > { %v10877_v36 = vpop.f32.mrb[8].mxu1  ;;  %4220 = vmatprep.subr.bf16.mxu0 %v8433_v25  ;;  %v1204_v24 = vld [vmem:[#allocation8 + $0xee8] sm:$0xff]  ;;  %v945_v25 = vld [vmem:[#allocation8 + $0x6d0] sm:$0xff] }
 0x2a2   : > { %v10879_v39 = vpop.f32.mrb[9].mxu1  ;;  %v8735_v32 = vcombine.high %v1200_v23, %v1204_v24  ;;  %v8734_v45 = vcombine.low %v1200_v23, %v1204_v24  ;;  %v8480_v41 = vcombine.low %v945_v25, %v949_v26 }
 0x2a3   : > { %4139 = vmatpush1.bf16.msra.mxu1 %v8686_v33  ;;  %v3879_v43 = vpop.f32.mrb[10].mxu1  ;;  %v8481_v33 = vcombine.high %v945_v25, %v949_v26  ;;  %v993_v26 = vld [vmem:[#allocation8 + $0x850] sm:$0xff] }
 0x2a4   : > { %4221 = vmatpush1.bf16.msra.mxu0 %v8432_v34  ;;  %v3880_v51 = vpop.f32.mrb[11].mxu1  ;;  %4140 = vmatprep.subr.bf16.mxu1 %v8695_v35  ;;  %v1208_v34 = vld [vmem:[#allocation8 + $0xf08] sm:$0xff] }
 0x2a5   : > { %4222 = vmatprep.subr.bf16.mxu0 %v8441_v37  ;;  %v1212_v35 = vld [vmem:[#allocation8 + $0xf28] sm:$0xff]  ;;  %v953_v37 = vld [vmem:[#allocation8 + $0x710] sm:$0xff] }
 0x2a6   : > { %v8743_v42 = vcombine.high %v1208_v34, %v1212_v35  ;;  %v8489_v43 = vcombine.high %v953_v37, %v957_v38  ;;  %v1220_v51 = vld [vmem:[#allocation8 + $0xf68] sm:$0xff]  ;;  %v8488_v54 = vcombine.low %v953_v37, %v957_v38  ;;  %v746_v37 = vld [vmem:[#allocation8 + $0x98] sm:$0xff] }
 0x2a7   : > { %4141 = vmatpush1.bf16.msra.mxu1 %v8694_v50  ;;  %v1216_v50 = vld [vmem:[#allocation8 + $0xf48] sm:$0xff]  ;;  %v750_v38 = vld [vmem:[#allocation8 + $0xb8] sm:$0xff] }
 0x2a8   : > { %4223 = vmatpush1.bf16.msra.mxu0 %v8440_v52  ;;  %4142 = vmatprep.subr.bf16.mxu1 %v8703_v53  ;;  %v961_v52 = vld [vmem:[#allocation8 + $0x750] sm:$0xff]  ;;  %v8751_v56 = vcombine.high %v1216_v50, %v1220_v51 }
 0x2a9   : > { %4224 = vmatprep.subr.bf16.mxu0 %v8449_v27  ;;  %v965_v53 = vld [vmem:[#allocation8 + $0x770] sm:$0xff]  ;;  %v8742_v27 = vcombine.low %v1208_v34, %v1212_v35 }
 0x2aa   : > { %v8497_v58 = vcombine.high %v961_v52, %v965_v53  ;;  %v8496_v63 = vcombine.low %v961_v52, %v965_v53  ;;  %v754_v53 = vld [vmem:[#allocation8 + $0xd8] sm:$0xff] }
 0x2ab   : > { %4143 = vmatpush1.bf16.msra.mxu1 %v8702_v60  ;;  %v1228_v60 = vld [vmem:[#allocation8 + $0xfa8] sm:$0xff] }
 0x2ac   : > { %4225 = vmatpush1.bf16.msra.mxu0 %v8448_v61  ;;  %4144 = vmatprep.subr.bf16.mxu1 %v8711_v62  ;;  %v969_v61 = vld [vmem:[#allocation8 + $0x790] sm:$0xff]  ;;  %v8759_v0 = vcombine.high %v1224_v59, %v1228_v60 }
 0x2ad   : > { %4226 = vmatprep.subr.bf16.mxu0 %v8457_v22  ;;  %v973_v62 = vld [vmem:[#allocation8 + $0x7b0] sm:$0xff]  ;;  %v8750_v22 = vcombine.low %v1216_v50, %v1220_v51  ;;  %v8283_v51 = vcombine.high %v746_v37, %v750_v38 }
 0x2ae   : > { %v8505_v1 = vcombine.high %v969_v61, %v973_v62  ;;  %v8504_v7 = vcombine.low %v969_v61, %v973_v62  ;;  %v762_v62 = vld [vmem:[#allocation8 + $0x118] sm:$0xff] }
 0x2af   : > { %4145 = vmatpush1.bf16.msra.mxu1 %v8710_v3  ;;  %v1236_v3 = vld [vmem:[#allocation8 + $0xfe8] sm:$0xff] }
 0x2b0   : > { %4227 = vmatpush1.bf16.msra.mxu0 %v8456_v4  ;;  %4146 = vmatprep.subr.bf16.mxu1 %v8719_v6  ;;  %v977_v4 = vld [vmem:[#allocation8 + $0x7d0] sm:$0xff]  ;;  %v8767_v9 = vcombine.high %v1232_v2, %v1236_v3 }
 0x2b1   : > { %4228 = vmatprep.subr.bf16.mxu0 %v8465_v31  ;;  %v981_v6 = vld [vmem:[#allocation8 + $0x7f0] sm:$0xff]  ;;  %v8758_v31 = vcombine.low %v1224_v59, %v1228_v60 }
 0x2b2   : > { %v8513_v10 = vcombine.high %v977_v4, %v981_v6  ;;  %v8512_v23 = vcombine.low %v977_v4, %v981_v6  ;;  %v770_v4 = vld [vmem:[#allocation8 + $0x158] sm:$0xff] }
 0x2b3   : > { %4147 = vmatpush1.bf16.msra.mxu1 %v8718_v16  ;;  %v734_v16 = vld [vmem:[#allocation8 + $0x38] sm:$0xff] }
 0x2b4   : > { %4229 = vmatpush1.bf16.msra.mxu0 %v8464_v18  ;;  %4148 = vmatprep.subr.bf16.mxu1 %v8727_v19  ;;  %v985_v18 = vld [vmem:[#allocation8 + $0x810] sm:$0xff]  ;;  %v8267_v24 = vcombine.high %v730_v13, %v734_v16  ;;  %v774_v6 = vld [vmem:[#allocation8 + $0x178] sm:$0xff] }
 0x2b5   : > { %4230 = vmatprep.subr.bf16.mxu0 %v8473_v21  ;;  %v989_v19 = vld [vmem:[#allocation8 + $0x830] sm:$0xff]  ;;  %v8766_v21 = vcombine.low %v1232_v2, %v1236_v3 }
 0x2b6   : > { %v8521_v25 = vcombine.high %v985_v18, %v989_v19  ;;  %v8520_v34 = vcombine.low %v985_v18, %v989_v19  ;;  %v778_v18 = vld [vmem:[#allocation8 + $0x198] sm:$0xff] }
 0x2b7   : > { %4149 = vmatpush1.bf16.msra.mxu1 %v8726_v28  ;;  %v997_v28 = vld [vmem:[#allocation8 + $0x870] sm:$0xff]  ;;  %v782_v19 = vld [vmem:[#allocation8 + $0x1b8] sm:$0xff] }
 0x2b8   : > { %4231 = vmatpush1.bf16.msra.mxu0 %v8472_v29  ;;  %4150 = vmatprep.subr.bf16.mxu1 %v8735_v32  ;;  %v8266_v29 = vcombine.low %v730_v13, %v734_v16  ;;  %v738_v32 = vld [vmem:[#allocation8 + $0x58] sm:$0xff]  ;;  %v8529_v35 = vcombine.high %v993_v26, %v997_v28  ;;  %v8528_v50 = vcombine.low %v993_v26, %v997_v28 }
 0x2b9   : > { %4232 = vmatprep.subr.bf16.mxu0 %v8481_v33  ;;  %v742_v33 = vld [vmem:[#allocation8 + $0x78] sm:$0xff]  ;;  %v8307_v13 = vcombine.high %v770_v4, %v774_v6  ;;  %v8315_v26 = vcombine.high %v778_v18, %v782_v19 }
 0x2bb   : > { %4151 = vmatpush1.bf16.msra.mxu1 %v8734_v45  ;;  %v8275_v45 = vcombine.high %v738_v32, %v742_v33 }
 0x2bc   : > { %4233 = vmatpush1.bf16.msra.mxu0 %v8480_v41  ;;  %4152 = vmatprep.subr.bf16.mxu1 %v8743_v42  ;;  %v1001_v41 = vld [vmem:[#allocation8 + $0x890] sm:$0xff] }
 0x2bd   : > { %4234 = vmatprep.subr.bf16.mxu0 %v8489_v43  ;;  %v1005_v42 = vld [vmem:[#allocation8 + $0x8b0] sm:$0xff]  ;;  %v8274_v43 = vcombine.low %v738_v32, %v742_v33  ;;  %v790_v32 = vld [vmem:[#allocation8 + $0x1f8] sm:$0xff] }
 0x2be   : > { %v8537_v52 = vcombine.high %v1001_v41, %v1005_v42  ;;  %v8536_v59 = vcombine.low %v1001_v41, %v1005_v42  ;;  %v1041_v33 = vld [vmem:[#allocation8 + $0x9d0] sm:$0xff]  ;;  %v794_v41 = vld [vmem:[#allocation8 + $0x218] sm:$0xff] }
 0x2bf   : > { %4153 = vmatpush1.bf16.msra.mxu1 %v8742_v27  ;;  %v758_v27 = vld [vmem:[#allocation8 + $0xf8] sm:$0xff] }
 0x2c0   : > { %4235 = vmatpush1.bf16.msra.mxu0 %v8488_v54  ;;  %4154 = vmatprep.subr.bf16.mxu1 %v8751_v56  ;;  %v1009_v54 = vld [vmem:[#allocation8 + $0x8d0] sm:$0xff]  ;;  %v8291_v60 = vcombine.high %v754_v53, %v758_v27  ;;  %v798_v42 = vld [vmem:[#allocation8 + $0x238] sm:$0xff] }
 0x2c1   : > { %4236 = vmatprep.subr.bf16.mxu0 %v8497_v58  ;;  %v1013_v56 = vld [vmem:[#allocation8 + $0x8f0] sm:$0xff]  ;;  %v8282_v58 = vcombine.low %v746_v37, %v750_v38 }
 0x2c2   : > { %v8545_v61 = vcombine.high %v1009_v54, %v1013_v56 }
 0x2c3   : > { %4155 = vmatpush1.bf16.msra.mxu1 %v8750_v22  ;;  %v766_v22 = vld [vmem:[#allocation8 + $0x138] sm:$0xff] }
 0x2c4   : > { %4237 = vmatpush1.bf16.msra.mxu0 %v8496_v63  ;;  %4156 = vmatprep.subr.bf16.mxu1 %v8759_v0  ;;  %v1017_v63 = vld [vmem:[#allocation8 + $0x910] sm:$0xff]  ;;  %v8299_v2 = vcombine.high %v762_v62, %v766_v22 }
 0x2c5   : > { %4238 = vmatprep.subr.bf16.mxu0 %v8505_v1  ;;  %v1021_v0 = vld [vmem:[#allocation8 + $0x930] sm:$0xff]  ;;  %v8544_v1 = vcombine.low %v1009_v54, %v1013_v56  ;;  %v802_v54 = vld [vmem:[#allocation8 + $0x258] sm:$0xff] }
 0x2c6   : > { %v8553_v3 = vcombine.high %v1017_v63, %v1021_v0  ;;  %v806_v56 = vld [vmem:[#allocation8 + $0x278] sm:$0xff] }
 0x2c7   : > { %4157 = vmatpush1.bf16.msra.mxu1 %v8758_v31  ;;  %v1025_v31 = vld [vmem:[#allocation8 + $0x950] sm:$0xff] }
 0x2c8   : > { %4239 = vmatpush1.bf16.msra.mxu0 %v8504_v7  ;;  %4158 = vmatprep.subr.bf16.mxu1 %v8767_v9  ;;  %v1029_v7 = vld [vmem:[#allocation8 + $0x970] sm:$0xff]  ;;  %v8298_v9 = vcombine.low %v762_v62, %v766_v22  ;;  %v8339_v62 = vcombine.high %v802_v54, %v806_v56 }
 0x2c9   : > { %4240 = vmatprep.subr.bf16.mxu0 %v8513_v10  ;;  %v8552_v10 = vcombine.low %v1017_v63, %v1021_v0  ;;  %v8561_v16 = vcombine.high %v1025_v31, %v1029_v7  ;;  %v810_v63 = vld [vmem:[#allocation8 + $0x298] sm:$0xff] }
 0x2ca   : > { %v814_v0 = vld [vmem:[#allocation8 + $0x2b8] sm:$0xff] }
 0x2cb   : > { %4159 = vmatpush1.bf16.msra.mxu1 %v8766_v21  ;;  %v1033_v21 = vld [vmem:[#allocation8 + $0x990] sm:$0xff] }
 0x2cc   : > { %4241 = vmatpush1.bf16.msra.mxu0 %v8512_v23  ;;  %4333 = vmatprep.subr.bf16.mxu1 %v8267_v24  ;;  %v1037_v23 = vld [vmem:[#allocation8 + $0x9b0] sm:$0xff]  ;;  %v8306_v24 = vcombine.low %v770_v4, %v774_v6  ;;  %v8347_v4 = vcombine.high %v810_v63, %v814_v0 }
 0x2cd   : > { %4251 = vmatprep.subr.bf16.mxu0 %v8521_v25  ;;  %v8560_v25 = vcombine.low %v1025_v31, %v1029_v7  ;;  %v8569_v28 = vcombine.high %v1033_v21, %v1037_v23  ;;  %v8568_v37 = vcombine.low %v1033_v21, %v1037_v23  ;;  %v818_v31 = vld [vmem:[#allocation8 + $0x2d8] sm:$0xff] }
 0x2ce   : > { %4161 = vmatmul.mubr.bf16.vlgmr.msra.gmra.mrb[12].mxu1 %v10867_v57  ;;  %v822_v7 = vld [vmem:[#allocation8 + $0x2f8] sm:$0xff] }
 0x2cf   : > { %4243 = vmatmul.mubr.bf16.vlgmr.msra.gmra.mrb[12].mxu0 %v10818_v11  ;;  %4334 = vmatpush1.bf16.msra.mxu1 %v8266_v29  ;;  %v786_v29 = vld [vmem:[#allocation8 + $0x1d8] sm:$0xff] }
 0x2d0   : > { %4252 = vmatpush1.bf16.msra.mxu0 %v8520_v34  ;;  %4283 = vmatprep.mubr.bf16.mxu0 %v10839_v40  ;;  %v1045_v34 = vld [vmem:[#allocation8 + $0x9f0] sm:$0xff]  ;;  %v8323_v38 = vcombine.high %v786_v29, %v790_v32  ;;  %v826_v21 = vld [vmem:[#allocation8 + $0x318] sm:$0xff] }
 0x2d1   : > { %4365 = vmatprep.mubr.bf16.mxu1 %v10820_v12  ;;  %4253 = vmatprep.subr.bf16.mxu0 %v8529_v35  ;;  %v8290_v12 = vcombine.low %v754_v53, %v758_v27  ;;  %v8314_v35 = vcombine.low %v778_v18, %v782_v19  ;;  %v8331_v53 = vcombine.high %v794_v41, %v798_v42  ;;  %v830_v23 = vld [vmem:[#allocation8 + $0x338] sm:$0xff] }
 0x2d2   : > { %4335 = vmatprep.subr.bf16.mxu1 %v8275_v45  ;;  %v8577_v45 = vcombine.high %v1041_v33, %v1045_v34  ;;  %v8355_v18 = vcombine.high %v818_v31, %v822_v7 }
 0x2d3   : > { %4336 = vmatpush1.bf16.msra.mxu1 %v8274_v43  ;;  %v1049_v43 = vld [vmem:[#allocation8 + $0xa10] sm:$0xff] }
 0x2d4   : > { %4254 = vmatpush1.bf16.msra.mxu0 %v8528_v50  ;;  %4337 = vmatprep.subr.bf16.mxu1 %v8283_v51  ;;  %v1053_v50 = vld [vmem:[#allocation8 + $0xa30] sm:$0xff]  ;;  %v8322_v51 = vcombine.low %v786_v29, %v790_v32  ;;  %v8363_v29 = vcombine.high %v826_v21, %v830_v23 }
 0x2d5   : > { %4255 = vmatprep.subr.bf16.mxu0 %v8537_v52  ;;  %v8576_v52 = vcombine.low %v1041_v33, %v1045_v34  ;;  %v8585_v27 = vcombine.high %v1049_v43, %v1053_v50  ;;  %v834_v33 = vld [vmem:[#allocation8 + $0x358] sm:$0xff] }
 0x2d6   : > { %v838_v34 = vld [vmem:[#allocation8 + $0x378] sm:$0xff] }
 0x2d7   : > { %4338 = vmatpush1.bf16.msra.mxu1 %v8282_v58  ;;  %v1057_v58 = vld [vmem:[#allocation8 + $0xa50] sm:$0xff] }
 0x2d8   : > { %4256 = vmatpush1.bf16.msra.mxu0 %v8536_v59  ;;  %4339 = vmatprep.subr.bf16.mxu1 %v8291_v60  ;;  %v1061_v59 = vld [vmem:[#allocation8 + $0xa70] sm:$0xff]  ;;  %v8330_v60 = vcombine.low %v794_v41, %v798_v42  ;;  %v8371_v41 = vcombine.high %v834_v33, %v838_v34 }
 0x2d9   : > { %4257 = vmatprep.subr.bf16.mxu0 %v8545_v61  ;;  %v8584_v61 = vcombine.low %v1049_v43, %v1053_v50  ;;  %v8593_v22 = vcombine.high %v1057_v58, %v1061_v59  ;;  %v842_v43 = vld [vmem:[#allocation8 + $0x398] sm:$0xff] }
 0x2da   : > { %v846_v50 = vld [vmem:[#allocation8 + $0x3b8] sm:$0xff] }
 0x2db   : > { %4340 = vmatpush1.bf16.msra.mxu1 %v8290_v12  ;;  %v1065_v12 = vld [vmem:[#allocation8 + $0xa90] sm:$0xff] }
 0x2dc   : > { %4258 = vmatpush1.bf16.msra.mxu0 %v8544_v1  ;;  %4341 = vmatprep.subr.bf16.mxu1 %v8299_v2  ;;  %v1069_v1 = vld [vmem:[#allocation8 + $0xab0] sm:$0xff]  ;;  %v8338_v2 = vcombine.low %v802_v54, %v806_v56  ;;  %v8379_v54 = vcombine.high %v842_v43, %v846_v50 }
 0x2dd   : > { %4259 = vmatprep.subr.bf16.mxu0 %v8553_v3  ;;  %v8592_v3 = vcombine.low %v1057_v58, %v1061_v59  ;;  %v8601_v6 = vcombine.high %v1065_v12, %v1069_v1  ;;  %v850_v58 = vld [vmem:[#allocation8 + $0x3d8] sm:$0xff] }
 0x2de   : > { %v854_v59 = vld [vmem:[#allocation8 + $0x3f8] sm:$0xff] }
 0x2df   : > { %4342 = vmatpush1.bf16.msra.mxu1 %v8298_v9  ;;  %v1073_v9 = vld [vmem:[#allocation8 + $0xad0] sm:$0xff] }
 0x2e0   : > { %4260 = vmatpush1.bf16.msra.mxu0 %v8552_v10  ;;  %4343 = vmatprep.subr.bf16.mxu1 %v8307_v13  ;;  %v1077_v10 = vld [vmem:[#allocation8 + $0xaf0] sm:$0xff]  ;;  %v8346_v13 = vcombine.low %v810_v63, %v814_v0  ;;  %v8387_v63 = vcombine.high %v850_v58, %v854_v59 }
 0x2e1   : > { %4261 = vmatprep.subr.bf16.mxu0 %v8561_v16  ;;  %v8600_v16 = vcombine.low %v1065_v12, %v1069_v1  ;;  %v8609_v19 = vcombine.high %v1073_v9, %v1077_v10  ;;  %v858_v12 = vld [vmem:[#allocation8 + $0x418] sm:$0xff] }
 0x2e2   : > { %v862_v1 = vld [vmem:[#allocation8 + $0x438] sm:$0xff] }
 0x2e3   : > { %4344 = vmatpush1.bf16.msra.mxu1 %v8306_v24  ;;  %v1081_v24 = vld [vmem:[#allocation8 + $0xb10] sm:$0xff] }
 0x2e4   : > { %4262 = vmatpush1.bf16.msra.mxu0 %v8560_v25  ;;  %4345 = vmatprep.subr.bf16.mxu1 %v8315_v26  ;;  %v1085_v25 = vld [vmem:[#allocation8 + $0xb30] sm:$0xff]  ;;  %v8354_v26 = vcombine.low %v818_v31, %v822_v7  ;;  %v8395_v31 = vcombine.high %v858_v12, %v862_v1 }
 0x2e5   : > { %4263 = vmatprep.subr.bf16.mxu0 %v8569_v28  ;;  %v8608_v28 = vcombine.low %v1073_v9, %v1077_v10  ;;  %v8617_v32 = vcombine.high %v1081_v24, %v1085_v25  ;;  %v1121_v9 = vld [vmem:[#allocation8 + $0xc50] sm:$0xff] }
 0x2e6   : > { %v1125_v10 = vld [vmem:[#allocation8 + $0xc70] sm:$0xff] }
 0x2e7   : > { %4346 = vmatpush1.bf16.msra.mxu1 %v8314_v35  ;;  %v1089_v35 = vld [vmem:[#allocation8 + $0xb50] sm:$0xff] }
 0x2e8   : > { %4264 = vmatpush1.bf16.msra.mxu0 %v8568_v37  ;;  %4347 = vmatprep.subr.bf16.mxu1 %v8323_v38  ;;  %v1093_v37 = vld [vmem:[#allocation8 + $0xb70] sm:$0xff]  ;;  %v8362_v38 = vcombine.low %v826_v21, %v830_v23  ;;  %v8657_v21 = vcombine.high %v1121_v9, %v1125_v10  ;;  %v874_v23 = vld [vmem:[#allocation8 + $0x498] sm:$0xff] }
 0x2e9   : > { %4265 = vmatprep.subr.bf16.mxu0 %v8577_v45  ;;  %v8616_v45 = vcombine.low %v1081_v24, %v1085_v25  ;;  %v8625_v42 = vcombine.high %v1089_v35, %v1093_v37  ;;  %v878_v24 = vld [vmem:[#allocation8 + $0x4b8] sm:$0xff] }
 0x2eb   : > { %4348 = vmatpush1.bf16.msra.mxu1 %v8322_v51  ;;  %v1097_v51 = vld [vmem:[#allocation8 + $0xb90] sm:$0xff] }
 0x2ec   : > { %4266 = vmatpush1.bf16.msra.mxu0 %v8576_v52  ;;  %4349 = vmatprep.subr.bf16.mxu1 %v8331_v53  ;;  %v1101_v52 = vld [vmem:[#allocation8 + $0xbb0] sm:$0xff]  ;;  %v8370_v53 = vcombine.low %v834_v33, %v838_v34  ;;  %v8411_v33 = vcombine.high %v874_v23, %v878_v24 }
 0x2ed   : > { %4267 = vmatprep.subr.bf16.mxu0 %v8585_v27  ;;  %v8624_v27 = vcombine.low %v1089_v35, %v1093_v37  ;;  %v8633_v56 = vcombine.high %v1097_v51, %v1101_v52  ;;  %v882_v35 = vld [vmem:[#allocation8 + $0x4d8] sm:$0xff] }
 0x2ee   : > { %v886_v37 = vld [vmem:[#allocation8 + $0x4f8] sm:$0xff] }
 0x2ef   : > { %4350 = vmatpush1.bf16.msra.mxu1 %v8330_v60  ;;  %v1105_v60 = vld [vmem:[#allocation8 + $0xbd0] sm:$0xff] }
 0x2f0   : > { %4268 = vmatpush1.bf16.msra.mxu0 %v8584_v61  ;;  %4351 = vmatprep.subr.bf16.mxu1 %v8339_v62  ;;  %v1109_v61 = vld [vmem:[#allocation8 + $0xbf0] sm:$0xff]  ;;  %v8378_v62 = vcombine.low %v842_v43, %v846_v50  ;;  %v890_v50 = vld [vmem:[#allocation8 + $0x518] sm:$0xff] }
 0x2f1   : > { %4269 = vmatprep.subr.bf16.mxu0 %v8593_v22  ;;  %v8632_v22 = vcombine.low %v1097_v51, %v1101_v52  ;;  %v8641_v0 = vcombine.high %v1105_v60, %v1109_v61  ;;  %v894_v51 = vld [vmem:[#allocation8 + $0x538] sm:$0xff]  ;;  %v1145_v52 = vld [vmem:[#allocation8 + $0xd10] sm:$0xff] }
 0x2f3   : > { %4352 = vmatpush1.bf16.msra.mxu1 %v8338_v2  ;;  %v1113_v2 = vld [vmem:[#allocation8 + $0xc10] sm:$0xff] }
 0x2f4   : > { %4270 = vmatpush1.bf16.msra.mxu0 %v8592_v3  ;;  %4353 = vmatprep.subr.bf16.mxu1 %v8347_v4  ;;  %v1117_v3 = vld [vmem:[#allocation8 + $0xc30] sm:$0xff]  ;;  %v8386_v4 = vcombine.low %v850_v58, %v854_v59  ;;  %v898_v58 = vld [vmem:[#allocation8 + $0x558] sm:$0xff] }
 0x2f5   : > { %4271 = vmatprep.subr.bf16.mxu0 %v8601_v6  ;;  %v8640_v6 = vcombine.low %v1105_v60, %v1109_v61  ;;  %v8649_v7 = vcombine.high %v1113_v2, %v1117_v3  ;;  %v902_v59 = vld [vmem:[#allocation8 + $0x578] sm:$0xff]  ;;  %v10889_v60 = vld [vmem:[#allocation10] sm:$0xff]  ;;  %v1153_v61 = vld [vmem:[#allocation8 + $0xd50] sm:$0xff] }
 0x2f7   : > { %4354 = vmatpush1.bf16.msra.mxu1 %v8346_v13  ;;  %v8394_v13 = vcombine.low %v858_v12, %v862_v1  ;;  %v1244_v12 = vrot.slane %v10889_v60, %v10796_v46 }
 0x2f8   : > { %4272 = vmatpush1.bf16.msra.mxu0 %v8600_v16  ;;  %4355 = vmatprep.subr.bf16.mxu1 %v8355_v18  ;;  %v866_v16 = vld [vmem:[#allocation8 + $0x458] sm:$0xff] }
 0x2f9   : > { %4273 = vmatprep.subr.bf16.mxu0 %v8609_v19  ;;  %v870_v18 = vld [vmem:[#allocation8 + $0x478] sm:$0xff]  ;;  %v8648_v19 = vcombine.low %v1113_v2, %v1117_v3 }
 0x2fa   : > { %v8403_v25 = vcombine.high %v866_v16, %v870_v18  ;;  %v906_v2 = vld [vmem:[#allocation8 + $0x598] sm:$0xff] }
 0x2fb   : > { %4356 = vmatpush1.bf16.msra.mxu1 %v8354_v26  ;;  %v1129_v26 = vld [vmem:[#allocation8 + $0xc90] sm:$0xff]  ;;  %v910_v3 = vld [vmem:[#allocation8 + $0x5b8] sm:$0xff] }
 0x2fc   : > { %4274 = vmatpush1.bf16.msra.mxu0 %v8608_v28  ;;  %4357 = vmatprep.subr.bf16.mxu1 %v8363_v29  ;;  %v1133_v28 = vld [vmem:[#allocation8 + $0xcb0] sm:$0xff]  ;;  %v8402_v29 = vcombine.low %v866_v16, %v870_v18  ;;  %v914_v18 = vld [vmem:[#allocation8 + $0x5d8] sm:$0xff] }
 0x2fd   : > { %4275 = vmatprep.subr.bf16.mxu0 %v8617_v32  ;;  %v8656_v32 = vcombine.low %v1121_v9, %v1125_v10  ;;  %v8665_v34 = vcombine.high %v1129_v26, %v1133_v28  ;;  %v8443_v10 = vcombine.high %v906_v2, %v910_v3 }
 0x2ff   : > { %4358 = vmatpush1.bf16.msra.mxu1 %v8362_v38  ;;  %v1141_v38 = vld [vmem:[#allocation8 + $0xcf0] sm:$0xff] }
 0x300   : > { %4276 = vmatpush1.bf16.msra.mxu0 %v8616_v45  ;;  %4359 = vmatprep.subr.bf16.mxu1 %v8371_v41  ;;  %v8410_v45 = vcombine.low %v874_v23, %v878_v24  ;;  %v8664_v41 = vcombine.low %v1129_v26, %v1133_v28  ;;  %v1169_v24 = vld [vmem:[#allocation8 + $0xdd0] sm:$0xff] }
 0x301   : > { %4277 = vmatprep.subr.bf16.mxu0 %v8625_v42  ;;  %v8419_v42 = vcombine.high %v882_v35, %v886_v37 }
 0x303   : > { %4360 = vmatpush1.bf16.msra.mxu1 %v8370_v53  ;;  %v1149_v53 = vld [vmem:[#allocation8 + $0xd30] sm:$0xff] }
 0x304   : > { %4278 = vmatpush1.bf16.msra.mxu0 %v8624_v27  ;;  %4361 = vmatprep.subr.bf16.mxu1 %v8379_v54  ;;  %v8427_v54 = vcombine.high %v890_v50, %v894_v51 }
 0x305   : > { %4279 = vmatprep.subr.bf16.mxu0 %v8633_v56  ;;  %v8681_v56 = vcombine.high %v1145_v52, %v1149_v53 }
 0x307   : > { %4362 = vmatpush1.bf16.msra.mxu1 %v8378_v62  ;;  %v1157_v62 = vld [vmem:[#allocation8 + $0xd70] sm:$0xff] }
 0x308   : > { %4280 = vmatpush1.bf16.msra.mxu0 %v8632_v22  ;;  %4363 = vmatprep.subr.bf16.mxu1 %v8387_v63  ;;  %v8426_v22 = vcombine.low %v890_v50, %v894_v51  ;;  %v8680_v63 = vcombine.low %v1145_v52, %v1149_v53  ;;  %v8689_v1 = vcombine.high %v1153_v61, %v1157_v62  ;;  %v930_v51 = vld [vmem:[#allocation8 + $0x658] sm:$0xff]  ;;  %v1185_v53 = vld [vmem:[#allocation8 + $0xe50] sm:$0xff] }
 0x309   : > { %4281 = vmatprep.subr.bf16.mxu0 %v8641_v0  ;;  %v8435_v0 = vcombine.high %v898_v58, %v902_v59  ;;  %v8688_v9 = vcombine.low %v1153_v61, %v1157_v62  ;;  %v934_v52 = vld [vmem:[#allocation8 + $0x678] sm:$0xff]  ;;  %v1193_v62 = vld [vmem:[#allocation8 + $0xe90] sm:$0xff] }
 0x30a   : > { %v942_v61 = vld [vmem:[#allocation8 + $0x6b8] sm:$0xff] }
 0x30b   : > { %4364 = vmatpush1.bf16.msra.mxu1 %v8386_v4  ;;  %v1248_v4 = vrot.slane %v10889_v60, %v10802_v48 }
 0x30c   : > { %4282 = vmatpush1.bf16.msra.mxu0 %v8640_v6  ;;  %4374 = vmatprep.subr.bf16.mxu1 %v8395_v31  ;;  %v1161_v6 = vld [vmem:[#allocation8 + $0xd90] sm:$0xff] }
 0x30d   : > { %4292 = vmatprep.subr.bf16.mxu0 %v8649_v7  ;;  %v1165_v31 = vld [vmem:[#allocation8 + $0xdb0] sm:$0xff]  ;;  %v8434_v7 = vcombine.low %v898_v58, %v902_v59  ;;  %v938_v59 = vld [vmem:[#allocation8 + $0x698] sm:$0xff] }
 0x30e   : > { %4366 = vmatmul.mubr.bf16.vlgmr.msra.gmra.mrb[16].mxu1 %v10824_v14  ;;  %v1137_v14 = vld [vmem:[#allocation8 + $0xcd0] sm:$0xff]  ;;  %v8697_v16 = vcombine.high %v1161_v6, %v1165_v31 }
 0x30f   : > { %4284 = vmatmul.mubr.bf16.vlgmr.msra.gmra.mrb[12].mxu0 %v10853_v5  ;;  %4375 = vmatpush1.bf16.msra.mxu1 %v8394_v13  ;;  %v8673_v43 = vcombine.high %v1137_v14, %v1141_v38  ;;  %v8672_v27 = vcombine.low %v1137_v14, %v1141_v38  ;;  %v3876_v13 = vadd.f32 %v10877_v36, %v1244_v12  ;;  %v922_v14 = vld [vmem:[#allocation8 + $0x618] sm:$0xff]  ;;  %v1177_v38 = vld [vmem:[#allocation8 + $0xe10] sm:$0xff] }
 0x310   : > { %4293 = vmatpush1.bf16.msra.mxu0 %v8648_v19  ;;  %4324 = vmatprep.mubr.bf16.mxu0 %v10856_v17  ;;  %v918_v19 = vld [vmem:[#allocation8 + $0x5f8] sm:$0xff]  ;;  %v8475_v12 = vcombine.high %v938_v59, %v942_v61 }
 0x311   : > { %4406 = vmatprep.mubr.bf16.mxu1 %v10826_v15  ;;  %4294 = vmatprep.subr.bf16.mxu0 %v8657_v21  ;;  %v8418_v15 = vcombine.low %v882_v35, %v886_v37  ;;  %v3878_v21 = vadd.f32 %v10879_v39, %v1248_v4  ;;  %v8451_v36 = vcombine.high %v914_v18, %v918_v19  ;;  %v926_v39 = vld [vmem:[#allocation8 + $0x638] sm:$0xff]  ;;  %v1201_v4 = vld [vmem:[#allocation8 + $0xed0] sm:$0xff] }
 0x312   : > { %4376 = vmatprep.subr.bf16.mxu1 %v8403_v25  ;;  %v1173_v25 = vld [vmem:[#allocation8 + $0xdf0] sm:$0xff] }
 0x313   : > { %4377 = vmatpush1.bf16.msra.mxu1 %v8402_v29  ;;  %v8442_v29 = vcombine.low %v906_v2, %v910_v3  ;;  %v8705_v37 = vcombine.high %v1169_v24, %v1173_v25  ;;  %v946_v2 = vld [vmem:[#allocation8 + $0x6d8] sm:$0xff] }
 0x314   : > { %4295 = vmatpush1.bf16.msra.mxu0 %v8656_v32  ;;  %4378 = vmatprep.subr.bf16.mxu1 %v8411_v33  ;;  %v950_v3 = vld [vmem:[#allocation8 + $0x6f8] sm:$0xff] }
 0x315   : > { %4296 = vmatprep.subr.bf16.mxu0 %v8665_v34  ;;  %v8696_v34 = vcombine.low %v1161_v6, %v1165_v31  ;;  %v1205_v6 = vld [vmem:[#allocation8 + $0xef0] sm:$0xff]  ;;  %v8474_v31 = vcombine.low %v938_v59, %v942_v61  ;;  %v986_v61 = vld [vmem:[#allocation8 + $0x818] sm:$0xff] }
 0x317   : > { %4379 = vmatpush1.bf16.msra.mxu1 %v8410_v45  ;;  %v1181_v45 = vld [vmem:[#allocation8 + $0xe30] sm:$0xff] }
 0x318   : > { %4297 = vmatpush1.bf16.msra.mxu0 %v8664_v41  ;;  %4380 = vmatprep.subr.bf16.mxu1 %v8419_v42  ;;  %v8450_v41 = vcombine.low %v914_v18, %v918_v19  ;;  %v8704_v42 = vcombine.low %v1169_v24, %v1173_v25  ;;  %v8713_v50 = vcombine.high %v1177_v38, %v1181_v45  ;;  %v1209_v18 = vld [vmem:[#allocation8 + $0xf10] sm:$0xff] }
 0x319   : > { %4298 = vmatprep.subr.bf16.mxu0 %v8673_v43  ;;  %v8459_v43 = vcombine.high %v922_v14, %v926_v39  ;;  %v1213_v19 = vld [vmem:[#allocation8 + $0xf30] sm:$0xff] }
 0x31a   : > { %v8745_v25 = vcombine.high %v1209_v18, %v1213_v19 }
 0x31b   : > { %4381 = vmatpush1.bf16.msra.mxu1 %v8418_v15  ;;  %v1189_v15 = vld [vmem:[#allocation8 + $0xe70] sm:$0xff] }
 0x31c   : > { %4299 = vmatpush1.bf16.msra.mxu0 %v8672_v27  ;;  %4382 = vmatprep.subr.bf16.mxu1 %v8427_v54  ;;  %v8458_v27 = vcombine.low %v922_v14, %v926_v39  ;;  %v8712_v54 = vcombine.low %v1177_v38, %v1181_v45  ;;  %v8721_v58 = vcombine.high %v1185_v53, %v1189_v15  ;;  %v970_v39 = vld [vmem:[#allocation8 + $0x798] sm:$0xff]  ;;  %v1225_v45 = vld [vmem:[#allocation8 + $0xf90] sm:$0xff] }
 0x31d   : > { %4300 = vmatprep.subr.bf16.mxu0 %v8681_v56  ;;  %v8467_v56 = vcombine.high %v930_v51, %v934_v52  ;;  %v974_v38 = vld [vmem:[#allocation8 + $0x7b8] sm:$0xff] }
 0x31f   : > { %4383 = vmatpush1.bf16.msra.mxu1 %v8426_v22  ;;  %v1197_v22 = vld [vmem:[#allocation8 + $0xeb0] sm:$0xff] }
 0x320   : > { %4301 = vmatpush1.bf16.msra.mxu0 %v8680_v63  ;;  %4384 = vmatprep.subr.bf16.mxu1 %v8435_v0  ;;  %v8466_v63 = vcombine.low %v930_v51, %v934_v52  ;;  %v8720_v0 = vcombine.low %v1185_v53, %v1189_v15  ;;  %v978_v52 = vld [vmem:[#allocation8 + $0x7d8] sm:$0xff]  ;;  %v1233_v15 = vld [vmem:[#allocation8 + $0xfd0] sm:$0xff] }
 0x321   : > { %4302 = vmatprep.subr.bf16.mxu0 %v8689_v1  ;;  %v3998_v23 = vpop.f32.mrb[8].mxu0  ;;  %v8729_v1 = vcombine.high %v1193_v62, %v1197_v22  ;;  %v982_v53 = vld [vmem:[#allocation8 + $0x7f8] sm:$0xff] }
 0x322   : > { %v10897_v26 = vadd.f32 %v3998_v23, %v3876_v13  ;;  %v4000_v28 = vpop.f32.mrb[9].mxu0  ;;  %v954_v13 = vld [vmem:[#allocation8 + $0x718] sm:$0xff]  ;;  %v8736_v23 = vcombine.low %v1201_v4, %v1205_v6 }
 0x323   : > { %4385 = vmatpush1.bf16.msra.mxu1 %v8434_v7  ;;  %v10899_v32 = vadd.f32 %v4000_v28, %v3878_v21  ;;  %v4002_v33 = vpop.f32.mrb[10].mxu0  ;;  %v8728_v7 = vcombine.low %v1193_v62, %v1197_v22  ;;  %v8482_v21 = vcombine.low %v946_v2, %v950_v3  ;;  %v962_v28 = vld [vmem:[#allocation8 + $0x758] sm:$0xff]  ;;  %v8514_v22 = vcombine.low %v978_v52, %v982_v53 }
 0x324   : > { %4303 = vmatpush1.bf16.msra.mxu0 %v8688_v9  ;;  %4386 = vmatprep.subr.bf16.mxu1 %v8443_v10  ;;  %v4003_v35 = vpop.f32.mrb[11].mxu0  ;;  %v8483_v9 = vcombine.high %v946_v2, %v950_v3  ;;  %v8737_v10 = vcombine.high %v1201_v4, %v1205_v6  ;;  %v1217_v33 = vld [vmem:[#allocation8 + $0xf50] sm:$0xff]  ;;  %v990_v62 = vld [vmem:[#allocation8 + $0x838] sm:$0xff]  ;;  %v9524_v6 = vld [vmem:[%s10773_s14] ss:$28 sps:$4 sm:$0xff]  }
 0x325   : > { %4304 = vmatprep.subr.bf16.mxu0 %v8697_v16  ;;  %v958_v16 = vld [vmem:[#allocation8 + $0x738] sm:$0xff]  ;;  %v8744_v35 = vcombine.low %v1209_v18, %v1213_v19  ;;  %v4498_v3 = vmax.f32 %v10899_v32, 0.0  ;;  %v8522_v4 = vcombine.low %v986_v61, %v990_v62 }
 0x326   : > { %v8491_v24 = vcombine.high %v954_v13, %v958_v16  ;;  %v998_v2 = vld [vmem:[#allocation8 + $0x878] sm:$0xff] }
 0x327   : > { %4387 = vmatpush1.bf16.msra.mxu1 %v8442_v29  ;;  %v966_v29 = vld [vmem:[#allocation8 + $0x778] sm:$0xff] }
 0x328   : > { %4305 = vmatpush1.bf16.msra.mxu0 %v8696_v34  ;;  %4388 = vmatprep.subr.bf16.mxu1 %v8451_v36  ;;  %v1221_v34 = vld [vmem:[#allocation8 + $0xf70] sm:$0xff]  ;;  %v8490_v36 = vcombine.low %v954_v13, %v958_v16  ;;  %v10906_v13 = vpack.c.bf16 %v4498_v3, %v4498_v3  ;;  %v9527_v16 = vld [vmem:[%s10773_s14 + $0x38] ss:$28 sps:$4 sm:$0xff]  }
 0x329   : > { %4306 = vmatprep.subr.bf16.mxu0 %v8705_v37  ;;  %v8499_v37 = vcombine.high %v962_v28, %v966_v29  ;;  %v8753_v14 = vcombine.high %v1217_v33, %v1221_v34  ;;  %v9532_v19 = vld [vmem:[%s10773_s14 + $0x74] ss:$28 sps:$4 sm:$0xff]  }
 0x32b   : > { %4389 = vmatpush1.bf16.msra.mxu1 %v8450_v41  ;;  %v1229_v41 = vld [vmem:[#allocation8 + $0xfb0] sm:$0xff] }
 0x32c   : > { %4307 = vmatpush1.bf16.msra.mxu0 %v8704_v42  ;;  %4390 = vmatprep.subr.bf16.mxu1 %v8459_v43  ;;  %v8498_v42 = vcombine.low %v962_v28, %v966_v29  ;;  %v8752_v43 = vcombine.low %v1217_v33, %v1221_v34  ;;  %v8761_v51 = vcombine.high %v1225_v45, %v1229_v41  ;;  %v1018_v28 = vld [vmem:[#allocation8 + $0x918] sm:$0xff]  ;;  %v9533_v34 = vld [vmem:[%s10773_s14 + $0xa8] ss:$28 sps:$4 sm:$0xff]  }
 0x32d   : > { %4308 = vmatprep.subr.bf16.mxu0 %v8713_v50  ;;  %v8507_v50 = vcombine.high %v970_v39, %v974_v38  ;;  %v1022_v29 = vld [vmem:[#allocation8 + $0x938] sm:$0xff] }
 0x32f   : > { %4391 = vmatpush1.bf16.msra.mxu1 %v8458_v27  ;;  %v1237_v27 = vld [vmem:[#allocation8 + $0xff0] sm:$0xff] }
 0x330   : > { %4309 = vmatpush1.bf16.msra.mxu0 %v8712_v54  ;;  %4392 = vmatprep.subr.bf16.mxu1 %v8467_v56  ;;  %v8506_v54 = vcombine.low %v970_v39, %v974_v38  ;;  %v8760_v56 = vcombine.low %v1225_v45, %v1229_v41  ;;  %v8769_v59 = vcombine.high %v1233_v15, %v1237_v27  ;;  %v9536_v38 = vld [vmem:[%s10773_s14 + $0xe0] ss:$28 sps:$4 sm:$0xff]  }
 0x331   : > { %4310 = vmatprep.subr.bf16.mxu0 %v8721_v58  ;;  %v8515_v58 = vcombine.high %v978_v52, %v982_v53  ;;  %v8554_v39 = vcombine.low %v1018_v28, %v1022_v29  ;;  %v9541_v41 = vld [vmem:[%s10773_s14 + $0x11c] ss:$28 sps:$4 sm:$0xff]   ;;  %v9544_v53 = vld [vmem:[%s10773_s14 + $0x154] ss:$28 sps:$4 sm:$0xff]  }
 0x333   : > { %4393 = vmatpush1.bf16.msra.mxu1 %v8466_v63  ;;  %v8768_v63 = vcombine.low %v1233_v15, %v1237_v27  ;;  %v1042_v15 = vld [vmem:[#allocation8 + $0x9d8] sm:$0xff] }
 0x334   : > { %4311 = vmatpush1.bf16.msra.mxu0 %v8720_v0  ;;  %4394 = vmatprep.subr.bf16.mxu1 %v8475_v12  ;;  %v8523_v0 = vcombine.high %v986_v61, %v990_v62  ;;  %v9526_v12 = vld [vmem:[%s10773_s14 + $0x4] ss:$28 sps:$4 sm:$0xff]   ;;  %v1046_v27 = vld [vmem:[#allocation8 + $0x9f8] sm:$0xff] }
 0x335   : > { %4312 = vmatprep.subr.bf16.mxu0 %v8729_v1  ;;  %v994_v1 = vld [vmem:[#allocation8 + $0x858] sm:$0xff] }
 0x336   : > { %v8530_v32 = vcombine.low %v994_v1, %v998_v2  ;;  %v1050_v61 = vld [vmem:[#allocation8 + $0xa18] sm:$0xff] }
 0x337   : > { %4395 = vmatpush1.bf16.msra.mxu1 %v8474_v31  ;;  %v8531_v31 = vcombine.high %v994_v1, %v998_v2  ;;  %v1054_v62 = vld [vmem:[#allocation8 + $0xa38] sm:$0xff] }
 0x338   : > { %4313 = vmatpush1.bf16.msra.mxu0 %v8728_v7  ;;  %4396 = vmatprep.subr.bf16.mxu1 %v8483_v9  ;;  %v1002_v7 = vld [vmem:[#allocation8 + $0x898] sm:$0xff]  ;;  %v8586_v3 = vcombine.low %v1050_v61, %v1054_v62 }
 0x339   : > { %4314 = vmatprep.subr.bf16.mxu0 %v8737_v10  ;;  %v1006_v9 = vld [vmem:[#allocation8 + $0x8b8] sm:$0xff]  ;;  %v9529_v10 = vld [vmem:[%s10773_s14 + $0x3c] ss:$28 sps:$4 sm:$0xff]  }
 0x33a   : > { %v8539_v18 = vcombine.high %v1002_v7, %v1006_v9  ;;  %v1058_v1 = vld [vmem:[#allocation8 + $0xa58] sm:$0xff] }
 0x33b   : > { %4397 = vmatpush1.bf16.msra.mxu1 %v8482_v21  ;;  %v1010_v21 = vld [vmem:[#allocation8 + $0x8d8] sm:$0xff] }
 0x33c   : > { %4315 = vmatpush1.bf16.msra.mxu0 %v8736_v23  ;;  %4398 = vmatprep.subr.bf16.mxu1 %v8491_v24  ;;  %v8538_v23 = vcombine.low %v1002_v7, %v1006_v9  ;;  %v9530_v24 = vld [vmem:[%s10773_s14 + $0x70] ss:$28 sps:$4 sm:$0xff]  }
 0x33d   : > { %4316 = vmatprep.subr.bf16.mxu0 %v8745_v25  ;;  %v1062_v2 = vld [vmem:[#allocation8 + $0xa78] sm:$0xff] }
 0x33e   : > { %v1066_v7 = vld [vmem:[#allocation8 + $0xa98] sm:$0xff] }
 0x33f   : > { %4399 = vmatpush1.bf16.msra.mxu1 %v8490_v36  ;;  %v8555_v36 = vcombine.high %v1018_v28, %v1022_v29  ;;  %v1070_v9 = vld [vmem:[#allocation8 + $0xab8] sm:$0xff] }
 0x340   : > { %4317 = vmatpush1.bf16.msra.mxu0 %v8744_v35  ;;  %4400 = vmatprep.subr.bf16.mxu1 %v8499_v37  ;;  %v9538_v35 = vld [vmem:[%s10773_s14 + $0xe4] ss:$28 sps:$4 sm:$0xff]   ;;  %v1026_v37 = vld [vmem:[#allocation8 + $0x958] sm:$0xff] }
 0x341   : > { %4318 = vmatprep.subr.bf16.mxu0 %v8753_v14  ;;  %v1030_v14 = vld [vmem:[#allocation8 + $0x978] sm:$0xff] }
 0x342   : > { %v8563_v45 = vcombine.high %v1026_v37, %v1030_v14  ;;  %v1086_v28 = vld [vmem:[#allocation8 + $0xb38] sm:$0xff] }
 0x343   : > { %4401 = vmatpush1.bf16.msra.mxu1 %v8498_v42  ;;  %v1034_v42 = vld [vmem:[#allocation8 + $0x998] sm:$0xff] }
 0x344   : > { %4319 = vmatpush1.bf16.msra.mxu0 %v8752_v43  ;;  %4402 = vmatprep.subr.bf16.mxu1 %v8507_v50  ;;  %v1038_v43 = vld [vmem:[#allocation8 + $0x9b8] sm:$0xff]  ;;  %v8562_v50 = vcombine.low %v1026_v37, %v1030_v14 }
 0x345   : > { %4320 = vmatprep.subr.bf16.mxu0 %v8761_v51  ;;  %v9539_v51 = vld [vmem:[%s10773_s14 + $0x118] ss:$28 sps:$4 sm:$0xff]   ;;  %v8571_v52 = vcombine.high %v1034_v42, %v1038_v43 }
 0x346   : > { %v1094_v37 = vld [vmem:[#allocation8 + $0xb78] sm:$0xff] }
 0x347   : > { %4403 = vmatpush1.bf16.msra.mxu1 %v8506_v54  ;;  %v8570_v54 = vcombine.low %v1034_v42, %v1038_v43  ;;  %v1102_v42 = vld [vmem:[#allocation8 + $0xbb8] sm:$0xff] }
 0x348   : > { %4321 = vmatpush1.bf16.msra.mxu0 %v8760_v56  ;;  %4404 = vmatprep.subr.bf16.mxu1 %v8515_v58  ;;  %v9542_v56 = vld [vmem:[%s10773_s14 + $0x150] ss:$28 sps:$4 sm:$0xff]   ;;  %v8579_v58 = vcombine.high %v1042_v15, %v1046_v27 }
 0x349   : > { %4322 = vmatprep.subr.bf16.mxu0 %v8769_v59  ;;  %v9547_v59 = vld [vmem:[%s10773_s14 + $0x18c] ss:$28 sps:$4 sm:$0xff]  }
 0x34b   : > { %4405 = vmatpush1.bf16.msra.mxu1 %v8514_v22  ;;  %v8578_v22 = vcombine.low %v1042_v15, %v1046_v27  ;;  %v1110_v15 = vld [vmem:[#allocation8 + $0xbf8] sm:$0xff] }
 0x34c   : > { %4323 = vmatpush1.bf16.msra.mxu0 %v8768_v63  ;;  %4415 = vmatprep.subr.bf16.mxu1 %v8523_v0  ;;  %v9545_v63 = vld [vmem:[%s10773_s14 + $0x188] ss:$28 sps:$4 sm:$0xff]   ;;  %v8587_v0 = vcombine.high %v1050_v61, %v1054_v62  ;;  %v1118_v61 = vld [vmem:[#allocation8 + $0xc38] sm:$0xff] }
 0x34d   : > { %7366 = vmatprep.subr.bf16.mxu0 %v9526_v12  ;;  %v9550_v12 = vld [vmem:[%s10773_s14 + $0x1c4] ss:$28 sps:$4 sm:$0xff]  }
 0x34e   : > { %4407 = vmatmul.mubr.bf16.vlgmr.msra.gmra.mrb[16].mxu1 %v10818_v11  ;;  %v1014_v11 = vld [vmem:[#allocation8 + $0x8f8] sm:$0xff] }
 0x34f   : > { %4325 = vmatmul.mubr.bf16.vlgmr.msra.gmra.mrb[12].mxu0 %v10867_v57  ;;  %4416 = vmatpush1.bf16.msra.mxu1 %v8522_v4  ;;  %v8547_v25 = vcombine.high %v1010_v21, %v1014_v11  ;;  %v8546_v33 = vcombine.low %v1010_v21, %v1014_v11  ;;  %v9548_v4 = vld [vmem:[%s10773_s14 + $0x1c0] ss:$28 sps:$4 sm:$0xff]   ;;  %v1078_v21 = vld [vmem:[#allocation8 + $0xaf8] sm:$0xff]  ;;  %v8602_v11 = vcombine.low %v1066_v7, %v1070_v9 }
 0x350   : > { %4447 = vmatprep.mubr.bf16.mxu1 %v10839_v40  ;;  %7367 = vmatpush1.bf16.msra.mxu0 %v9524_v6  ;;  %v9535_v40 = vld [vmem:[%s10773_s14 + $0xac] ss:$28 sps:$4 sm:$0xff]   ;;  %v8595_v6 = vcombine.high %v1058_v1, %v1062_v2 }
 0x351   : > { %7398 = vmatprep.mubr.bf16.mxu0 %v10906_v13  ;;  %4417 = vmatprep.subr.bf16.mxu1 %v8531_v31  ;;  %v9553_v31 = vld [vmem:[%s10773_s14 + $0x1fc] ss:$28 sps:$4 sm:$0xff]  }
 0x352   : > { %7368 = vmatprep.subr.bf16.mxu0 %v9529_v10  ;;  %v8594_v10 = vcombine.low %v1058_v1, %v1062_v2  ;;  %v1122_v1 = vld [vmem:[#allocation8 + $0xc58] sm:$0xff] }
 0x353   : > { %4418 = vmatpush1.bf16.msra.mxu1 %v8530_v32  ;;  %v9551_v32 = vld [vmem:[%s10773_s14 + $0x1f8] ss:$28 sps:$4 sm:$0xff]  }
 0x354   : > { %7369 = vmatpush1.bf16.msra.mxu0 %v9527_v16  ;;  %4419 = vmatprep.subr.bf16.mxu1 %v8539_v18  ;;  %v8603_v16 = vcombine.high %v1066_v7, %v1070_v9  ;;  %v9556_v18 = vld [vmem:[%s10773_s14 + $0x234] ss:$28 sps:$4 sm:$0xff]   ;;  %v9577_v7 = vld [vmem:[%s10773_s14 + $0x3bc] ss:$28 sps:$4 sm:$0xff]  }
 0x355   : > { %7370 = vmatprep.subr.bf16.mxu0 %v9532_v19  ;;  %v1074_v19 = vld [vmem:[#allocation8 + $0xad8] sm:$0xff] }
 0x356   : > { %v8610_v29 = vcombine.low %v1074_v19, %v1078_v21  ;;  %v1126_v2 = vld [vmem:[#allocation8 + $0xc78] sm:$0xff] }
 0x357   : > { %4420 = vmatpush1.bf16.msra.mxu1 %v8538_v23  ;;  %v9554_v23 = vld [vmem:[%s10773_s14 + $0x230] ss:$28 sps:$4 sm:$0xff]  }
 0x358   : > { %7371 = vmatpush1.bf16.msra.mxu0 %v9530_v24  ;;  %4421 = vmatprep.subr.bf16.mxu1 %v8547_v25  ;;  %v8611_v24 = vcombine.high %v1074_v19, %v1078_v21  ;;  %v9559_v25 = vld [vmem:[%s10773_s14 + $0x26c] ss:$28 sps:$4 sm:$0xff]   ;;  %v1130_v9 = vld [vmem:[#allocation8 + $0xc98] sm:$0xff] }
 0x359   : > { %7372 = vmatprep.subr.bf16.mxu0 %v9535_v40  ;;  %v1082_v40 = vld [vmem:[#allocation8 + $0xb18] sm:$0xff] }
 0x35a   : > { %v8618_v14 = vcombine.low %v1082_v40, %v1086_v28  ;;  %v1138_v19 = vld [vmem:[#allocation8 + $0xcd8] sm:$0xff] }
 0x35b   : > { %4422 = vmatpush1.bf16.msra.mxu1 %v8546_v33  ;;  %v9557_v33 = vld [vmem:[%s10773_s14 + $0x268] ss:$28 sps:$4 sm:$0xff]   ;;  %v1142_v21 = vld [vmem:[#allocation8 + $0xcf8] sm:$0xff] }
 0x35c   : > { %7373 = vmatpush1.bf16.msra.mxu0 %v9533_v34  ;;  %4423 = vmatprep.subr.bf16.mxu1 %v8555_v36  ;;  %v8619_v34 = vcombine.high %v1082_v40, %v1086_v28  ;;  %v9562_v36 = vld [vmem:[%s10773_s14 + $0x2a4] ss:$28 sps:$4 sm:$0xff]   ;;  %v8674_v40 = vcombine.low %v1138_v19, %v1142_v21 }
 0x35d   : > { %7374 = vmatprep.subr.bf16.mxu0 %v9538_v35  ;;  %v1090_v35 = vld [vmem:[#allocation8 + $0xb58] sm:$0xff]  ;;  %v9581_v28 = vld [vmem:[%s10773_s14 + $0x428] ss:$28 sps:$4 sm:$0xff]  }
 0x35e   : > { %v8626_v43 = vcombine.low %v1090_v35, %v1094_v37 }
 0x35f   : > { %4424 = vmatpush1.bf16.msra.mxu1 %v8554_v39  ;;  %v9560_v39 = vld [vmem:[%s10773_s14 + $0x2a0] ss:$28 sps:$4 sm:$0xff]  }
 0x360   : > { %7375 = vmatpush1.bf16.msra.mxu0 %v9536_v38  ;;  %4425 = vmatprep.subr.bf16.mxu1 %v8563_v45  ;;  %v8627_v38 = vcombine.high %v1090_v35, %v1094_v37  ;;  %v9565_v45 = vld [vmem:[%s10773_s14 + $0x2dc] ss:$28 sps:$4 sm:$0xff]  }
 0x361   : > { %7376 = vmatprep.subr.bf16.mxu0 %v9541_v41  ;;  %v1098_v41 = vld [vmem:[#allocation8 + $0xb98] sm:$0xff]  ;;  %v9584_v37 = vld [vmem:[%s10773_s14 + $0x460] ss:$28 sps:$4 sm:$0xff]  }
 0x362   : > { %v8634_v27 = vcombine.low %v1098_v41, %v1102_v42 }
 0x363   : > { %4426 = vmatpush1.bf16.msra.mxu1 %v8562_v50  ;;  %v9563_v50 = vld [vmem:[%s10773_s14 + $0x2d8] ss:$28 sps:$4 sm:$0xff]  }
 0x364   : > { %7377 = vmatpush1.bf16.msra.mxu0 %v9539_v51  ;;  %4427 = vmatprep.subr.bf16.mxu1 %v8571_v52  ;;  %v8635_v51 = vcombine.high %v1098_v41, %v1102_v42  ;;  %v9568_v52 = vld [vmem:[%s10773_s14 + $0x314] ss:$28 sps:$4 sm:$0xff]   ;;  %v1256_v41 = vrot.slane %v10889_v60, %v10805_v49 }
 0x365   : > { %7378 = vmatprep.subr.bf16.mxu0 %v9544_v53  ;;  %v1106_v53 = vld [vmem:[#allocation8 + $0xbd8] sm:$0xff] }
 0x366   : > { %v8642_v62 = vcombine.low %v1106_v53, %v1110_v15 }
 0x367   : > { %4428 = vmatpush1.bf16.msra.mxu1 %v8570_v54  ;;  %v9566_v54 = vld [vmem:[%s10773_s14 + $0x310] ss:$28 sps:$4 sm:$0xff]  }
 0x368   : > { %7379 = vmatpush1.bf16.msra.mxu0 %v9542_v56  ;;  %4429 = vmatprep.subr.bf16.mxu1 %v8579_v58  ;;  %v8643_v56 = vcombine.high %v1106_v53, %v1110_v15  ;;  %v9571_v58 = vld [vmem:[%s10773_s14 + $0x34c] ss:$28 sps:$4 sm:$0xff]   ;;  %v1170_v53 = vld [vmem:[#allocation8 + $0xdd8] sm:$0xff] }
 0x369   : > { %7380 = vmatprep.subr.bf16.mxu0 %v9547_v59  ;;  %v1114_v59 = vld [vmem:[#allocation8 + $0xc18] sm:$0xff] }
 0x36a   : > { %v1174_v15 = vld [vmem:[#allocation8 + $0xdf8] sm:$0xff] }
 0x36b   : > { %4430 = vmatpush1.bf16.msra.mxu1 %v8578_v22  ;;  %v9569_v22 = vld [vmem:[%s10773_s14 + $0x348] ss:$28 sps:$4 sm:$0xff]  }
 0x36c   : > { %7381 = vmatpush1.bf16.msra.mxu0 %v9545_v63  ;;  %4431 = vmatprep.subr.bf16.mxu1 %v8587_v0  ;;  %v8651_v63 = vcombine.high %v1114_v59, %v1118_v61  ;;  %v4497_v0 = vmax.f32 %v10897_v26, 0.0  ;;  %v8658_v26 = vcombine.low %v1122_v1, %v1126_v2 }
 0x36d   : > { %7382 = vmatprep.subr.bf16.mxu0 %v9550_v12  ;;  %v9574_v12 = vld [vmem:[%s10773_s14 + $0x384] ss:$28 sps:$4 sm:$0xff]  }
 0x36f   : > { %4432 = vmatpush1.bf16.msra.mxu1 %v8586_v3  ;;  %v8650_v3 = vcombine.low %v1114_v59, %v1118_v61  ;;  %v9590_v61 = vld [vmem:[%s10773_s14 + $0x4d0] ss:$28 sps:$4 sm:$0xff]  }
 0x370   : > { %7383 = vmatpush1.bf16.msra.mxu0 %v9548_v4  ;;  %4433 = vmatprep.subr.bf16.mxu1 %v8595_v6  ;;  %v9572_v4 = vld [vmem:[%s10773_s14 + $0x380] ss:$28 sps:$4 sm:$0xff]   ;;  %v10943_v6 = vpack.c.bf16 %v4497_v0, %v4497_v0  ;;  %v1178_v0 = vld [vmem:[#allocation8 + $0xe18] sm:$0xff] }
 0x371   : > { %7384 = vmatprep.subr.bf16.mxu0 %v9553_v31  ;;  %v8659_v31 = vcombine.high %v1122_v1, %v1126_v2  ;;  %v8706_v2 = vcombine.low %v1170_v53, %v1174_v15 }
 0x373   : > { %4434 = vmatpush1.bf16.msra.mxu1 %v8594_v10  ;;  %v1134_v10 = vld [vmem:[#allocation8 + $0xcb8] sm:$0xff] }
 0x374   : > { %7385 = vmatpush1.bf16.msra.mxu0 %v9551_v32  ;;  %4435 = vmatprep.subr.bf16.mxu1 %v8603_v16  ;;  %v9575_v32 = vld [vmem:[%s10773_s14 + $0x3b8] ss:$28 sps:$4 sm:$0xff]   ;;  %v8667_v16 = vcombine.high %v1130_v9, %v1134_v10 }
 0x375   : > { %7386 = vmatprep.subr.bf16.mxu0 %v9556_v18  ;;  %v9580_v18 = vld [vmem:[%s10773_s14 + $0x3f4] ss:$28 sps:$4 sm:$0xff]  }
 0x377   : > { %4436 = vmatpush1.bf16.msra.mxu1 %v8602_v11  ;;  %v8666_v11 = vcombine.low %v1130_v9, %v1134_v10  ;;  %v1190_v9 = vld [vmem:[#allocation8 + $0xe78] sm:$0xff] }
 0x378   : > { %7387 = vmatpush1.bf16.msra.mxu0 %v9554_v23  ;;  %4437 = vmatprep.subr.bf16.mxu1 %v8611_v24  ;;  %v8675_v23 = vcombine.high %v1138_v19, %v1142_v21  ;;  %v9583_v24 = vld [vmem:[%s10773_s14 + $0x42c] ss:$28 sps:$4 sm:$0xff]   ;;  %v1198_v19 = vld [vmem:[#allocation8 + $0xeb8] sm:$0xff] }
 0x379   : > { %7388 = vmatprep.subr.bf16.mxu0 %v9559_v25  ;;  %v1150_v25 = vld [vmem:[#allocation8 + $0xd38] sm:$0xff] }
 0x37b   : > { %4438 = vmatpush1.bf16.msra.mxu1 %v8610_v29 }
 0x37c   : > { %7389 = vmatpush1.bf16.msra.mxu0 %v9557_v33  ;;  %4439 = vmatprep.subr.bf16.mxu1 %v8619_v34  ;;  %v9586_v33 = vld [vmem:[%s10773_s14 + $0x464] ss:$28 sps:$4 sm:$0xff]   ;;  %v1154_v34 = vld [vmem:[#allocation8 + $0xd58] sm:$0xff] }
 0x37d   : > { %7390 = vmatprep.subr.bf16.mxu0 %v9562_v36  ;;  %v1158_v36 = vld [vmem:[#allocation8 + $0xd78] sm:$0xff] }
 0x37e   : > { %v8690_v42 = vcombine.low %v1154_v34, %v1158_v36 }
 0x37f   : > { %4440 = vmatpush1.bf16.msra.mxu1 %v8618_v14  ;;  %v8691_v14 = vcombine.high %v1154_v34, %v1158_v36  ;;  %v1214_v34 = vld [vmem:[#allocation8 + $0xf38] sm:$0xff] }
 0x380   : > { %7391 = vmatpush1.bf16.msra.mxu0 %v9560_v39  ;;  %4441 = vmatprep.subr.bf16.mxu1 %v8627_v38  ;;  %v9589_v39 = vld [vmem:[%s10773_s14 + $0x49c] ss:$28 sps:$4 sm:$0xff]   ;;  %v1162_v38 = vld [vmem:[#allocation8 + $0xd98] sm:$0xff] }
 0x381   : > { %7392 = vmatprep.subr.bf16.mxu0 %v9565_v45  ;;  %v1166_v45 = vld [vmem:[#allocation8 + $0xdb8] sm:$0xff] }
 0x383   : > { %4442 = vmatpush1.bf16.msra.mxu1 %v8626_v43  ;;  %v9587_v43 = vld [vmem:[%s10773_s14 + $0x498] ss:$28 sps:$4 sm:$0xff]  }
 0x384   : > { %7393 = vmatpush1.bf16.msra.mxu0 %v9563_v50  ;;  %4443 = vmatprep.subr.bf16.mxu1 %v8635_v51  ;;  %v8699_v50 = vcombine.high %v1162_v38, %v1166_v45 }
 0x385   : > { %7394 = vmatprep.subr.bf16.mxu0 %v9568_v52  ;;  %v9592_v52 = vld [vmem:[%s10773_s14 + $0x4d4] ss:$28 sps:$4 sm:$0xff]  }
 0x387   : > { %4444 = vmatpush1.bf16.msra.mxu1 %v8634_v27 }
 0x388   : > { %7395 = vmatpush1.bf16.msra.mxu0 %v9566_v54  ;;  %4445 = vmatprep.subr.bf16.mxu1 %v8643_v56 }
 0x389   : > { %7396 = vmatprep.subr.bf16.mxu0 %v9571_v58  ;;  %v8698_v58 = vcombine.low %v1162_v38, %v1166_v45  ;;  %v1222_v38 = vld [vmem:[#allocation8 + $0xf78] sm:$0xff] }
 0x38b   : > { %4446 = vmatpush1.bf16.msra.mxu1 %v8642_v62  ;;  %v8707_v62 = vcombine.high %v1170_v53, %v1174_v15  ;;  %v9611_v15 = vld [vmem:[%s10773_s14 + $0x658] ss:$28 sps:$4 sm:$0xff]  }
 0x38c   : > { %7397 = vmatpush1.bf16.msra.mxu0 %v9569_v22  ;;  %4456 = vmatprep.subr.bf16.mxu1 %v8651_v63  ;;  %v9595_v63 = vld [vmem:[%s10773_s14 + $0x50c] ss:$28 sps:$4 sm:$0xff]  }
 0x38d   : > { %7407 = vmatprep.subr.bf16.mxu0 %v9574_v12  ;;  %v1182_v12 = vld [vmem:[#allocation8 + $0xe38] sm:$0xff] }
 0x38e   : > { %4448 = vmatmul.mubr.bf16.vlgmr.msra.gmra.mrb[16].mxu1 %v10853_v5  ;;  %v9578_v5 = vld [vmem:[%s10773_s14 + $0x3f0] ss:$28 sps:$4 sm:$0xff]   ;;  %v8714_v10 = vcombine.low %v1178_v0, %v1182_v12 }
 0x38f   : > { %7399 = vmatmul.mubr.bf16.vlgmr.msra.gmra.mrb[16].mxu0 %v10943_v6  ;;  %4457 = vmatpush1.bf16.msra.mxu1 %v8650_v3  ;;  %v9593_v3 = vld [vmem:[%s10773_s14 + $0x508] ss:$28 sps:$4 sm:$0xff]  }
 0x390   : > { %4488 = vmatprep.mubr.bf16.mxu1 %v10856_v17  ;;  %7408 = vmatpush1.bf16.msra.mxu0 %v9572_v4  ;;  %v1146_v17 = vld [vmem:[#allocation8 + $0xd18] sm:$0xff]  ;;  %v8715_v4 = vcombine.high %v1178_v0, %v1182_v12  ;;  %v9619_v0 = vld [vmem:[%s10773_s14 + $0x6cc] ss:$28 sps:$4 sm:$0xff]  }
 0x391   : > { %4458 = vmatprep.subr.bf16.mxu1 %v8659_v31  ;;  %7409 = vmatprep.subr.bf16.mxu0 %v9577_v7  ;;  %v8683_v29 = vcombine.high %v1146_v17, %v1150_v25  ;;  %v8682_v35 = vcombine.low %v1146_v17, %v1150_v25  ;;  %v9598_v31 = vld [vmem:[%s10773_s14 + $0x544] ss:$28 sps:$4 sm:$0xff]   ;;  %v1186_v7 = vld [vmem:[#allocation8 + $0xe58] sm:$0xff] }
 0x392   : > { %v8722_v21 = vcombine.low %v1186_v7, %v1190_v9  ;;  %v1206_v17 = vld [vmem:[#allocation8 + $0xef8] sm:$0xff]  ;;  %v9617_v12 = vld [vmem:[%s10773_s14 + $0x6c8] ss:$28 sps:$4 sm:$0xff]  }
 0x393   : > { %4459 = vmatpush1.bf16.msra.mxu1 %v8658_v26  ;;  %v9596_v26 = vld [vmem:[%s10773_s14 + $0x540] ss:$28 sps:$4 sm:$0xff]  }
 0x394   : > { %7410 = vmatpush1.bf16.msra.mxu0 %v9575_v32  ;;  %4460 = vmatprep.subr.bf16.mxu1 %v8667_v16  ;;  %v8723_v32 = vcombine.high %v1186_v7, %v1190_v9  ;;  %v9601_v16 = vld [vmem:[%s10773_s14 + $0x57c] ss:$28 sps:$4 sm:$0xff]  }
 0x395   : > { %7411 = vmatprep.subr.bf16.mxu0 %v9580_v18  ;;  %v1194_v18 = vld [vmem:[#allocation8 + $0xe98] sm:$0xff]  ;;  %v9641_v9 = vld [vmem:[%s10773_s14 + $0x700] ss:$28 sps:$4 sm:$0xff]  }
 0x396   : > { %v8730_v25 = vcombine.low %v1194_v18, %v1198_v19 }
 0x397   : > { %4461 = vmatpush1.bf16.msra.mxu1 %v8666_v11  ;;  %v9599_v11 = vld [vmem:[%s10773_s14 + $0x578] ss:$28 sps:$4 sm:$0xff]  }
 0x398   : > { %7412 = vmatpush1.bf16.msra.mxu0 %v9578_v5  ;;  %4462 = vmatprep.subr.bf16.mxu1 %v8675_v23  ;;  %v8731_v5 = vcombine.high %v1194_v18, %v1198_v19  ;;  %v9604_v23 = vld [vmem:[%s10773_s14 + $0x5b4] ss:$28 sps:$4 sm:$0xff]  }
 0x399   : > { %7413 = vmatprep.subr.bf16.mxu0 %v9583_v24  ;;  %v1202_v24 = vld [vmem:[#allocation8 + $0xed8] sm:$0xff] }
 0x39a   : > { %v8738_v36 = vcombine.low %v1202_v24, %v1206_v17  ;;  %v9655_v18 = vld [vmem:[%s10773_s14 + $0x774] ss:$28 sps:$4 sm:$0xff]  }
 0x39b   : > { %4463 = vmatpush1.bf16.msra.mxu1 %v8674_v40  ;;  %v9602_v40 = vld [vmem:[%s10773_s14 + $0x5b0] ss:$28 sps:$4 sm:$0xff]  }
 0x39c   : > { %7414 = vmatpush1.bf16.msra.mxu0 %v9581_v28  ;;  %4464 = vmatprep.subr.bf16.mxu1 %v8683_v29  ;;  %v8739_v28 = vcombine.high %v1202_v24, %v1206_v17  ;;  %v9607_v29 = vld [vmem:[%s10773_s14 + $0x5ec] ss:$28 sps:$4 sm:$0xff]   ;;  %v9631_v19 = vld [vmem:[%s10773_s14 + $0xb4] ss:$28 sps:$4 sm:$0xff]   ;;  %v9667_v17 = vld [vmem:[%s10773_s14 + $0x7e4] ss:$28 sps:$4 sm:$0xff]  }
 0x39d   : > { %7415 = vmatprep.subr.bf16.mxu0 %v9586_v33  ;;  %v1210_v33 = vld [vmem:[#allocation8 + $0xf18] sm:$0xff]  ;;  %v9659_v24 = vld [vmem:[%s10773_s14 + $0x7a8] ss:$28 sps:$4 sm:$0xff]  }
 0x39e   : > { %v8746_v45 = vcombine.low %v1210_v33, %v1214_v34 }
 0x39f   : > { %4465 = vmatpush1.bf16.msra.mxu1 %v8682_v35  ;;  %v9605_v35 = vld [vmem:[%s10773_s14 + $0x5e8] ss:$28 sps:$4 sm:$0xff]  }
 0x3a0   : > { %7416 = vmatpush1.bf16.msra.mxu0 %v9584_v37  ;;  %4466 = vmatprep.subr.bf16.mxu1 %v8691_v14  ;;  %v8747_v37 = vcombine.high %v1210_v33, %v1214_v34  ;;  %v9610_v14 = vld [vmem:[%s10773_s14 + $0x624] ss:$28 sps:$4 sm:$0xff]   ;;  %v9640_v34 = vld [vmem:[%s10773_s14 + $0x15c] ss:$28 sps:$4 sm:$0xff]  }
 0x3a1   : > { %v10960_v51 = vpop.f32.mrb[12].mxu1  ;;  %7417 = vmatprep.subr.bf16.mxu0 %v9589_v39  ;;  %v1218_v39 = vld [vmem:[#allocation8 + $0xf58] sm:$0xff]  ;;  %v9635_v33 = vld [vmem:[%s10773_s14 + $0x120] ss:$28 sps:$4 sm:$0xff]  }
 0x3a2   : > { %v4164_v27 = vpop.f32.mrb[13].mxu1  ;;  %v8754_v53 = vcombine.low %v1218_v39, %v1222_v38 }
 0x3a3   : > { %v9319_v54 = vadd.f32 %v4164_v27, %v1256_v41  ;;  %v4166_v56 = vpop.f32.mrb[14].mxu1  ;;  %4467 = vmatpush1.bf16.msra.mxu1 %v8690_v42  ;;  %v9608_v41 = vld [vmem:[%s10773_s14 + $0x620] ss:$28 sps:$4 sm:$0xff]   ;;  %v8755_v42 = vcombine.high %v1218_v39, %v1222_v38  ;;  %v9677_v39 = vld [vmem:[%s10773_s14 + $0x850] ss:$28 sps:$4 sm:$0xff]  }
 0x3a4   : > { %7418 = vmatpush1.bf16.msra.mxu0 %v9587_v43  ;;  %v4167_v59 = vpop.f32.mrb[15].mxu1  ;;  %4468 = vmatprep.subr.bf16.mxu1 %v8699_v50  ;;  %v9613_v43 = vld [vmem:[%s10773_s14 + $0x65c] ss:$28 sps:$4 sm:$0xff]   ;;  %v1226_v50 = vld [vmem:[#allocation8 + $0xf98] sm:$0xff]  ;;  %v9685_v38 = vld [vmem:[%s10773_s14 + $0x88c] ss:$28 sps:$4 sm:$0xff]  }
 0x3a5   : > { %v4500_v22 = vmax.f32 %v9319_v54, 0.0  ;;  %7419 = vmatprep.subr.bf16.mxu0 %v9592_v52  ;;  %v1230_v52 = vld [vmem:[#allocation8 + $0xfb8] sm:$0xff]  ;;  %v1252_v54 = vrot.slane %v10889_v60, %v10799_v47 }
 0x3a6   : > { %v8763_v27 = vcombine.high %v1226_v50, %v1230_v52  ;;  %v9616_v56 = vld [vmem:[%s10773_s14 + $0x694] ss:$28 sps:$4 sm:$0xff]  }
 0x3a7   : > { %v10965_v1 = vpack.c.bf16 %v4500_v22, %v4500_v22  ;;  %4469 = vmatpush1.bf16.msra.mxu1 %v8698_v58  ;;  %v1234_v58 = vld [vmem:[#allocation8 + $0xfd8] sm:$0xff] }
 0x3a8   : > { %7420 = vmatpush1.bf16.msra.mxu0 %v9590_v61  ;;  %4470 = vmatprep.subr.bf16.mxu1 %v8707_v62  ;;  %v1238_v59 = vld [vmem:[#allocation8 + $0xff8] sm:$0xff]  ;;  %v8762_v61 = vcombine.low %v1226_v50, %v1230_v52  ;;  %v9650_v50 = vld [vmem:[%s10773_s14 + $0x1c8] ss:$28 sps:$4 sm:$0xff]  }
 0x3a9   : > { %7439 = vmatprep.mubr.bf16.mxu0 %v10965_v1  ;;  %7421 = vmatprep.subr.bf16.mxu0 %v9595_v63  ;;  %v9614_v62 = vld [vmem:[%s10773_s14 + $0x690] ss:$28 sps:$4 sm:$0xff]   ;;  %v8771_v22 = vcombine.high %v1234_v58, %v1238_v59  ;;  %v9318_v63 = vadd.f32 %v10960_v51, %v1252_v54  ;;  %v8770_v60 = vcombine.low %v1234_v58, %v1238_v59  ;;  %v9625_v51 = vld [vmem:[%s10773_s14 + $0x44] ss:$28 sps:$4 sm:$0xff]   ;;  %v9664_v54 = vld [vmem:[%s10773_s14 + $0x23c] ss:$28 sps:$4 sm:$0xff]  }
 0x3aa   : > { %v9658_v52 = vld [vmem:[%s10773_s14 + $0x204] ss:$28 sps:$4 sm:$0xff]   ;;  %v9703_v58 = vld [vmem:[%s10773_s14 + $0x934] ss:$28 sps:$4 sm:$0xff]  }
 0x3ab   : > { %4471 = vmatpush1.bf16.msra.mxu1 %v8706_v2  ;;  %v9622_v2 = vld [vmem:[%s10773_s14 + $0xc] ss:$28 sps:$4 sm:$0xff]   ;;  %v9662_v59 = vld [vmem:[%s10773_s14 + $0x238] ss:$28 sps:$4 sm:$0xff]  }
 0x3ac   : > { %7422 = vmatpush1.bf16.msra.mxu0 %v9593_v3  ;;  %4472 = vmatprep.subr.bf16.mxu1 %v8715_v4  ;;  %v4499_v3 = vmax.f32 %v9318_v63, 0.0  ;;  %v9643_v4 = vld [vmem:[%s10773_s14 + $0x704] ss:$28 sps:$4 sm:$0xff]   ;;  %v9668_v63 = vld [vmem:[%s10773_s14 + $0x270] ss:$28 sps:$4 sm:$0xff]  }
 0x3ad   : > { %7423 = vmatprep.subr.bf16.mxu0 %v9598_v31  ;;  %v9620_v31 = vld [vmem:[%s10773_s14 + $0x8] ss:$28 sps:$4 sm:$0xff]  }
 0x3ae   : > { %v10992_v7 = vpack.c.bf16 %v4499_v3, %v4499_v3  ;;  %v9682_v3 = vld [vmem:[%s10773_s14 + $0x2e4] ss:$28 sps:$4 sm:$0xff]  }
 0x3af   : > { %4473 = vmatpush1.bf16.msra.mxu1 %v8714_v10  ;;  %v9649_v10 = vld [vmem:[%s10773_s14 + $0x73c] ss:$28 sps:$4 sm:$0xff]  }
 0x3b0   : > { %7424 = vmatpush1.bf16.msra.mxu0 %v9596_v26  ;;  %4474 = vmatprep.subr.bf16.mxu1 %v8723_v32  ;;  %v9623_v26 = vld [vmem:[%s10773_s14 + $0x40] ss:$28 sps:$4 sm:$0xff]  }
 0x3b1   : > { %7425 = vmatprep.subr.bf16.mxu0 %v9601_v16  ;;  %v9628_v32 = vld [vmem:[%s10773_s14 + $0x7c] ss:$28 sps:$4 sm:$0xff]  }
 0x3b2   : > { %v9647_v16 = vld [vmem:[%s10773_s14 + $0x738] ss:$28 sps:$4 sm:$0xff]  }
 0x3b3   : > { %4475 = vmatpush1.bf16.msra.mxu1 %v8722_v21  ;;  %v9653_v21 = vld [vmem:[%s10773_s14 + $0x770] ss:$28 sps:$4 sm:$0xff]  }
 0x3b4   : > { %7426 = vmatpush1.bf16.msra.mxu0 %v9599_v11  ;;  %4476 = vmatprep.subr.bf16.mxu1 %v8731_v5  ;;  %v9661_v11 = vld [vmem:[%s10773_s14 + $0x7ac] ss:$28 sps:$4 sm:$0xff]  }
 0x3b5   : > { %7427 = vmatprep.subr.bf16.mxu0 %v9604_v23  ;;  %v9629_v5 = vld [vmem:[%s10773_s14 + $0xb0] ss:$28 sps:$4 sm:$0xff]  }
 0x3b6   : > { %v9634_v23 = vld [vmem:[%s10773_s14 + $0xec] ss:$28 sps:$4 sm:$0xff]  }
 0x3b7   : > { %4477 = vmatpush1.bf16.msra.mxu1 %v8730_v25  ;;  %v9632_v25 = vld [vmem:[%s10773_s14 + $0xe8] ss:$28 sps:$4 sm:$0xff]  }
 0x3b8   : > { %7428 = vmatpush1.bf16.msra.mxu0 %v9602_v40  ;;  %4478 = vmatprep.subr.bf16.mxu1 %v8739_v28  ;;  %v9637_v40 = vld [vmem:[%s10773_s14 + $0x124] ss:$28 sps:$4 sm:$0xff]  }
 0x3b9   : > { %7429 = vmatprep.subr.bf16.mxu0 %v9607_v29  ;;  %v9665_v28 = vld [vmem:[%s10773_s14 + $0x7e0] ss:$28 sps:$4 sm:$0xff]  }
 0x3ba   : > { %v9673_v29 = vld [vmem:[%s10773_s14 + $0x81c] ss:$28 sps:$4 sm:$0xff]  }
 0x3bb   : > { %4479 = vmatpush1.bf16.msra.mxu1 %v8738_v36  ;;  %v9671_v36 = vld [vmem:[%s10773_s14 + $0x818] ss:$28 sps:$4 sm:$0xff]  }
 0x3bc   : > { %7430 = vmatpush1.bf16.msra.mxu0 %v9605_v35  ;;  %4480 = vmatprep.subr.bf16.mxu1 %v8747_v37  ;;  %v9679_v35 = vld [vmem:[%s10773_s14 + $0x854] ss:$28 sps:$4 sm:$0xff]  }
 0x3bd   : > { %7431 = vmatprep.subr.bf16.mxu0 %v9610_v14  ;;  %v9638_v37 = vld [vmem:[%s10773_s14 + $0x158] ss:$28 sps:$4 sm:$0xff]  }
 0x3be   : > { %v9646_v14 = vld [vmem:[%s10773_s14 + $0x194] ss:$28 sps:$4 sm:$0xff]  }
 0x3bf   : > { %4481 = vmatpush1.bf16.msra.mxu1 %v8746_v45  ;;  %v9644_v45 = vld [vmem:[%s10773_s14 + $0x190] ss:$28 sps:$4 sm:$0xff]  }
 0x3c0   : > { %7432 = vmatpush1.bf16.msra.mxu0 %v9608_v41  ;;  %4482 = vmatprep.subr.bf16.mxu1 %v8755_v42  ;;  %v9652_v41 = vld [vmem:[%s10773_s14 + $0x1cc] ss:$28 sps:$4 sm:$0xff]  }
 0x3c1   : > { %7433 = vmatprep.subr.bf16.mxu0 %v9613_v43  ;;  %v9683_v42 = vld [vmem:[%s10773_s14 + $0x888] ss:$28 sps:$4 sm:$0xff]  }
 0x3c2   : > { %v9691_v43 = vld [vmem:[%s10773_s14 + $0x8c4] ss:$28 sps:$4 sm:$0xff]  }
 0x3c3   : > { %4483 = vmatpush1.bf16.msra.mxu1 %v8754_v53  ;;  %v9689_v53 = vld [vmem:[%s10773_s14 + $0x8c0] ss:$28 sps:$4 sm:$0xff]  }
 0x3c4   : > { %7434 = vmatpush1.bf16.msra.mxu0 %v9611_v15  ;;  %4484 = vmatprep.subr.bf16.mxu1 %v8763_v27  ;;  %v9697_v15 = vld [vmem:[%s10773_s14 + $0x8fc] ss:$28 sps:$4 sm:$0xff]  }
 0x3c5   : > { %7435 = vmatprep.subr.bf16.mxu0 %v9616_v56  ;;  %v9656_v27 = vld [vmem:[%s10773_s14 + $0x200] ss:$28 sps:$4 sm:$0xff]   ;;  %v9695_v56 = vld [vmem:[%s10773_s14 + $0x8f8] ss:$28 sps:$4 sm:$0xff]  }
 0x3c7   : > { %4485 = vmatpush1.bf16.msra.mxu1 %v8762_v61  ;;  %v9670_v61 = vld [vmem:[%s10773_s14 + $0x274] ss:$28 sps:$4 sm:$0xff]  }
 0x3c8   : > { %7436 = vmatpush1.bf16.msra.mxu0 %v9614_v62  ;;  %4486 = vmatprep.subr.bf16.mxu1 %v8771_v22  ;;  %v9701_v62 = vld [vmem:[%s10773_s14 + $0x930] ss:$28 sps:$4 sm:$0xff]  }
 0x3c9   : > { %7437 = vmatprep.subr.bf16.mxu0 %v9619_v0  ;;  %v9709_v22 = vld [vmem:[%s10773_s14 + $0x96c] ss:$28 sps:$4 sm:$0xff]  }
 0x3ca   : > { %v9676_v0 = vld [vmem:[%s10773_s14 + $0x2ac] ss:$28 sps:$4 sm:$0xff]  }
 0x3cb   : > { %4487 = vmatpush1.bf16.msra.mxu1 %v8770_v60  ;;  %v9707_v60 = vld [vmem:[%s10773_s14 + $0x968] ss:$28 sps:$4 sm:$0xff]  }
 0x3cc   : > { %7438 = vmatpush1.bf16.msra.mxu0 %v9617_v12  ;;  %7530 = vmatprep.subr.bf16.mxu1 %v9622_v2  ;;  %v9715_v12 = vld [vmem:[%s10773_s14 + $0x9a4] ss:$28 sps:$4 sm:$0xff]  }
 0x3cd   : > { %7448 = vmatprep.subr.bf16.mxu0 %v9643_v4  ;;  %v9674_v2 = vld [vmem:[%s10773_s14 + $0x2a8] ss:$28 sps:$4 sm:$0xff]   ;;  %v9713_v4 = vld [vmem:[%s10773_s14 + $0x9a0] ss:$28 sps:$4 sm:$0xff]  }
 0x3ce   : > { %4489 = vmatmul.mubr.bf16.vlgmr.msra.gmra.mrb[16].mxu1 %v10867_v57  ;;  %v9626_v57 = vld [vmem:[%s10773_s14 + $0x78] ss:$28 sps:$4 sm:$0xff]  }
 0x3cf   : > { %7440 = vmatmul.mubr.bf16.vlgmr.msra.gmra.mrb[16].mxu0 %v10992_v7  ;;  %7531 = vmatpush1.bf16.msra.mxu1 %v9620_v31  ;;  %v9721_v31 = vld [vmem:[%s10773_s14 + $0x9dc] ss:$28 sps:$4 sm:$0xff]  }
 0x3d0   : > { %7562 = vmatprep.mubr.bf16.mxu1 %v10906_v13  ;;  %7532 = vmatprep.subr.bf16.mxu1 %v9625_v51  ;;  %v9680_v51 = vld [vmem:[%s10773_s14 + $0x2e0] ss:$28 sps:$4 sm:$0xff]  }
 0x3d1   : > { %7449 = vmatpush1.bf16.msra.mxu0 %v9641_v9  ;;  %v9688_v9 = vld [vmem:[%s10773_s14 + $0x31c] ss:$28 sps:$4 sm:$0xff]  }
 0x3d2   : > { %7450 = vmatprep.subr.bf16.mxu0 %v9649_v10  ;;  %v9719_v10 = vld [vmem:[%s10773_s14 + $0x9d8] ss:$28 sps:$4 sm:$0xff]  }
 0x3d3   : > { %7533 = vmatpush1.bf16.msra.mxu1 %v9623_v26  ;;  %v9727_v26 = vld [vmem:[%s10773_s14 + $0xa14] ss:$28 sps:$4 sm:$0xff]  }
 0x3d4   : > { %7534 = vmatprep.subr.bf16.mxu1 %v9628_v32  ;;  %v9686_v32 = vld [vmem:[%s10773_s14 + $0x318] ss:$28 sps:$4 sm:$0xff]  }
 0x3d5   : > { %7451 = vmatpush1.bf16.msra.mxu0 %v9647_v16  ;;  %v9694_v16 = vld [vmem:[%s10773_s14 + $0x354] ss:$28 sps:$4 sm:$0xff]  }
 0x3d6   : > { %7452 = vmatprep.subr.bf16.mxu0 %v9655_v18  ;;  %v9725_v18 = vld [vmem:[%s10773_s14 + $0xa10] ss:$28 sps:$4 sm:$0xff]  }
 0x3d7   : > { %7535 = vmatpush1.bf16.msra.mxu1 %v9626_v57  ;;  %v9733_v57 = vld [vmem:[%s10773_s14 + $0xa4c] ss:$28 sps:$4 sm:$0xff]  }
 0x3d8   : > { %7536 = vmatprep.subr.bf16.mxu1 %v9631_v19  ;;  %v9692_v19 = vld [vmem:[%s10773_s14 + $0x350] ss:$28 sps:$4 sm:$0xff]  }
 0x3d9   : > { %7453 = vmatpush1.bf16.msra.mxu0 %v9653_v21  ;;  %v9700_v21 = vld [vmem:[%s10773_s14 + $0x38c] ss:$28 sps:$4 sm:$0xff]  }
 0x3da   : > { %7454 = vmatprep.subr.bf16.mxu0 %v9661_v11  ;;  %v9731_v11 = vld [vmem:[%s10773_s14 + $0xa48] ss:$28 sps:$4 sm:$0xff]  }
 0x3db   : > { %7537 = vmatpush1.bf16.msra.mxu1 %v9629_v5  ;;  %v9787_v5 = vld [vmem:[%s10773_s14 + $0xa84] ss:$28 sps:$4 sm:$0xff]  }
 0x3dc   : > { %7538 = vmatprep.subr.bf16.mxu1 %v9634_v23  ;;  %v9698_v23 = vld [vmem:[%s10773_s14 + $0x388] ss:$28 sps:$4 sm:$0xff]  }
 0x3dd   : > { %7455 = vmatpush1.bf16.msra.mxu0 %v9659_v24  ;;  %v9706_v24 = vld [vmem:[%s10773_s14 + $0x3c4] ss:$28 sps:$4 sm:$0xff]  }
 0x3de   : > { %7456 = vmatprep.subr.bf16.mxu0 %v9667_v17  ;;  %v9704_v17 = vld [vmem:[%s10773_s14 + $0x3c0] ss:$28 sps:$4 sm:$0xff]  }
 0x3df   : > { %7539 = vmatpush1.bf16.msra.mxu1 %v9632_v25  ;;  %v9712_v25 = vld [vmem:[%s10773_s14 + $0x3fc] ss:$28 sps:$4 sm:$0xff]  }
 0x3e0   : > { %7540 = vmatprep.subr.bf16.mxu1 %v9637_v40  ;;  %v9710_v40 = vld [vmem:[%s10773_s14 + $0x3f8] ss:$28 sps:$4 sm:$0xff]  }
 0x3e1   : > { %7457 = vmatpush1.bf16.msra.mxu0 %v9665_v28  ;;  %v9718_v28 = vld [vmem:[%s10773_s14 + $0x434] ss:$28 sps:$4 sm:$0xff]  }
 0x3e2   : > { %7458 = vmatprep.subr.bf16.mxu0 %v9673_v29  ;;  %v9716_v29 = vld [vmem:[%s10773_s14 + $0x430] ss:$28 sps:$4 sm:$0xff]  }
 0x3e3   : > { %7541 = vmatpush1.bf16.msra.mxu1 %v9635_v33  ;;  %v9724_v33 = vld [vmem:[%s10773_s14 + $0x46c] ss:$28 sps:$4 sm:$0xff]  }
 0x3e4   : > { %7542 = vmatprep.subr.bf16.mxu1 %v9640_v34  ;;  %v9722_v34 = vld [vmem:[%s10773_s14 + $0x468] ss:$28 sps:$4 sm:$0xff]  }
 0x3e5   : > { %7459 = vmatpush1.bf16.msra.mxu0 %v9671_v36  ;;  %v9730_v36 = vld [vmem:[%s10773_s14 + $0x4a4] ss:$28 sps:$4 sm:$0xff]  }
 0x3e6   : > { %7460 = vmatprep.subr.bf16.mxu0 %v9679_v35  ;;  %v11071_v35 = vld [vmem:[#allocation10] sm:$0xff] }
 0x3e7   : > { %7543 = vmatpush1.bf16.msra.mxu1 %v9638_v37  ;;  %v1260_v37 = vrot.slane %v11071_v35, %v10843_v20 }
 0x3e8   : > { %7544 = vmatprep.subr.bf16.mxu1 %v9646_v14  ;;  %v9728_v14 = vld [vmem:[%s10773_s14 + $0x4a0] ss:$28 sps:$4 sm:$0xff]  }
 0x3e9   : > { %7461 = vmatpush1.bf16.msra.mxu0 %v9677_v39  ;;  %v1264_v39 = vrot.slane %v11071_v35, %v10816_v55 }
 0x3ea   : > { %7462 = vmatprep.subr.bf16.mxu0 %v9685_v38  ;;  %v9736_v38 = vld [vmem:[%s10773_s14 + $0x4dc] ss:$28 sps:$4 sm:$0xff]  }
 0x3eb   : > { %7545 = vmatpush1.bf16.msra.mxu1 %v9644_v45 }
 0x3ec   : > { %7546 = vmatprep.subr.bf16.mxu1 %v9652_v41 }
 0x3ed   : > { %7463 = vmatpush1.bf16.msra.mxu0 %v9683_v42 }
 0x3ee   : > { %7464 = vmatprep.subr.bf16.mxu0 %v9691_v43  ;;  %v9734_v43 = vld [vmem:[%s10773_s14 + $0x4d8] ss:$28 sps:$4 sm:$0xff]  }
 0x3ef   : > { %7547 = vmatpush1.bf16.msra.mxu1 %v9650_v50 }
 0x3f0   : > { %7548 = vmatprep.subr.bf16.mxu1 %v9658_v52 }
 0x3f1   : > { %7465 = vmatpush1.bf16.msra.mxu0 %v9689_v53  ;;  %v9739_v53 = vld [vmem:[%s10773_s14 + $0x514] ss:$28 sps:$4 sm:$0xff]  }
 0x3f2   : > { %7466 = vmatprep.subr.bf16.mxu0 %v9697_v15 }
 0x3f3   : > { %7549 = vmatpush1.bf16.msra.mxu1 %v9656_v27 }
 0x3f4   : > { %7550 = vmatprep.subr.bf16.mxu1 %v9664_v54 }
 0x3f5   : > { %7467 = vmatpush1.bf16.msra.mxu0 %v9695_v56  ;;  %v9737_v56 = vld [vmem:[%s10773_s14 + $0x510] ss:$28 sps:$4 sm:$0xff]  }
 0x3f6   : > { %7468 = vmatprep.subr.bf16.mxu0 %v9703_v58 }
 0x3f7   : > { %7551 = vmatpush1.bf16.msra.mxu1 %v9662_v59  ;;  %v9742_v59 = vld [vmem:[%s10773_s14 + $0x54c] ss:$28 sps:$4 sm:$0xff]  }
 0x3f8   : > { %7552 = vmatprep.subr.bf16.mxu1 %v9670_v61  ;;  %v9785_v61 = vld [vmem:[%s10773_s14 + $0xa80] ss:$28 sps:$4 sm:$0xff]  }
 0x3f9   : > { %7469 = vmatpush1.bf16.msra.mxu0 %v9701_v62 }
 0x3fa   : > { %7470 = vmatprep.subr.bf16.mxu0 %v9709_v22  ;;  %v9793_v22 = vld [vmem:[%s10773_s14 + $0xabc] ss:$28 sps:$4 sm:$0xff]  }
 0x3fb   : > { %7553 = vmatpush1.bf16.msra.mxu1 %v9668_v63  ;;  %v9740_v63 = vld [vmem:[%s10773_s14 + $0x548] ss:$28 sps:$4 sm:$0xff]  }
 0x3fc   : > { %7554 = vmatprep.subr.bf16.mxu1 %v9676_v0  ;;  %v9745_v0 = vld [vmem:[%s10773_s14 + $0x584] ss:$28 sps:$4 sm:$0xff]  }
 0x3fd   : > { %7471 = vmatpush1.bf16.msra.mxu0 %v9707_v60  ;;  %v9791_v60 = vld [vmem:[%s10773_s14 + $0xab8] ss:$28 sps:$4 sm:$0xff]  }
 0x3fe   : > { %7472 = vmatprep.subr.bf16.mxu0 %v9715_v12  ;;  %v9799_v12 = vld [vmem:[%s10773_s14 + $0xaf4] ss:$28 sps:$4 sm:$0xff]  }
 0x3ff   : > { %7555 = vmatpush1.bf16.msra.mxu1 %v9674_v2  ;;  %v9743_v2 = vld [vmem:[%s10773_s14 + $0x580] ss:$28 sps:$4 sm:$0xff]  }
 0x400   : > { %7556 = vmatprep.subr.bf16.mxu1 %v9682_v3  ;;  %v9748_v3 = vld [vmem:[%s10773_s14 + $0x5bc] ss:$28 sps:$4 sm:$0xff]  }
 0x401   : > { %7473 = vmatpush1.bf16.msra.mxu0 %v9713_v4  ;;  %v9797_v4 = vld [vmem:[%s10773_s14 + $0xaf0] ss:$28 sps:$4 sm:$0xff]  }
 0x402   : > { %7474 = vmatprep.subr.bf16.mxu0 %v9721_v31  ;;  %v9805_v31 = vld [vmem:[%s10773_s14 + $0xb2c] ss:$28 sps:$4 sm:$0xff]  }
 0x403   : > { %7557 = vmatpush1.bf16.msra.mxu1 %v9680_v51  ;;  %v9746_v51 = vld [vmem:[%s10773_s14 + $0x5b8] ss:$28 sps:$4 sm:$0xff]  }
 0x404   : > { %7558 = vmatprep.subr.bf16.mxu1 %v9688_v9  ;;  %v9751_v9 = vld [vmem:[%s10773_s14 + $0x5f4] ss:$28 sps:$4 sm:$0xff]  }
 0x405   : > { %7475 = vmatpush1.bf16.msra.mxu0 %v9719_v10  ;;  %v9803_v10 = vld [vmem:[%s10773_s14 + $0xb28] ss:$28 sps:$4 sm:$0xff]  }
 0x406   : > { %7476 = vmatprep.subr.bf16.mxu0 %v9727_v26  ;;  %v9811_v26 = vld [vmem:[%s10773_s14 + $0xb64] ss:$28 sps:$4 sm:$0xff]  }
 0x407   : > { %7559 = vmatpush1.bf16.msra.mxu1 %v9686_v32  ;;  %v9749_v32 = vld [vmem:[%s10773_s14 + $0x5f0] ss:$28 sps:$4 sm:$0xff]  }
 0x408   : > { %7560 = vmatprep.subr.bf16.mxu1 %v9694_v16  ;;  %v9754_v16 = vld [vmem:[%s10773_s14 + $0x62c] ss:$28 sps:$4 sm:$0xff]  }
 0x409   : > { %7477 = vmatpush1.bf16.msra.mxu0 %v9725_v18  ;;  %v9809_v18 = vld [vmem:[%s10773_s14 + $0xb60] ss:$28 sps:$4 sm:$0xff]  }
 0x40a   : > { %7478 = vmatprep.subr.bf16.mxu0 %v9733_v57  ;;  %v9817_v57 = vld [vmem:[%s10773_s14 + $0xb9c] ss:$28 sps:$4 sm:$0xff]  }
 0x40b   : > { %7561 = vmatpush1.bf16.msra.mxu1 %v9692_v19  ;;  %v9752_v19 = vld [vmem:[%s10773_s14 + $0x628] ss:$28 sps:$4 sm:$0xff]  }
 0x40c   : > { %7571 = vmatprep.subr.bf16.mxu1 %v9700_v21  ;;  %v9757_v21 = vld [vmem:[%s10773_s14 + $0x664] ss:$28 sps:$4 sm:$0xff]  }
 0x40d   : > { %7479 = vmatpush1.bf16.msra.mxu0 %v9731_v11  ;;  %v9815_v11 = vld [vmem:[%s10773_s14 + $0xb98] ss:$28 sps:$4 sm:$0xff]  }
 0x40e   : > { %7563 = vmatmul.mubr.bf16.vlgmr.msra.gmra.mrb[20].mxu1 %v10943_v6  ;;  %7489 = vmatprep.subr.bf16.mxu0 %v9787_v5  ;;  %v9823_v5 = vld [vmem:[%s10773_s14 + $0xbd4] ss:$28 sps:$4 sm:$0xff]  }
 0x40f   : > { %7572 = vmatpush1.bf16.msra.mxu1 %v9698_v23  ;;  %7603 = vmatprep.mubr.bf16.mxu1 %v10965_v1  ;;  %v9755_v23 = vld [vmem:[%s10773_s14 + $0x660] ss:$28 sps:$4 sm:$0xff]  }
 0x410   : > { %7573 = vmatprep.subr.bf16.mxu1 %v9706_v24  ;;  %v9760_v24 = vld [vmem:[%s10773_s14 + $0x69c] ss:$28 sps:$4 sm:$0xff]  }
 0x413   : > { %7574 = vmatpush1.bf16.msra.mxu1 %v9704_v17  ;;  %v9821_v17 = vld [vmem:[%s10773_s14 + $0xbd0] ss:$28 sps:$4 sm:$0xff]  }
 0x414   : > { %7575 = vmatprep.subr.bf16.mxu1 %v9712_v25  ;;  %v9829_v25 = vld [vmem:[%s10773_s14 + $0xc0c] ss:$28 sps:$4 sm:$0xff]  }
 0x417   : > { %7576 = vmatpush1.bf16.msra.mxu1 %v9710_v40  ;;  %v9758_v40 = vld [vmem:[%s10773_s14 + $0x698] ss:$28 sps:$4 sm:$0xff]  }
 0x418   : > { %7577 = vmatprep.subr.bf16.mxu1 %v9718_v28  ;;  %v9763_v28 = vld [vmem:[%s10773_s14 + $0x6d4] ss:$28 sps:$4 sm:$0xff]  }
 0x41b   : > { %7578 = vmatpush1.bf16.msra.mxu1 %v9716_v29  ;;  %v9827_v29 = vld [vmem:[%s10773_s14 + $0xc08] ss:$28 sps:$4 sm:$0xff]  }
 0x41c   : > { %7579 = vmatprep.subr.bf16.mxu1 %v9724_v33  ;;  %v9835_v33 = vld [vmem:[%s10773_s14 + $0xc44] ss:$28 sps:$4 sm:$0xff]  }
 0x41f   : > { %7580 = vmatpush1.bf16.msra.mxu1 %v9722_v34  ;;  %v9761_v34 = vld [vmem:[%s10773_s14 + $0x6d0] ss:$28 sps:$4 sm:$0xff]  }
 0x420   : > { %7581 = vmatprep.subr.bf16.mxu1 %v9730_v36  ;;  %v9766_v36 = vld [vmem:[%s10773_s14 + $0x70c] ss:$28 sps:$4 sm:$0xff]  }
 0x422   : > { %v4326_v45 = vpop.f32.mrb[12].mxu0 }
 0x423   : > { %v9320_v41 = vadd.f32 %v4326_v45, %v1260_v37  ;;  %v4328_v42 = vpop.f32.mrb[13].mxu0  ;;  %7582 = vmatpush1.bf16.msra.mxu1 %v9728_v14  ;;  %v9833_v37 = vld [vmem:[%s10773_s14 + $0xc40] ss:$28 sps:$4 sm:$0xff]   ;;  %v9839_v45 = vld [vmem:[%s10773_s14 + $0xc78] ss:$28 sps:$4 sm:$0xff]  }
 0x424   : > { %v9321_v50 = vadd.f32 %v4328_v42, %v1264_v39  ;;  %v4330_v52 = vpop.f32.mrb[14].mxu0  ;;  %7583 = vmatprep.subr.bf16.mxu1 %v9736_v38  ;;  %v9841_v14 = vld [vmem:[%s10773_s14 + $0xc7c] ss:$28 sps:$4 sm:$0xff]   ;;  %v9764_v39 = vld [vmem:[%s10773_s14 + $0x708] ss:$28 sps:$4 sm:$0xff]  }
 0x425   : > { %v4501_v15 = vmax.f32 %v9320_v41, 0.0  ;;  %v4331_v27 = vpop.f32.mrb[15].mxu0  ;;  %v9769_v38 = vld [vmem:[%s10773_s14 + $0x744] ss:$28 sps:$4 sm:$0xff]   ;;  %v9847_v41 = vld [vmem:[%s10773_s14 + $0xcb4] ss:$28 sps:$4 sm:$0xff]  }
 0x426   : > { %v4502_v54 = vmax.f32 %v9321_v50, 0.0  ;;  %v9767_v42 = vld [vmem:[%s10773_s14 + $0x740] ss:$28 sps:$4 sm:$0xff]   ;;  %v9845_v50 = vld [vmem:[%s10773_s14 + $0xcb0] ss:$28 sps:$4 sm:$0xff]  }
 0x427   : > { %7584 = vmatpush1.bf16.msra.mxu1 %v9734_v43  ;;  %v11086_v62 = vpack.c.bf16 %v4501_v15, %v4501_v15  ;;  %v9772_v43 = vld [vmem:[%s10773_s14 + $0x77c] ss:$28 sps:$4 sm:$0xff]   ;;  %v9853_v52 = vld [vmem:[%s10773_s14 + $0xcec] ss:$28 sps:$4 sm:$0xff]   ;;  %v9775_v15 = vld [vmem:[%s10773_s14 + $0x7b4] ss:$28 sps:$4 sm:$0xff]  }
 0x428   : > { %v11082_v58 = vpack.c.bf16 %v4502_v54, %v4502_v54  ;;  %7585 = vmatprep.subr.bf16.mxu1 %v9739_v53  ;;  %v9770_v53 = vld [vmem:[%s10773_s14 + $0x778] ss:$28 sps:$4 sm:$0xff]   ;;  %v9851_v27 = vld [vmem:[%s10773_s14 + $0xce8] ss:$28 sps:$4 sm:$0xff]  }
 0x429   : > { %v9859_v54 = vld [vmem:[%s10773_s14 + $0xd24] ss:$28 sps:$4 sm:$0xff]  }
 0x42a   : > { %7480 = vmatprep.mubr.bf16.mxu0 %v11082_v58 }
 0x42b   : > { %7481 = vmatmul.mubr.bf16.vlgmr.msra.gmra.mrb[16].mxu0 %v11086_v62  ;;  %7586 = vmatpush1.bf16.msra.mxu1 %v9737_v56  ;;  %v9773_v56 = vld [vmem:[%s10773_s14 + $0x7b0] ss:$28 sps:$4 sm:$0xff]  }
 0x42c   : > { %7587 = vmatprep.subr.bf16.mxu1 %v9742_v59  ;;  %7490 = vmatpush1.bf16.msra.mxu0 %v9785_v61  ;;  %v9778_v59 = vld [vmem:[%s10773_s14 + $0x7ec] ss:$28 sps:$4 sm:$0xff]   ;;  %v9857_v61 = vld [vmem:[%s10773_s14 + $0xd20] ss:$28 sps:$4 sm:$0xff]  }
 0x42d   : > { %7491 = vmatprep.subr.bf16.mxu0 %v9793_v22  ;;  %v9865_v22 = vld [vmem:[%s10773_s14 + $0xd5c] ss:$28 sps:$4 sm:$0xff]  }
 0x42f   : > { %7588 = vmatpush1.bf16.msra.mxu1 %v9740_v63  ;;  %v9776_v63 = vld [vmem:[%s10773_s14 + $0x7e8] ss:$28 sps:$4 sm:$0xff]  }
 0x430   : > { %7589 = vmatprep.subr.bf16.mxu1 %v9745_v0  ;;  %7492 = vmatpush1.bf16.msra.mxu0 %v9791_v60  ;;  %v9781_v0 = vld [vmem:[%s10773_s14 + $0x824] ss:$28 sps:$4 sm:$0xff]   ;;  %v9863_v60 = vld [vmem:[%s10773_s14 + $0xd58] ss:$28 sps:$4 sm:$0xff]  }
 0x431   : > { %7493 = vmatprep.subr.bf16.mxu0 %v9799_v12  ;;  %v9871_v12 = vld [vmem:[%s10773_s14 + $0xd94] ss:$28 sps:$4 sm:$0xff]  }
 0x433   : > { %7590 = vmatpush1.bf16.msra.mxu1 %v9743_v2  ;;  %v9779_v2 = vld [vmem:[%s10773_s14 + $0x820] ss:$28 sps:$4 sm:$0xff]  }
 0x434   : > { %7591 = vmatprep.subr.bf16.mxu1 %v9748_v3  ;;  %7494 = vmatpush1.bf16.msra.mxu0 %v9797_v4  ;;  %v9784_v3 = vld [vmem:[%s10773_s14 + $0x85c] ss:$28 sps:$4 sm:$0xff]   ;;  %v9869_v4 = vld [vmem:[%s10773_s14 + $0xd90] ss:$28 sps:$4 sm:$0xff]  }
 0x435   : > { %7495 = vmatprep.subr.bf16.mxu0 %v9805_v31  ;;  %v9877_v31 = vld [vmem:[%s10773_s14 + $0xdcc] ss:$28 sps:$4 sm:$0xff]  }
 0x437   : > { %7592 = vmatpush1.bf16.msra.mxu1 %v9746_v51  ;;  %v9782_v51 = vld [vmem:[%s10773_s14 + $0x858] ss:$28 sps:$4 sm:$0xff]  }
 0x438   : > { %7593 = vmatprep.subr.bf16.mxu1 %v9751_v9  ;;  %7496 = vmatpush1.bf16.msra.mxu0 %v9803_v10  ;;  %v9790_v9 = vld [vmem:[%s10773_s14 + $0x894] ss:$28 sps:$4 sm:$0xff]   ;;  %v9875_v10 = vld [vmem:[%s10773_s14 + $0xdc8] ss:$28 sps:$4 sm:$0xff]  }
 0x439   : > { %7497 = vmatprep.subr.bf16.mxu0 %v9811_v26  ;;  %v9883_v26 = vld [vmem:[%s10773_s14 + $0x14] ss:$28 sps:$4 sm:$0xff]  }
 0x43b   : > { %7594 = vmatpush1.bf16.msra.mxu1 %v9749_v32  ;;  %v9788_v32 = vld [vmem:[%s10773_s14 + $0x890] ss:$28 sps:$4 sm:$0xff]  }
 0x43c   : > { %7595 = vmatprep.subr.bf16.mxu1 %v9754_v16  ;;  %7498 = vmatpush1.bf16.msra.mxu0 %v9809_v18  ;;  %v9796_v16 = vld [vmem:[%s10773_s14 + $0x8cc] ss:$28 sps:$4 sm:$0xff]  }
 0x43d   : > { %7499 = vmatprep.subr.bf16.mxu0 %v9817_v57  ;;  %v9794_v18 = vld [vmem:[%s10773_s14 + $0x8c8] ss:$28 sps:$4 sm:$0xff]  }
 0x43e   : > { %v9802_v57 = vld [vmem:[%s10773_s14 + $0x904] ss:$28 sps:$4 sm:$0xff]  }
 0x43f   : > { %7596 = vmatpush1.bf16.msra.mxu1 %v9752_v19  ;;  %v9800_v19 = vld [vmem:[%s10773_s14 + $0x900] ss:$28 sps:$4 sm:$0xff]  }
 0x440   : > { %7597 = vmatprep.subr.bf16.mxu1 %v9757_v21  ;;  %7500 = vmatpush1.bf16.msra.mxu0 %v9815_v11  ;;  %v9808_v21 = vld [vmem:[%s10773_s14 + $0x93c] ss:$28 sps:$4 sm:$0xff]  }
 0x441   : > { %7501 = vmatprep.subr.bf16.mxu0 %v9823_v5  ;;  %v9806_v11 = vld [vmem:[%s10773_s14 + $0x938] ss:$28 sps:$4 sm:$0xff]  }
 0x442   : > { %v9814_v5 = vld [vmem:[%s10773_s14 + $0x974] ss:$28 sps:$4 sm:$0xff]  }
 0x443   : > { %7598 = vmatpush1.bf16.msra.mxu1 %v9755_v23  ;;  %v9812_v23 = vld [vmem:[%s10773_s14 + $0x970] ss:$28 sps:$4 sm:$0xff]  }
 0x444   : > { %7599 = vmatprep.subr.bf16.mxu1 %v9760_v24  ;;  %7502 = vmatpush1.bf16.msra.mxu0 %v9821_v17  ;;  %v9820_v24 = vld [vmem:[%s10773_s14 + $0x9ac] ss:$28 sps:$4 sm:$0xff]  }
 0x445   : > { %7503 = vmatprep.subr.bf16.mxu0 %v9829_v25  ;;  %v9818_v17 = vld [vmem:[%s10773_s14 + $0x9a8] ss:$28 sps:$4 sm:$0xff]  }
 0x446   : > { %v9826_v25 = vld [vmem:[%s10773_s14 + $0x9e4] ss:$28 sps:$4 sm:$0xff]  }
 0x447   : > { %7600 = vmatpush1.bf16.msra.mxu1 %v9758_v40  ;;  %v9824_v40 = vld [vmem:[%s10773_s14 + $0x9e0] ss:$28 sps:$4 sm:$0xff]  }
 0x448   : > { %7601 = vmatprep.subr.bf16.mxu1 %v9763_v28  ;;  %7504 = vmatpush1.bf16.msra.mxu0 %v9827_v29  ;;  %v9832_v28 = vld [vmem:[%s10773_s14 + $0xa1c] ss:$28 sps:$4 sm:$0xff]  }
 0x449   : > { %7505 = vmatprep.subr.bf16.mxu0 %v9835_v33  ;;  %v9830_v29 = vld [vmem:[%s10773_s14 + $0xa18] ss:$28 sps:$4 sm:$0xff]  }
 0x44a   : > { %v9838_v33 = vld [vmem:[%s10773_s14 + $0xa54] ss:$28 sps:$4 sm:$0xff]  }
 0x44b   : > { %7602 = vmatpush1.bf16.msra.mxu1 %v9761_v34  ;;  %v9836_v34 = vld [vmem:[%s10773_s14 + $0xa50] ss:$28 sps:$4 sm:$0xff]  }
 0x44c   : > { %7612 = vmatprep.subr.bf16.mxu1 %v9766_v36  ;;  %7506 = vmatpush1.bf16.msra.mxu0 %v9833_v37  ;;  %v9844_v36 = vld [vmem:[%s10773_s14 + $0xa8c] ss:$28 sps:$4 sm:$0xff]  }
 0x44d   : > { %7507 = vmatprep.subr.bf16.mxu0 %v9841_v14  ;;  %v9842_v37 = vld [vmem:[%s10773_s14 + $0xa88] ss:$28 sps:$4 sm:$0xff]  }
 0x44e   : > { %7604 = vmatmul.mubr.bf16.vlgmr.msra.gmra.mrb[20].mxu1 %v10992_v7  ;;  %v9850_v14 = vld [vmem:[%s10773_s14 + $0xac4] ss:$28 sps:$4 sm:$0xff]  }
 0x44f   : > { %7613 = vmatpush1.bf16.msra.mxu1 %v9764_v39  ;;  %7644 = vmatprep.mubr.bf16.mxu1 %v11082_v58  ;;  %v9848_v39 = vld [vmem:[%s10773_s14 + $0xac0] ss:$28 sps:$4 sm:$0xff]  }
 0x450   : > { %7614 = vmatprep.subr.bf16.mxu1 %v9769_v38  ;;  %7508 = vmatpush1.bf16.msra.mxu0 %v9839_v45  ;;  %v9856_v38 = vld [vmem:[%s10773_s14 + $0xafc] ss:$28 sps:$4 sm:$0xff]  }
 0x451   : > { %7509 = vmatprep.subr.bf16.mxu0 %v9847_v41  ;;  %v9854_v45 = vld [vmem:[%s10773_s14 + $0xaf8] ss:$28 sps:$4 sm:$0xff]  }
 0x452   : > { %v9862_v41 = vld [vmem:[%s10773_s14 + $0xb34] ss:$28 sps:$4 sm:$0xff]  }
 0x453   : > { %7615 = vmatpush1.bf16.msra.mxu1 %v9767_v42  ;;  %v9860_v42 = vld [vmem:[%s10773_s14 + $0xb30] ss:$28 sps:$4 sm:$0xff]  }
 0x454   : > { %7616 = vmatprep.subr.bf16.mxu1 %v9772_v43  ;;  %7510 = vmatpush1.bf16.msra.mxu0 %v9845_v50  ;;  %v9868_v43 = vld [vmem:[%s10773_s14 + $0xb6c] ss:$28 sps:$4 sm:$0xff]  }
 0x455   : > { %7511 = vmatprep.subr.bf16.mxu0 %v9853_v52  ;;  %v9866_v50 = vld [vmem:[%s10773_s14 + $0xb68] ss:$28 sps:$4 sm:$0xff]  }
 0x456   : > { %v9874_v52 = vld [vmem:[%s10773_s14 + $0xba4] ss:$28 sps:$4 sm:$0xff]  }
 0x457   : > { %7617 = vmatpush1.bf16.msra.mxu1 %v9770_v53  ;;  %v1268_v53 = vrot.slane %v11071_v35, %v10862_v8 }
 0x458   : > { %7618 = vmatprep.subr.bf16.mxu1 %v9775_v15  ;;  %7512 = vmatpush1.bf16.msra.mxu0 %v9851_v27  ;;  %v1272_v15 = vrot.slane %v11071_v35, %v453_v30  ;;  %v9872_v27 = vld [vmem:[%s10773_s14 + $0xba0] ss:$28 sps:$4 sm:$0xff]  }
 0x459   : > { %7513 = vmatprep.subr.bf16.mxu0 %v9859_v54  ;;  %v9880_v54 = vld [vmem:[%s10773_s14 + $0xbdc] ss:$28 sps:$4 sm:$0xff]  }
 0x45b   : > { %7619 = vmatpush1.bf16.msra.mxu1 %v9773_v56 }
 0x45c   : > { %7620 = vmatprep.subr.bf16.mxu1 %v9778_v59  ;;  %7514 = vmatpush1.bf16.msra.mxu0 %v9857_v61 }
 0x45d   : > { %7515 = vmatprep.subr.bf16.mxu0 %v9865_v22 }
 0x45f   : > { %7621 = vmatpush1.bf16.msra.mxu1 %v9776_v63 }
 0x460   : > { %7622 = vmatprep.subr.bf16.mxu1 %v9781_v0  ;;  %7516 = vmatpush1.bf16.msra.mxu0 %v9863_v60  ;;  %v9878_v0 = vld [vmem:[%s10773_s14 + $0xbd8] ss:$28 sps:$4 sm:$0xff]  }
 0x461   : > { %7517 = vmatprep.subr.bf16.mxu0 %v9871_v12 }
 0x463   : > { %7623 = vmatpush1.bf16.msra.mxu1 %v9779_v2  ;;  %v9886_v2 = vld [vmem:[%s10773_s14 + $0xc14] ss:$28 sps:$4 sm:$0xff]  }
 0x464   : > { %7624 = vmatprep.subr.bf16.mxu1 %v9784_v3  ;;  %7518 = vmatpush1.bf16.msra.mxu0 %v9869_v4  ;;  %v9881_v3 = vld [vmem:[%s10773_s14 + $0x10] ss:$28 sps:$4 sm:$0xff]  }
 0x465   : > { %7519 = vmatprep.subr.bf16.mxu0 %v9877_v31  ;;  %v9884_v4 = vld [vmem:[%s10773_s14 + $0xc10] ss:$28 sps:$4 sm:$0xff]  }
 0x467   : > { %7625 = vmatpush1.bf16.msra.mxu1 %v9782_v51  ;;  %v9889_v51 = vld [vmem:[%s10773_s14 + $0x4c] ss:$28 sps:$4 sm:$0xff]  }
 0x468   : > { %7626 = vmatprep.subr.bf16.mxu1 %v9790_v9  ;;  %7520 = vmatpush1.bf16.msra.mxu0 %v9875_v10  ;;  %v9892_v9 = vld [vmem:[%s10773_s14 + $0xc4c] ss:$28 sps:$4 sm:$0xff]  }
 0x469   : > { %7694 = vmatprep.subr.bf16.mxu0 %v9883_v26  ;;  %v9887_v10 = vld [vmem:[%s10773_s14 + $0x48] ss:$28 sps:$4 sm:$0xff]  }
 0x46a   : > { %v9890_v26 = vld [vmem:[%s10773_s14 + $0xc48] ss:$28 sps:$4 sm:$0xff]  }
 0x46b   : > { %7627 = vmatpush1.bf16.msra.mxu1 %v9788_v32  ;;  %v9895_v32 = vld [vmem:[%s10773_s14 + $0x84] ss:$28 sps:$4 sm:$0xff]  }
 0x46c   : > { %7628 = vmatprep.subr.bf16.mxu1 %v9796_v16  ;;  %v9898_v16 = vld [vmem:[%s10773_s14 + $0xc84] ss:$28 sps:$4 sm:$0xff]  }
 0x46f   : > { %7629 = vmatpush1.bf16.msra.mxu1 %v9794_v18  ;;  %v9893_v18 = vld [vmem:[%s10773_s14 + $0x80] ss:$28 sps:$4 sm:$0xff]  }
 0x470   : > { %7630 = vmatprep.subr.bf16.mxu1 %v9802_v57  ;;  %v9896_v57 = vld [vmem:[%s10773_s14 + $0xc80] ss:$28 sps:$4 sm:$0xff]  }
 0x473   : > { %7631 = vmatpush1.bf16.msra.mxu1 %v9800_v19  ;;  %v9901_v19 = vld [vmem:[%s10773_s14 + $0xbc] ss:$28 sps:$4 sm:$0xff]  }
 0x474   : > { %7632 = vmatprep.subr.bf16.mxu1 %v9808_v21  ;;  %v9904_v21 = vld [vmem:[%s10773_s14 + $0xcbc] ss:$28 sps:$4 sm:$0xff]  }
 0x477   : > { %7633 = vmatpush1.bf16.msra.mxu1 %v9806_v11  ;;  %v9899_v11 = vld [vmem:[%s10773_s14 + $0xb8] ss:$28 sps:$4 sm:$0xff]  }
 0x478   : > { %7634 = vmatprep.subr.bf16.mxu1 %v9814_v5  ;;  %v9902_v5 = vld [vmem:[%s10773_s14 + $0xcb8] ss:$28 sps:$4 sm:$0xff]  }
 0x47b   : > { %7635 = vmatpush1.bf16.msra.mxu1 %v9812_v23  ;;  %v9907_v23 = vld [vmem:[%s10773_s14 + $0xf4] ss:$28 sps:$4 sm:$0xff]  }
 0x47c   : > { %7636 = vmatprep.subr.bf16.mxu1 %v9820_v24  ;;  %v9910_v24 = vld [vmem:[%s10773_s14 + $0xcf4] ss:$28 sps:$4 sm:$0xff]  }
 0x47f   : > { %7637 = vmatpush1.bf16.msra.mxu1 %v9818_v17  ;;  %v9905_v17 = vld [vmem:[%s10773_s14 + $0xf0] ss:$28 sps:$4 sm:$0xff]  }
 0x480   : > { %7638 = vmatprep.subr.bf16.mxu1 %v9826_v25  ;;  %v9908_v25 = vld [vmem:[%s10773_s14 + $0xcf0] ss:$28 sps:$4 sm:$0xff]  }
 0x483   : > { %7639 = vmatpush1.bf16.msra.mxu1 %v9824_v40  ;;  %v9913_v40 = vld [vmem:[%s10773_s14 + $0x12c] ss:$28 sps:$4 sm:$0xff]  }
 0x484   : > { %7640 = vmatprep.subr.bf16.mxu1 %v9832_v28  ;;  %v9916_v28 = vld [vmem:[%s10773_s14 + $0xd2c] ss:$28 sps:$4 sm:$0xff]  }
 0x487   : > { %7641 = vmatpush1.bf16.msra.mxu1 %v9830_v29  ;;  %v9911_v29 = vld [vmem:[%s10773_s14 + $0x128] ss:$28 sps:$4 sm:$0xff]  }
 0x488   : > { %7642 = vmatprep.subr.bf16.mxu1 %v9838_v33  ;;  %v9914_v33 = vld [vmem:[%s10773_s14 + $0xd28] ss:$28 sps:$4 sm:$0xff]  }
 0x48b   : > { %7643 = vmatpush1.bf16.msra.mxu1 %v9836_v34  ;;  %v9919_v34 = vld [vmem:[%s10773_s14 + $0x164] ss:$28 sps:$4 sm:$0xff]  }
 0x48c   : > { %7653 = vmatprep.subr.bf16.mxu1 %v9844_v36  ;;  %v9922_v36 = vld [vmem:[%s10773_s14 + $0xd64] ss:$28 sps:$4 sm:$0xff]  }
 0x48e   : > { %7645 = vmatmul.mubr.bf16.vlgmr.msra.gmra.mrb[20].mxu1 %v11086_v62 }
 0x48f   : > { %7654 = vmatpush1.bf16.msra.mxu1 %v9842_v37  ;;  %v9917_v37 = vld [vmem:[%s10773_s14 + $0x160] ss:$28 sps:$4 sm:$0xff]  }
 0x490   : > { %7655 = vmatprep.subr.bf16.mxu1 %v9850_v14  ;;  %v9920_v14 = vld [vmem:[%s10773_s14 + $0xd60] ss:$28 sps:$4 sm:$0xff]  }
 0x493   : > { %7656 = vmatpush1.bf16.msra.mxu1 %v9848_v39  ;;  %v9925_v39 = vld [vmem:[%s10773_s14 + $0x19c] ss:$28 sps:$4 sm:$0xff]  }
 0x494   : > { %7657 = vmatprep.subr.bf16.mxu1 %v9856_v38  ;;  %v9928_v38 = vld [vmem:[%s10773_s14 + $0xd9c] ss:$28 sps:$4 sm:$0xff]  }
 0x497   : > { %7658 = vmatpush1.bf16.msra.mxu1 %v9854_v45  ;;  %v9923_v45 = vld [vmem:[%s10773_s14 + $0x198] ss:$28 sps:$4 sm:$0xff]  }
 0x498   : > { %7659 = vmatprep.subr.bf16.mxu1 %v9862_v41  ;;  %v9926_v41 = vld [vmem:[%s10773_s14 + $0xd98] ss:$28 sps:$4 sm:$0xff]  }
 0x49b   : > { %7660 = vmatpush1.bf16.msra.mxu1 %v9860_v42  ;;  %v9931_v42 = vld [vmem:[%s10773_s14 + $0x1d4] ss:$28 sps:$4 sm:$0xff]  }
 0x49c   : > { %7661 = vmatprep.subr.bf16.mxu1 %v9868_v43  ;;  %v9934_v43 = vld [vmem:[%s10773_s14 + $0xdd4] ss:$28 sps:$4 sm:$0xff]  }
 0x49f   : > { %7662 = vmatpush1.bf16.msra.mxu1 %v9866_v50  ;;  %v9929_v50 = vld [vmem:[%s10773_s14 + $0x1d0] ss:$28 sps:$4 sm:$0xff]  }
 0x4a0   : > { %7663 = vmatprep.subr.bf16.mxu1 %v9874_v52  ;;  %v9932_v52 = vld [vmem:[%s10773_s14 + $0xdd0] ss:$28 sps:$4 sm:$0xff]  }
 0x4a1   : > { %v4490_v56 = vpop.f32.mrb[16].mxu1 }
 0x4a2   : > { %v9322_v59 = vadd.f32 %v4490_v56, %v1268_v53  ;;  %v4492_v61 = vpop.f32.mrb[17].mxu1  ;;  %v9937_v53 = vld [vmem:[%s10773_s14 + $0x20c] ss:$28 sps:$4 sm:$0xff]   ;;  %v9942_v56 = vld [vmem:[%s10773_s14 + $0x244] ss:$28 sps:$4 sm:$0xff]  }
 0x4a3   : > { %v9323_v22 = vadd.f32 %v4492_v61, %v1272_v15  ;;  %v4494_v63 = vpop.f32.mrb[18].mxu1  ;;  %7664 = vmatpush1.bf16.msra.mxu1 %v9872_v27  ;;  %v9938_v15 = vld [vmem:[%s10773_s14 + $0x1d8] ss:$28 sps:$4 sm:$0xff]   ;;  %v9935_v27 = vld [vmem:[%s10773_s14 + $0x208] ss:$28 sps:$4 sm:$0xff]  }
 0x4a4   : > { %v4503_v60 = vmax.f32 %v9322_v59, 0.0  ;;  %v4495_v12 = vpop.f32.mrb[19].mxu1  ;;  %7665 = vmatprep.subr.bf16.mxu1 %v9880_v54  ;;  %v9939_v54 = vld [vmem:[%s10773_s14 + $0x18] ss:$28 sps:$4 sm:$0xff]   ;;  %v9943_v59 = vld [vmem:[%s10773_s14 + $0x210] ss:$28 sps:$4 sm:$0xff]  }
 0x4a5   : > { %v4504_v30 = vmax.f32 %v9323_v22, 0.0  ;;  %v9940_v61 = vld [vmem:[%s10773_s14 + $0x240] ss:$28 sps:$4 sm:$0xff]   ;;  %v9944_v22 = vld [vmem:[%s10773_s14 + $0x50] ss:$28 sps:$4 sm:$0xff]  }
 0x4a6   : > { %v11195_v31 = vpack.c.bf16 %v4503_v60, %v4503_v60  ;;  %v9947_v63 = vld [vmem:[%s10773_s14 + $0x27c] ss:$28 sps:$4 sm:$0xff]   ;;  %v9949_v12 = vld [vmem:[%s10773_s14 + $0x88] ss:$28 sps:$4 sm:$0xff]  }
 0x4a7   : > { %v11191_v35 = vpack.c.bf16 %v4504_v30, %v4504_v30  ;;  %7666 = vmatpush1.bf16.msra.mxu1 %v9878_v0  ;;  %v9948_v0 = vld [vmem:[%s10773_s14 + $0x248] ss:$28 sps:$4 sm:$0xff]   ;;  %v9945_v60 = vld [vmem:[%s10773_s14 + $0x278] ss:$28 sps:$4 sm:$0xff]   ;;  %v9953_v30 = vld [vmem:[%s10773_s14 + $0x280] ss:$28 sps:$4 sm:$0xff]  }
 0x4a8   : > { %7667 = vmatprep.subr.bf16.mxu1 %v9886_v2  ;;  %v9952_v2 = vld [vmem:[%s10773_s14 + $0x2b4] ss:$28 sps:$4 sm:$0xff]  }
 0x4a9   : > { %7521 = vmatprep.mubr.bf16.mxu0 %v11191_v35  ;;  %7685 = vmatprep.mubr.bf16.mxu1 %v11191_v35 }
 0x4aa   : > { %7522 = vmatmul.mubr.bf16.vlgmr.msra.gmra.mrb[16].mxu0 %v11195_v31 }
 0x4ab   : > { %7695 = vmatpush1.bf16.msra.mxu0 %v9881_v3  ;;  %7668 = vmatpush1.bf16.msra.mxu1 %v9884_v4  ;;  %v9954_v3 = vld [vmem:[%s10773_s14 + $0xc0] ss:$28 sps:$4 sm:$0xff]   ;;  %v9957_v4 = vld [vmem:[%s10773_s14 + $0x2ec] ss:$28 sps:$4 sm:$0xff]  }
 0x4ac   : > { %7726 = vmatprep.mubr.bf16.mxu0 %v10906_v13  ;;  %7696 = vmatprep.subr.bf16.mxu0 %v9889_v51  ;;  %v9958_v51 = vld [vmem:[%s10773_s14 + $0x2b8] ss:$28 sps:$4 sm:$0xff]  }
 0x4ad   : > { %7669 = vmatprep.subr.bf16.mxu1 %v9892_v9  ;;  %v9955_v9 = vld [vmem:[%s10773_s14 + $0x2e8] ss:$28 sps:$4 sm:$0xff]  }
 0x4af   : > { %7697 = vmatpush1.bf16.msra.mxu0 %v9887_v10  ;;  %7670 = vmatpush1.bf16.msra.mxu1 %v9890_v26  ;;  %v9959_v10 = vld [vmem:[%s10773_s14 + $0xf8] ss:$28 sps:$4 sm:$0xff]   ;;  %v9962_v26 = vld [vmem:[%s10773_s14 + $0x324] ss:$28 sps:$4 sm:$0xff]  }
 0x4b0   : > { %7698 = vmatprep.subr.bf16.mxu0 %v9895_v32  ;;  %7671 = vmatprep.subr.bf16.mxu1 %v9898_v16  ;;  %v9963_v32 = vld [vmem:[%s10773_s14 + $0x2f0] ss:$28 sps:$4 sm:$0xff]   ;;  %v9960_v16 = vld [vmem:[%s10773_s14 + $0x320] ss:$28 sps:$4 sm:$0xff]  }
 0x4b3   : > { %7699 = vmatpush1.bf16.msra.mxu0 %v9893_v18  ;;  %7672 = vmatpush1.bf16.msra.mxu1 %v9896_v57  ;;  %v9964_v18 = vld [vmem:[%s10773_s14 + $0x130] ss:$28 sps:$4 sm:$0xff]   ;;  %v9967_v57 = vld [vmem:[%s10773_s14 + $0x35c] ss:$28 sps:$4 sm:$0xff]  }
 0x4b4   : > { %7700 = vmatprep.subr.bf16.mxu0 %v9901_v19  ;;  %7673 = vmatprep.subr.bf16.mxu1 %v9904_v21  ;;  %v9968_v19 = vld [vmem:[%s10773_s14 + $0x328] ss:$28 sps:$4 sm:$0xff]   ;;  %v9965_v21 = vld [vmem:[%s10773_s14 + $0x358] ss:$28 sps:$4 sm:$0xff]  }
 0x4b7   : > { %7701 = vmatpush1.bf16.msra.mxu0 %v9899_v11  ;;  %7674 = vmatpush1.bf16.msra.mxu1 %v9902_v5  ;;  %v9969_v11 = vld [vmem:[%s10773_s14 + $0x168] ss:$28 sps:$4 sm:$0xff]   ;;  %v9972_v5 = vld [vmem:[%s10773_s14 + $0x394] ss:$28 sps:$4 sm:$0xff]  }
 0x4b8   : > { %7702 = vmatprep.subr.bf16.mxu0 %v9907_v23  ;;  %7675 = vmatprep.subr.bf16.mxu1 %v9910_v24  ;;  %v9973_v23 = vld [vmem:[%s10773_s14 + $0x360] ss:$28 sps:$4 sm:$0xff]   ;;  %v9970_v24 = vld [vmem:[%s10773_s14 + $0x390] ss:$28 sps:$4 sm:$0xff]  }
 0x4bb   : > { %7703 = vmatpush1.bf16.msra.mxu0 %v9905_v17  ;;  %7676 = vmatpush1.bf16.msra.mxu1 %v9908_v25  ;;  %v9974_v17 = vld [vmem:[%s10773_s14 + $0x1a0] ss:$28 sps:$4 sm:$0xff]   ;;  %v9977_v25 = vld [vmem:[%s10773_s14 + $0x3cc] ss:$28 sps:$4 sm:$0xff]  }
 0x4bc   : > { %7704 = vmatprep.subr.bf16.mxu0 %v9913_v40  ;;  %7677 = vmatprep.subr.bf16.mxu1 %v9916_v28  ;;  %v9978_v40 = vld [vmem:[%s10773_s14 + $0x558] ss:$28 sps:$4 sm:$0xff]   ;;  %v9975_v28 = vld [vmem:[%s10773_s14 + $0x3c8] ss:$28 sps:$4 sm:$0xff]  }
 0x4bf   : > { %7705 = vmatpush1.bf16.msra.mxu0 %v9911_v29  ;;  %7678 = vmatpush1.bf16.msra.mxu1 %v9914_v33  ;;  %v9979_v29 = vld [vmem:[%s10773_s14 + $0x398] ss:$28 sps:$4 sm:$0xff]   ;;  %v9982_v33 = vld [vmem:[%s10773_s14 + $0x404] ss:$28 sps:$4 sm:$0xff]  }
 0x4c0   : > { %7706 = vmatprep.subr.bf16.mxu0 %v9919_v34  ;;  %7679 = vmatprep.subr.bf16.mxu1 %v9922_v36  ;;  %v9983_v34 = vld [vmem:[%s10773_s14 + $0x590] ss:$28 sps:$4 sm:$0xff]   ;;  %v9980_v36 = vld [vmem:[%s10773_s14 + $0x400] ss:$28 sps:$4 sm:$0xff]  }
 0x4c3   : > { %7707 = vmatpush1.bf16.msra.mxu0 %v9917_v37  ;;  %7680 = vmatpush1.bf16.msra.mxu1 %v9920_v14  ;;  %v9984_v37 = vld [vmem:[%s10773_s14 + $0x3d0] ss:$28 sps:$4 sm:$0xff]   ;;  %v9987_v14 = vld [vmem:[%s10773_s14 + $0x43c] ss:$28 sps:$4 sm:$0xff]  }
 0x4c4   : > { %7708 = vmatprep.subr.bf16.mxu0 %v9925_v39  ;;  %7681 = vmatprep.subr.bf16.mxu1 %v9928_v38  ;;  %v9988_v39 = vld [vmem:[%s10773_s14 + $0x5c8] ss:$28 sps:$4 sm:$0xff]   ;;  %v9985_v38 = vld [vmem:[%s10773_s14 + $0x438] ss:$28 sps:$4 sm:$0xff]  }
 0x4c7   : > { %7709 = vmatpush1.bf16.msra.mxu0 %v9923_v45  ;;  %7682 = vmatpush1.bf16.msra.mxu1 %v9926_v41  ;;  %v9992_v45 = vld [vmem:[%s10773_s14 + $0x474] ss:$28 sps:$4 sm:$0xff]   ;;  %v9993_v41 = vld [vmem:[%s10773_s14 + $0x600] ss:$28 sps:$4 sm:$0xff]  }
 0x4c8   : > { %7710 = vmatprep.subr.bf16.mxu0 %v9931_v42  ;;  %7683 = vmatprep.subr.bf16.mxu1 %v9934_v43  ;;  %v9994_v42 = vld [vmem:[%s10773_s14 + $0x440] ss:$28 sps:$4 sm:$0xff]   ;;  %v9997_v43 = vld [vmem:[%s10773_s14 + $0x4ac] ss:$28 sps:$4 sm:$0xff]  }
 0x4cb   : > { %7711 = vmatpush1.bf16.msra.mxu0 %v9929_v50  ;;  %7684 = vmatpush1.bf16.msra.mxu1 %v9932_v52  ;;  %v9998_v50 = vld [vmem:[%s10773_s14 + $0x638] ss:$28 sps:$4 sm:$0xff]   ;;  %v9995_v52 = vld [vmem:[%s10773_s14 + $0x4a8] ss:$28 sps:$4 sm:$0xff]  }
 0x4cc   : > { %7712 = vmatprep.subr.bf16.mxu0 %v9937_v53  ;;  %9226 = vmatprep.subr.bf16.mxu1 %v9938_v15  ;;  %v9999_v53 = vld [vmem:[%s10773_s14 + $0x478] ss:$28 sps:$4 sm:$0xff]   ;;  %v10002_v15 = vld [vmem:[%s10773_s14 + $0x4e4] ss:$28 sps:$4 sm:$0xff]  }
 0x4ce   : > { %7686 = vmatmul.mubr.bf16.vlgmr.msra.gmra.mrb[20].mxu1 %v11195_v31 }
 0x4cf   : > { %7713 = vmatpush1.bf16.msra.mxu0 %v9935_v27  ;;  %9227 = vmatpush3.bf16.msra.mxu1 %v9939_v54  ;;  %v10003_v27 = vld [vmem:[%s10773_s14 + $0x670] ss:$28 sps:$4 sm:$0xff]   ;;  %v10000_v54 = vld [vmem:[%s10773_s14 + $0x4e0] ss:$28 sps:$4 sm:$0xff]  }
 0x4d0   : > { %7890 = vmatprep.mubr.bf16.mxu1 %v10906_v13  ;;  %7714 = vmatprep.subr.bf16.mxu0 %v9942_v56  ;;  %v9950_v13 = vld [vmem:[%s10773_s14 + $0x2b0] ss:$28 sps:$4 sm:$0xff]  }
 0x4d1   : > { %9228 = vmatprep.subr.bf16.mxu1 %v9943_v59  ;;  %v10004_v56 = vld [vmem:[%s10773_s14 + $0x4b0] ss:$28 sps:$4 sm:$0xff]   ;;  %v10007_v59 = vld [vmem:[%s10773_s14 + $0x51c] ss:$28 sps:$4 sm:$0xff]  }
 0x4d3   : > { %7715 = vmatpush1.bf16.msra.mxu0 %v9940_v61  ;;  %9229 = vmatpush3.bf16.msra.mxu1 %v9944_v22  ;;  %v10008_v61 = vld [vmem:[%s10773_s14 + $0x6a8] ss:$28 sps:$4 sm:$0xff]   ;;  %v10005_v22 = vld [vmem:[%s10773_s14 + $0x518] ss:$28 sps:$4 sm:$0xff]  }
 0x4d4   : > { %7716 = vmatprep.subr.bf16.mxu0 %v9947_v63  ;;  %9230 = vmatprep.subr.bf16.mxu1 %v9948_v0  ;;  %v10009_v63 = vld [vmem:[%s10773_s14 + $0x4e8] ss:$28 sps:$4 sm:$0xff]   ;;  %v10012_v0 = vld [vmem:[%s10773_s14 + $0x554] ss:$28 sps:$4 sm:$0xff]  }
 0x4d7   : > { %7717 = vmatpush1.bf16.msra.mxu0 %v9945_v60  ;;  %9231 = vmatpush3.bf16.msra.mxu1 %v9949_v12  ;;  %v10013_v60 = vld [vmem:[%s10773_s14 + $0x6e0] ss:$28 sps:$4 sm:$0xff]   ;;  %v10010_v12 = vld [vmem:[%s10773_s14 + $0x550] ss:$28 sps:$4 sm:$0xff]  }
 0x4d8   : > { %7718 = vmatprep.subr.bf16.mxu0 %v9952_v2  ;;  %9232 = vmatprep.subr.bf16.mxu1 %v9953_v30  ;;  %v10014_v2 = vld [vmem:[%s10773_s14 + $0x520] ss:$28 sps:$4 sm:$0xff]   ;;  %v10017_v30 = vld [vmem:[%s10773_s14 + $0x58c] ss:$28 sps:$4 sm:$0xff]  }
 0x4db   : > { %7719 = vmatpush1.bf16.msra.mxu0 %v9950_v13  ;;  %9233 = vmatpush3.bf16.msra.mxu1 %v9954_v3  ;;  %v10018_v13 = vld [vmem:[%s10773_s14 + $0x8d8] ss:$28 sps:$4 sm:$0xff]   ;;  %v10015_v3 = vld [vmem:[%s10773_s14 + $0x588] ss:$28 sps:$4 sm:$0xff]  }
 0x4dc   : > { %7720 = vmatprep.subr.bf16.mxu0 %v9957_v4  ;;  %9234 = vmatprep.subr.bf16.mxu1 %v9958_v51  ;;  %v10019_v4 = vld [vmem:[%s10773_s14 + $0x718] ss:$28 sps:$4 sm:$0xff]   ;;  %v10022_v51 = vld [vmem:[%s10773_s14 + $0x5c4] ss:$28 sps:$4 sm:$0xff]  }
 0x4df   : > { %7721 = vmatpush1.bf16.msra.mxu0 %v9955_v9  ;;  %9235 = vmatpush3.bf16.msra.mxu1 %v9959_v10  ;;  %v10023_v9 = vld [vmem:[%s10773_s14 + $0x910] ss:$28 sps:$4 sm:$0xff]   ;;  %v10020_v10 = vld [vmem:[%s10773_s14 + $0x5c0] ss:$28 sps:$4 sm:$0xff]  }
 0x4e0   : > { %7722 = vmatprep.subr.bf16.mxu0 %v9962_v26  ;;  %9236 = vmatprep.subr.bf16.mxu1 %v9963_v32  ;;  %v10024_v26 = vld [vmem:[%s10773_s14 + $0x750] ss:$28 sps:$4 sm:$0xff]   ;;  %v10027_v32 = vld [vmem:[%s10773_s14 + $0x5fc] ss:$28 sps:$4 sm:$0xff]  }
 0x4e3   : > { %7723 = vmatpush1.bf16.msra.mxu0 %v9960_v16  ;;  %9237 = vmatpush3.bf16.msra.mxu1 %v9964_v18  ;;  %v10028_v16 = vld [vmem:[%s10773_s14 + $0x948] ss:$28 sps:$4 sm:$0xff]   ;;  %v10025_v18 = vld [vmem:[%s10773_s14 + $0x5f8] ss:$28 sps:$4 sm:$0xff]  }
 0x4e4   : > { %7724 = vmatprep.subr.bf16.mxu0 %v9967_v57  ;;  %9238 = vmatprep.subr.bf16.mxu1 %v9968_v19  ;;  %v10029_v57 = vld [vmem:[%s10773_s14 + $0x788] ss:$28 sps:$4 sm:$0xff]   ;;  %v10032_v19 = vld [vmem:[%s10773_s14 + $0x634] ss:$28 sps:$4 sm:$0xff]  }
 0x4e7   : > { %7725 = vmatpush1.bf16.msra.mxu0 %v9965_v21  ;;  %9239 = vmatpush3.bf16.msra.mxu1 %v9969_v11  ;;  %v10033_v21 = vld [vmem:[%s10773_s14 + $0x980] ss:$28 sps:$4 sm:$0xff]   ;;  %v10030_v11 = vld [vmem:[%s10773_s14 + $0x630] ss:$28 sps:$4 sm:$0xff]  }
 0x4e8   : > { %7735 = vmatprep.subr.bf16.mxu0 %v9972_v5  ;;  %9240 = vmatprep.subr.bf16.mxu1 %v9973_v23  ;;  %v10034_v5 = vld [vmem:[%s10773_s14 + $0x7c0] ss:$28 sps:$4 sm:$0xff]   ;;  %v10037_v23 = vld [vmem:[%s10773_s14 + $0x66c] ss:$28 sps:$4 sm:$0xff]  }
 0x4ea   : > { %7727 = vmatmul.mubr.bf16.vlgmr.msra.gmra.mrb[20].mxu0 %v10943_v6 }
 0x4eb   : > { %7736 = vmatpush1.bf16.msra.mxu0 %v9970_v24  ;;  %7767 = vmatprep.mubr.bf16.mxu0 %v10965_v1  ;;  %v10038_v24 = vld [vmem:[%s10773_s14 + $0x9b8] ss:$28 sps:$4 sm:$0xff]  }
 0x4ec   : > { %9241 = vmatpush3.bf16.msra.mxu1 %v9974_v17  ;;  %7737 = vmatprep.subr.bf16.mxu0 %v9977_v25  ;;  %v10035_v17 = vld [vmem:[%s10773_s14 + $0x668] ss:$28 sps:$4 sm:$0xff]   ;;  %v10039_v25 = vld [vmem:[%s10773_s14 + $0x7f8] ss:$28 sps:$4 sm:$0xff]  }
 0x4ed   : > { %9248 = vmatprep.subr.bf16.mxu1 %v9978_v40  ;;  %v10042_v40 = vld [vmem:[%s10773_s14 + $0x6a4] ss:$28 sps:$4 sm:$0xff]  }
 0x4ef   : > { %7738 = vmatpush1.bf16.msra.mxu0 %v9975_v28  ;;  %7891 = vmatmul.mubr.bf16.vlgmr.msra.gmra.mrb[24].mxu1 %v10943_v6  ;;  %v9989_v6 = vld [vmem:[%s10773_s14 + $0x408] ss:$28 sps:$4 sm:$0xff]   ;;  %v10043_v28 = vld [vmem:[%s10773_s14 + $0x9f0] ss:$28 sps:$4 sm:$0xff]  }
 0x4f0   : > { %9249 = vmatpush3.bf16.msra.mxu1 %v9979_v29  ;;  %7930 = vmatprep.mubr.bf16.mxu1 %v10965_v1  ;;  %v9990_v1 = vld [vmem:[%s10773_s14 + $0x470] ss:$28 sps:$4 sm:$0xff]   ;;  %v10040_v29 = vld [vmem:[%s10773_s14 + $0x6a0] ss:$28 sps:$4 sm:$0xff]  }
 0x4f1   : > { %7739 = vmatprep.subr.bf16.mxu0 %v9982_v33  ;;  %9250 = vmatprep.subr.bf16.mxu1 %v9983_v34  ;;  %v10044_v33 = vld [vmem:[%s10773_s14 + $0x830] ss:$28 sps:$4 sm:$0xff]   ;;  %v10047_v34 = vld [vmem:[%s10773_s14 + $0x6dc] ss:$28 sps:$4 sm:$0xff]  }
 0x4f3   : > { %7740 = vmatpush1.bf16.msra.mxu0 %v9980_v36  ;;  %v10048_v36 = vld [vmem:[%s10773_s14 + $0xa28] ss:$28 sps:$4 sm:$0xff]  }
 0x4f4   : > { %9251 = vmatpush3.bf16.msra.mxu1 %v9984_v37  ;;  %7741 = vmatprep.subr.bf16.mxu0 %v9987_v14  ;;  %v10045_v37 = vld [vmem:[%s10773_s14 + $0x6d8] ss:$28 sps:$4 sm:$0xff]   ;;  %v10049_v14 = vld [vmem:[%s10773_s14 + $0x868] ss:$28 sps:$4 sm:$0xff]  }
 0x4f5   : > { %9252 = vmatprep.subr.bf16.mxu1 %v9988_v39  ;;  %v10052_v39 = vld [vmem:[%s10773_s14 + $0x714] ss:$28 sps:$4 sm:$0xff]  }
 0x4f7   : > { %7742 = vmatpush1.bf16.msra.mxu0 %v9985_v38  ;;  %v10053_v38 = vld [vmem:[%s10773_s14 + $0xa60] ss:$28 sps:$4 sm:$0xff]  }
 0x4f8   : > { %9253 = vmatpush3.bf16.msra.mxu1 %v9989_v6  ;;  %7743 = vmatprep.subr.bf16.mxu0 %v9992_v45  ;;  %v10050_v6 = vld [vmem:[%s10773_s14 + $0x710] ss:$28 sps:$4 sm:$0xff]   ;;  %v10054_v45 = vld [vmem:[%s10773_s14 + $0x8a0] ss:$28 sps:$4 sm:$0xff]  }
 0x4f9   : > { %9254 = vmatprep.subr.bf16.mxu1 %v9993_v41  ;;  %v10057_v41 = vld [vmem:[%s10773_s14 + $0x74c] ss:$28 sps:$4 sm:$0xff]  }
 0x4fb   : > { %7744 = vmatpush1.bf16.msra.mxu0 %v9990_v1  ;;  %v10058_v1 = vld [vmem:[%s10773_s14 + $0xc58] ss:$28 sps:$4 sm:$0xff]  }
 0x4fc   : > { %9255 = vmatpush3.bf16.msra.mxu1 %v9994_v42  ;;  %7745 = vmatprep.subr.bf16.mxu0 %v9997_v43  ;;  %v10055_v42 = vld [vmem:[%s10773_s14 + $0x748] ss:$28 sps:$4 sm:$0xff]   ;;  %v10059_v43 = vld [vmem:[%s10773_s14 + $0xa98] ss:$28 sps:$4 sm:$0xff]  }
 0x4fd   : > { %9256 = vmatprep.subr.bf16.mxu1 %v9998_v50  ;;  %v10062_v50 = vld [vmem:[%s10773_s14 + $0x784] ss:$28 sps:$4 sm:$0xff]  }
 0x4ff   : > { %7746 = vmatpush1.bf16.msra.mxu0 %v9995_v52  ;;  %v10063_v52 = vld [vmem:[%s10773_s14 + $0xc90] ss:$28 sps:$4 sm:$0xff]  }
 0x500   : > { %9257 = vmatpush3.bf16.msra.mxu1 %v9999_v53  ;;  %7747 = vmatprep.subr.bf16.mxu0 %v10002_v15  ;;  %v10067_v53 = vld [vmem:[%s10773_s14 + $0x7bc] ss:$28 sps:$4 sm:$0xff]   ;;  %v10068_v15 = vld [vmem:[%s10773_s14 + $0xcc8] ss:$28 sps:$4 sm:$0xff]  }
 0x501   : > { %9258 = vmatprep.subr.bf16.mxu1 %v10003_v27  ;;  %v10065_v27 = vld [vmem:[%s10773_s14 + $0x7b8] ss:$28 sps:$4 sm:$0xff]  }
 0x503   : > { %7748 = vmatpush1.bf16.msra.mxu0 %v10000_v54  ;;  %v10069_v54 = vld [vmem:[%s10773_s14 + $0xb08] ss:$28 sps:$4 sm:$0xff]  }
 0x504   : > { %9259 = vmatpush3.bf16.msra.mxu1 %v10004_v56  ;;  %7749 = vmatprep.subr.bf16.mxu0 %v10007_v59  ;;  %v10072_v56 = vld [vmem:[%s10773_s14 + $0x7f4] ss:$28 sps:$4 sm:$0xff]   ;;  %v10073_v59 = vld [vmem:[%s10773_s14 + $0xd00] ss:$28 sps:$4 sm:$0xff]  }
 0x505   : > { %9260 = vmatprep.subr.bf16.mxu1 %v10008_v61  ;;  %v10070_v61 = vld [vmem:[%s10773_s14 + $0x7f0] ss:$28 sps:$4 sm:$0xff]  }
 0x507   : > { %7750 = vmatpush1.bf16.msra.mxu0 %v10005_v22  ;;  %v10074_v22 = vld [vmem:[%s10773_s14 + $0xb40] ss:$28 sps:$4 sm:$0xff]  }
 0x508   : > { %9261 = vmatpush3.bf16.msra.mxu1 %v10009_v63  ;;  %7751 = vmatprep.subr.bf16.mxu0 %v10012_v0  ;;  %v10077_v63 = vld [vmem:[%s10773_s14 + $0x82c] ss:$28 sps:$4 sm:$0xff]   ;;  %v10078_v0 = vld [vmem:[%s10773_s14 + $0xd38] ss:$28 sps:$4 sm:$0xff]  }
 0x509   : > { %9262 = vmatprep.subr.bf16.mxu1 %v10013_v60  ;;  %v10075_v60 = vld [vmem:[%s10773_s14 + $0x828] ss:$28 sps:$4 sm:$0xff]  }
 0x50b   : > { %7752 = vmatpush1.bf16.msra.mxu0 %v10010_v12  ;;  %v10079_v12 = vld [vmem:[%s10773_s14 + $0xb78] ss:$28 sps:$4 sm:$0xff]  }
 0x50c   : > { %9263 = vmatpush3.bf16.msra.mxu1 %v10014_v2  ;;  %7753 = vmatprep.subr.bf16.mxu0 %v10017_v30  ;;  %v10082_v2 = vld [vmem:[%s10773_s14 + $0x864] ss:$28 sps:$4 sm:$0xff]   ;;  %v10083_v30 = vld [vmem:[%s10773_s14 + $0xd70] ss:$28 sps:$4 sm:$0xff]  }
 0x50d   : > { %9270 = vmatprep.subr.bf16.mxu1 %v10018_v13  ;;  %v10080_v13 = vld [vmem:[%s10773_s14 + $0x860] ss:$28 sps:$4 sm:$0xff]  }
 0x50f   : > { %7754 = vmatpush1.bf16.msra.mxu0 %v10015_v3  ;;  %7931 = vmatmul.mubr.bf16.vlgmr.msra.gmra.mrb[28].mxu1 %v10992_v7  ;;  %v10084_v3 = vld [vmem:[%s10773_s14 + $0xbb0] ss:$28 sps:$4 sm:$0xff]  }
 0x510   : > { %9271 = vmatpush3.bf16.msra.mxu1 %v10019_v4  ;;  %7970 = vmatprep.mubr.bf16.mxu1 %v11082_v58  ;;  %v10087_v4 = vld [vmem:[%s10773_s14 + $0x89c] ss:$28 sps:$4 sm:$0xff]  }
 0x511   : > { %7755 = vmatprep.subr.bf16.mxu0 %v10022_v51  ;;  %9272 = vmatprep.subr.bf16.mxu1 %v10023_v9  ;;  %v10088_v51 = vld [vmem:[%s10773_s14 + $0xda8] ss:$28 sps:$4 sm:$0xff]   ;;  %v10085_v9 = vld [vmem:[%s10773_s14 + $0x898] ss:$28 sps:$4 sm:$0xff]  }
 0x513   : > { %7756 = vmatpush1.bf16.msra.mxu0 %v10020_v10  ;;  %v10089_v10 = vld [vmem:[%s10773_s14 + $0xbe8] ss:$28 sps:$4 sm:$0xff]  }
 0x514   : > { %9273 = vmatpush3.bf16.msra.mxu1 %v10024_v26  ;;  %7757 = vmatprep.subr.bf16.mxu0 %v10027_v32  ;;  %v10092_v26 = vld [vmem:[%s10773_s14 + $0x8d4] ss:$28 sps:$4 sm:$0xff]   ;;  %v10093_v32 = vld [vmem:[%s10773_s14 + $0xde0] ss:$28 sps:$4 sm:$0xff]  }
 0x515   : > { %9274 = vmatprep.subr.bf16.mxu1 %v10028_v16  ;;  %v10090_v16 = vld [vmem:[%s10773_s14 + $0x8d0] ss:$28 sps:$4 sm:$0xff]  }
 0x517   : > { %7758 = vmatpush1.bf16.msra.mxu0 %v10025_v18  ;;  %v10094_v18 = vld [vmem:[%s10773_s14 + $0xc20] ss:$28 sps:$4 sm:$0xff]  }
 0x518   : > { %9275 = vmatpush3.bf16.msra.mxu1 %v10029_v57  ;;  %7759 = vmatprep.subr.bf16.mxu0 %v10032_v19  ;;  %v10097_v57 = vld [vmem:[%s10773_s14 + $0x90c] ss:$28 sps:$4 sm:$0xff]  }
 0x519   : > { %9276 = vmatprep.subr.bf16.mxu1 %v10033_v21  ;;  %v10095_v19 = vld [vmem:[%s10773_s14 + $0x908] ss:$28 sps:$4 sm:$0xff]  }
 0x51a   : > { %v10100_v21 = vld [vmem:[%s10773_s14 + $0x944] ss:$28 sps:$4 sm:$0xff]  }
 0x51b   : > { %7760 = vmatpush1.bf16.msra.mxu0 %v10030_v11  ;;  %v10098_v11 = vld [vmem:[%s10773_s14 + $0x940] ss:$28 sps:$4 sm:$0xff]  }
 0x51c   : > { %9277 = vmatpush3.bf16.msra.mxu1 %v10034_v5  ;;  %7761 = vmatprep.subr.bf16.mxu0 %v10037_v23  ;;  %v10103_v5 = vld [vmem:[%s10773_s14 + $0x97c] ss:$28 sps:$4 sm:$0xff]  }
 0x51d   : > { %9278 = vmatprep.subr.bf16.mxu1 %v10038_v24  ;;  %v10101_v23 = vld [vmem:[%s10773_s14 + $0x978] ss:$28 sps:$4 sm:$0xff]  }
 0x51e   : > { %v10106_v24 = vld [vmem:[%s10773_s14 + $0x9b4] ss:$28 sps:$4 sm:$0xff]  }
 0x51f   : > { %7762 = vmatpush1.bf16.msra.mxu0 %v10035_v17  ;;  %v10104_v17 = vld [vmem:[%s10773_s14 + $0x9b0] ss:$28 sps:$4 sm:$0xff]  }
 0x520   : > { %9279 = vmatpush3.bf16.msra.mxu1 %v10039_v25  ;;  %7763 = vmatprep.subr.bf16.mxu0 %v10042_v40  ;;  %v10109_v25 = vld [vmem:[%s10773_s14 + $0x9ec] ss:$28 sps:$4 sm:$0xff]  }
 0x521   : > { %9280 = vmatprep.subr.bf16.mxu1 %v10043_v28  ;;  %v10107_v40 = vld [vmem:[%s10773_s14 + $0x9e8] ss:$28 sps:$4 sm:$0xff]  }
 0x522   : > { %v10112_v28 = vld [vmem:[%s10773_s14 + $0xa24] ss:$28 sps:$4 sm:$0xff]  }
 0x523   : > { %7764 = vmatpush1.bf16.msra.mxu0 %v10040_v29  ;;  %v10110_v29 = vld [vmem:[%s10773_s14 + $0xa20] ss:$28 sps:$4 sm:$0xff]  }
 0x524   : > { %9281 = vmatpush3.bf16.msra.mxu1 %v10044_v33  ;;  %7765 = vmatprep.subr.bf16.mxu0 %v10047_v34  ;;  %v10115_v33 = vld [vmem:[%s10773_s14 + $0xa5c] ss:$28 sps:$4 sm:$0xff]  }
 0x525   : > { %9282 = vmatprep.subr.bf16.mxu1 %v10048_v36  ;;  %v10113_v34 = vld [vmem:[%s10773_s14 + $0xa58] ss:$28 sps:$4 sm:$0xff]  }
 0x526   : > { %v10118_v36 = vld [vmem:[%s10773_s14 + $0xa94] ss:$28 sps:$4 sm:$0xff]  }
 0x527   : > { %7766 = vmatpush1.bf16.msra.mxu0 %v10045_v37  ;;  %v10116_v37 = vld [vmem:[%s10773_s14 + $0xa90] ss:$28 sps:$4 sm:$0xff]  }
 0x528   : > { %9283 = vmatpush3.bf16.msra.mxu1 %v10049_v14  ;;  %7776 = vmatprep.subr.bf16.mxu0 %v10052_v39  ;;  %v10121_v14 = vld [vmem:[%s10773_s14 + $0xacc] ss:$28 sps:$4 sm:$0xff]  }
 0x529   : > { %9284 = vmatprep.subr.bf16.mxu1 %v10053_v38  ;;  %v10119_v39 = vld [vmem:[%s10773_s14 + $0xac8] ss:$28 sps:$4 sm:$0xff]  }
 0x52a   : > { %7768 = vmatmul.mubr.bf16.vlgmr.msra.gmra.mrb[20].mxu0 %v10992_v7  ;;  %v10060_v7 = vld [vmem:[%s10773_s14 + $0x780] ss:$28 sps:$4 sm:$0xff]  }
 0x52b   : > { %7777 = vmatpush1.bf16.msra.mxu0 %v10050_v6  ;;  %7808 = vmatprep.mubr.bf16.mxu0 %v11082_v58  ;;  %v10064_v58 = vld [vmem:[%s10773_s14 + $0xad0] ss:$28 sps:$4 sm:$0xff]   ;;  %v10124_v38 = vld [vmem:[%s10773_s14 + $0xb04] ss:$28 sps:$4 sm:$0xff]  }
 0x52c   : > { %9285 = vmatpush3.bf16.msra.mxu1 %v10054_v45  ;;  %7778 = vmatprep.subr.bf16.mxu0 %v10057_v41  ;;  %v10122_v6 = vld [vmem:[%s10773_s14 + $0xb00] ss:$28 sps:$4 sm:$0xff]   ;;  %v10125_v41 = vld [vmem:[%s10773_s14 + $0xb38] ss:$28 sps:$4 sm:$0xff]  }
 0x52d   : > { %9292 = vmatprep.subr.bf16.mxu1 %v10058_v1  ;;  %v10127_v45 = vld [vmem:[%s10773_s14 + $0xb3c] ss:$28 sps:$4 sm:$0xff]   ;;  %v10130_v1 = vld [vmem:[%s10773_s14 + $0xb74] ss:$28 sps:$4 sm:$0xff]  }
 0x52f   : > { %7779 = vmatpush1.bf16.msra.mxu0 %v10055_v42  ;;  %7971 = vmatmul.mubr.bf16.vlgmr.msra.gmra.mrb[32].mxu1 %v11086_v62  ;;  %v10133_v42 = vld [vmem:[%s10773_s14 + $0xbac] ss:$28 sps:$4 sm:$0xff]  }
 0x530   : > { %9293 = vmatpush3.bf16.msra.mxu1 %v10059_v43  ;;  %8010 = vmatprep.mubr.bf16.mxu1 %v11191_v35 }
 0x531   : > { %7780 = vmatprep.subr.bf16.mxu0 %v10062_v50  ;;  %9294 = vmatprep.subr.bf16.mxu1 %v10063_v52  ;;  %v10131_v50 = vld [vmem:[%s10773_s14 + $0xba8] ss:$28 sps:$4 sm:$0xff]  }
 0x533   : > { %7781 = vmatpush1.bf16.msra.mxu0 %v10060_v7  ;;  %v10136_v7 = vld [vmem:[%s10773_s14 + $0xbe4] ss:$28 sps:$4 sm:$0xff]  }
 0x534   : > { %9295 = vmatpush3.bf16.msra.mxu1 %v10064_v58  ;;  %7782 = vmatprep.subr.bf16.mxu0 %v10067_v53 }
 0x535   : > { %9296 = vmatprep.subr.bf16.mxu1 %v10068_v15 }
 0x537   : > { %7783 = vmatpush1.bf16.msra.mxu0 %v10065_v27 }
 0x538   : > { %9297 = vmatpush3.bf16.msra.mxu1 %v10069_v54  ;;  %7784 = vmatprep.subr.bf16.mxu0 %v10072_v56  ;;  %v10134_v56 = vld [vmem:[%s10773_s14 + $0xbe0] ss:$28 sps:$4 sm:$0xff]  }
 0x539   : > { %9298 = vmatprep.subr.bf16.mxu1 %v10073_v59 }
 0x53b   : > { %7785 = vmatpush1.bf16.msra.mxu0 %v10070_v61  ;;  %v10139_v61 = vld [vmem:[%s10773_s14 + $0xc1c] ss:$28 sps:$4 sm:$0xff]  }
 0x53c   : > { %9299 = vmatpush3.bf16.msra.mxu1 %v10074_v22  ;;  %7786 = vmatprep.subr.bf16.mxu0 %v10077_v63  ;;  %v10137_v63 = vld [vmem:[%s10773_s14 + $0xc18] ss:$28 sps:$4 sm:$0xff]  }
 0x53d   : > { %9300 = vmatprep.subr.bf16.mxu1 %v10078_v0  ;;  %v10142_v0 = vld [vmem:[%s10773_s14 + $0xc54] ss:$28 sps:$4 sm:$0xff]  }
 0x53f   : > { %7787 = vmatpush1.bf16.msra.mxu0 %v10075_v60  ;;  %v10140_v60 = vld [vmem:[%s10773_s14 + $0xc50] ss:$28 sps:$4 sm:$0xff]  }
 0x540   : > { %9301 = vmatpush3.bf16.msra.mxu1 %v10079_v12  ;;  %7788 = vmatprep.subr.bf16.mxu0 %v10082_v2  ;;  %v10145_v12 = vld [vmem:[%s10773_s14 + $0xc8c] ss:$28 sps:$4 sm:$0xff]  }
 0x541   : > { %9302 = vmatprep.subr.bf16.mxu1 %v10083_v30  ;;  %v10143_v2 = vld [vmem:[%s10773_s14 + $0xc88] ss:$28 sps:$4 sm:$0xff]  }
 0x542   : > { %v10148_v30 = vld [vmem:[%s10773_s14 + $0xcc4] ss:$28 sps:$4 sm:$0xff]  }
 0x543   : > { %7789 = vmatpush1.bf16.msra.mxu0 %v10080_v13  ;;  %v10146_v13 = vld [vmem:[%s10773_s14 + $0xcc0] ss:$28 sps:$4 sm:$0xff]  }
 0x544   : > { %9303 = vmatpush3.bf16.msra.mxu1 %v10084_v3  ;;  %7790 = vmatprep.subr.bf16.mxu0 %v10087_v4  ;;  %v10151_v3 = vld [vmem:[%s10773_s14 + $0xcfc] ss:$28 sps:$4 sm:$0xff]  }
 0x545   : > { %9304 = vmatprep.subr.bf16.mxu1 %v10088_v51  ;;  %v10149_v4 = vld [vmem:[%s10773_s14 + $0xcf8] ss:$28 sps:$4 sm:$0xff]  }
 0x546   : > { %v10154_v51 = vld [vmem:[%s10773_s14 + $0xd34] ss:$28 sps:$4 sm:$0xff]  }
 0x547   : > { %7791 = vmatpush1.bf16.msra.mxu0 %v10085_v9  ;;  %v10152_v9 = vld [vmem:[%s10773_s14 + $0xd30] ss:$28 sps:$4 sm:$0xff]  }
 0x548   : > { %9305 = vmatpush3.bf16.msra.mxu1 %v10089_v10  ;;  %7792 = vmatprep.subr.bf16.mxu0 %v10092_v26  ;;  %v10157_v10 = vld [vmem:[%s10773_s14 + $0xd6c] ss:$28 sps:$4 sm:$0xff]  }
 0x549   : > { %9306 = vmatprep.subr.bf16.mxu1 %v10093_v32  ;;  %v10155_v26 = vld [vmem:[%s10773_s14 + $0xd68] ss:$28 sps:$4 sm:$0xff]  }
 0x54a   : > { %v10160_v32 = vld [vmem:[%s10773_s14 + $0xda4] ss:$28 sps:$4 sm:$0xff]  }
 0x54b   : > { %7793 = vmatpush1.bf16.msra.mxu0 %v10090_v16  ;;  %v10458_v16 = vmov 1983009808  }
 0x54c   : > { %9307 = vmatpush3.bf16.msra.mxu1 %v10094_v18  ;;  %7794 = vmatprep.subr.bf16.mxu0 %v10097_v57  ;;  %v8035_v18 = vunpack.c.l.s4 %v10458_v16 }
 0x54f   : > { %7795 = vmatpush1.bf16.msra.mxu0 %v10095_v19  ;;  %8011 = vmatmul.mubr.bf16.vlgmr.msra.gmra.mrb[36].mxu1 %v11195_v31  ;;  %v10158_v19 = vld [vmem:[%s10773_s14 + $0xda0] ss:$28 sps:$4 sm:$0xff]  }
 0x550   : > { %7796 = vmatprep.subr.bf16.mxu0 %v10100_v21 }
 0x553   : > { %7797 = vmatpush1.bf16.msra.mxu0 %v10098_v11  ;;  %v10163_v11 = vld [vmem:[%s10773_s14 + $0xddc] ss:$28 sps:$4 sm:$0xff]  }
 0x554   : > { %7798 = vmatprep.subr.bf16.mxu0 %v10103_v5  ;;  %v8036_v5 = vunpack.c.0.s8 %v8035_v18 }
 0x557   : > { %7799 = vmatpush1.bf16.msra.mxu0 %v10101_v23 }
 0x558   : > { %7800 = vmatprep.subr.bf16.mxu0 %v10106_v24 }
 0x55b   : > { %7801 = vmatpush1.bf16.msra.mxu0 %v10104_v17 }
 0x55c   : > { %7802 = vmatprep.subr.bf16.mxu0 %v10109_v25 }
 0x55f   : > { %7803 = vmatpush1.bf16.msra.mxu0 %v10107_v40 }
 0x560   : > { %7804 = vmatprep.subr.bf16.mxu0 %v10112_v28  ;;  %v10161_v28 = vld [vmem:[%s10773_s14 + $0xdd8] ss:$28 sps:$4 sm:$0xff]  }
 0x563   : > { %7805 = vmatpush1.bf16.msra.mxu0 %v10110_v29 }
 0x564   : > { %7806 = vmatprep.subr.bf16.mxu0 %v10115_v33 }
 0x567   : > { %7807 = vmatpush1.bf16.msra.mxu0 %v10113_v34 }
 0x568   : > { %7817 = vmatprep.subr.bf16.mxu0 %v10118_v36 }
 0x56a   : > { %7809 = vmatmul.mubr.bf16.vlgmr.msra.gmra.mrb[20].mxu0 %v11086_v62  ;;  %v10128_v62 = vld [vmem:[%s10773_s14 + $0xb70] ss:$28 sps:$4 sm:$0xff]  }
 0x56b   : > { %7818 = vmatpush1.bf16.msra.mxu0 %v10116_v37  ;;  %7849 = vmatprep.mubr.bf16.mxu0 %v11191_v35  ;;  %v11401_v35 = vld [vmem:[%s363_s13] sm:$0xff] }
 0x56c   : > { %7819 = vmatprep.subr.bf16.mxu0 %v10121_v14  ;;  %v5030_v43 = vrot.slane %v11401_v35, %v10796_v46  ;;  %v5034_v52 = vrot.slane %v11401_v35, %v10802_v48  ;;  %v5038_v57 = vrot.slane %v11401_v35, %v10799_v47  ;;  %v5042_v21 = vrot.slane %v11401_v35, %v10805_v49 }
 0x56d   : > { %v8039_v47 = vsub.s32 %v8036_v5, %v10791_v44  ;;  %v5054_v44 = vrot.slane %v11401_v35, %v10862_v8 }
 0x56f   : > { %7820 = vmatpush1.bf16.msra.mxu0 %v10119_v39 }
 0x570   : > { %7821 = vmatprep.subr.bf16.mxu0 %v10124_v38 }
 0x573   : > { %7822 = vmatpush1.bf16.msra.mxu0 %v10122_v6 }
 0x574   : > { %7823 = vmatprep.subr.bf16.mxu0 %v10127_v45 }
 0x577   : > { %7824 = vmatpush1.bf16.msra.mxu0 %v10125_v41 }
 0x578   : > { %7825 = vmatprep.subr.bf16.mxu0 %v10130_v1 }
 0x57b   : > { %7826 = vmatpush1.bf16.msra.mxu0 %v10128_v62 }
 0x57c   : > { %7827 = vmatprep.subr.bf16.mxu0 %v10133_v42 }
 0x57d   : > { %v7523_v58 = vpop.f32.mrb[16].mxu0 }
 0x57e   : > { %v9324_v53 = vadd.f32 %v7523_v58, %v5030_v43  ;;  %v7525_v15 = vpop.f32.mrb[17].mxu0 }
 0x57f   : > { %v9325_v27 = vadd.f32 %v7525_v15, %v5034_v52  ;;  %7828 = vmatpush1.bf16.msra.mxu0 %v10131_v50  ;;  %v7527_v54 = vpop.f32.mrb[18].mxu0 }
 0x580   : > { %v8018_v46 = vmax.f32 %v9324_v53, 0.0  ;;  %v7528_v59 = vpop.f32.mrb[19].mxu0  ;;  %7829 = vmatprep.subr.bf16.mxu0 %v10136_v7 }
 0x581   : > { %v8019_v48 = vmax.f32 %v9325_v27, 0.0 }
 0x583   : > { %v8032_v22 = vcombine.low %v8018_v46, %v8019_v48  ;;  %7830 = vmatpush1.bf16.msra.mxu0 %v10134_v56 }
 0x584   : > { %7831 = vmatprep.subr.bf16.mxu0 %v10139_v61 }
 0x585   : > { %v8040_v49 = vrot.slane %v8032_v22, %v8039_v47  ;;  %v5046_v22 = vrot.slane %v11401_v35, %v10843_v20 }
 0x587   : > { %7832 = vmatpush1.bf16.msra.mxu0 %v10137_v63  ;;  %v5050_v63 = vrot.slane %v11401_v35, %v10816_v55 }
 0x588   : > { %7833 = vmatprep.subr.bf16.mxu0 %v10142_v0 }
 0x58b   : > { %7834 = vmatpush1.bf16.msra.mxu0 %v10140_v60 }
 0x58c   : > { %7835 = vmatprep.subr.bf16.mxu0 %v10145_v12 }
 0x58f   : > { %7836 = vmatpush1.bf16.msra.mxu0 %v10143_v2 }
 0x590   : > { %7837 = vmatprep.subr.bf16.mxu0 %v10148_v30 }
 0x593   : > { %7838 = vmatpush1.bf16.msra.mxu0 %v10146_v13 }
 0x594   : > { %7839 = vmatprep.subr.bf16.mxu0 %v10151_v3 }
 0x597   : > { %7840 = vmatpush1.bf16.msra.mxu0 %v10149_v4 }
 0x598   : > { %7841 = vmatprep.subr.bf16.mxu0 %v10154_v51 }
 0x59b   : > { %7842 = vmatpush1.bf16.msra.mxu0 %v10152_v9 }
 0x59c   : > { %7843 = vmatprep.subr.bf16.mxu0 %v10157_v10 }
 0x59f   : > { %7844 = vmatpush1.bf16.msra.mxu0 %v10155_v26 }
 0x5a0   : > { %7845 = vmatprep.subr.bf16.mxu0 %v10160_v32 }
 0x5a1   : > { %v7687_v23 = vpop.f32.mrb[20].mxu1 }
 0x5a2   : > { %v9326_v24 = vadd.f32 %v7687_v23, %v5038_v57  ;;  %v7689_v17 = vpop.f32.mrb[21].mxu1 }
 0x5a3   : > { %v9327_v25 = vadd.f32 %v7689_v17, %v5042_v21  ;;  %7846 = vmatpush1.bf16.msra.mxu0 %v10158_v19  ;;  %v7691_v40 = vpop.f32.mrb[22].mxu1 }
 0x5a4   : > { %v8020_v29 = vmax.f32 %v9326_v24, 0.0  ;;  %v7692_v33 = vpop.f32.mrb[23].mxu1  ;;  %7847 = vmatprep.subr.bf16.mxu0 %v10163_v11 }
 0x5a5   : > { %v8021_v34 = vmax.f32 %v9327_v25, 0.0 }
 0x5a7   : > { %v8033_v36 = vcombine.low %v8020_v29, %v8021_v34  ;;  %7848 = vmatpush1.bf16.msra.mxu0 %v10161_v28 }
 0x5a9   : > { %v8047_v37 = vrot.slane %v8033_v36, %v8039_v47 }
 0x5aa   : > { %7850 = vmatmul.mubr.bf16.vlgmr.msra.gmra.mrb[20].mxu0 %v11195_v31 }
 0x5ab   : > { %v8048_v14 = vcombine.low %v8040_v49, %v8047_v37 }
 0x5ad   : > { %8067 = vst [vmem:[%s11436_s22] sm:$0xff] %v8048_v14 }
 0x5c2   : > { %v9242_v39 = vpop.f32.mrb[24].mxu1 }
 0x5c3   : > { %v9243_v38 = vpop.f32.mrb[25].mxu1 }
 0x5c4   : > { %v9244_v6 = vadd.f32 %v9243_v38, %v9242_v39  ;;  %v9245_v45 = vpop.f32.mrb[26].mxu1 }
 0x5c5   : > { %v9246_v41 = vpop.f32.mrb[27].mxu1 }
 0x5c6   : > { %v7893_v42 = vadd.f32 %v9244_v6, %v5054_v44 }
 0x5e2   : > { %v9264_v1 = vpop.f32.mrb[28].mxu1 }
 0x5e3   : > { %v9265_v62 = vpop.f32.mrb[29].mxu1 }
 0x5e4   : > { %v9266_v43 = vadd.f32 %v9265_v62, %v9264_v1  ;;  %v9267_v50 = vpop.f32.mrb[30].mxu1 }
 0x5e5   : > { %v9268_v52 = vpop.f32.mrb[31].mxu1 }
 0x5e6   : > { %v7933_v31 = vadd.f32 %v9266_v43, %v7893_v42 }
 0x602   : > { %v9286_v7 = vpop.f32.mrb[32].mxu1 }
 0x603   : > { %v9287_v58 = vpop.f32.mrb[33].mxu1 }
 0x604   : > { %v9288_v53 = vadd.f32 %v9287_v58, %v9286_v7  ;;  %v9289_v15 = vpop.f32.mrb[34].mxu1 }
 0x605   : > { %v9290_v27 = vpop.f32.mrb[35].mxu1 }
 0x606   : > { %v7973_v54 = vadd.f32 %v9288_v53, %v7933_v31 }
 0x622   : > { %v9308_v56 = vpop.f32.mrb[36].mxu1 }
 0x623   : > { %v9309_v46 = vpop.f32.mrb[37].mxu1 }
 0x624   : > { %v9310_v59 = vadd.f32 %v9309_v46, %v9308_v56  ;;  %v9311_v61 = vpop.f32.mrb[38].mxu1 }
 0x625   : > { %v9312_v8 = vpop.f32.mrb[39].mxu1 }
 0x626   : > { %v8013_v48 = vadd.f32 %v9310_v59, %v7973_v54 }
 0x628   : > { %v8024_v4 = vmax.f32 %v8013_v48, 0.0 }
 0x62a   : > { %v8063_v10 = vrot.slane %v8024_v4, %v8039_v47 }
 0x67d   : > { %v7851_v0 = vpop.f32.mrb[20].mxu0 }
 0x67e   : > { %v9328_v60 = vadd.f32 %v7851_v0, %v5046_v22  ;;  %v7853_v12 = vpop.f32.mrb[21].mxu0 }
 0x67f   : > { %v9329_v2 = vadd.f32 %v7853_v12, %v5050_v63  ;;  %v7855_v30 = vpop.f32.mrb[22].mxu0 }
 0x680   : > { %v8022_v13 = vmax.f32 %v9328_v60, 0.0  ;;  %v7856_v3 = vpop.f32.mrb[23].mxu0 }
 0x681   : > { %v8023_v51 = vmax.f32 %v9329_v2, 0.0 }
 0x683   : > { %v8049_v9 = vcombine.low %v8022_v13, %v8023_v51 }
 0x685   : > { %v8056_v20 = vrot.slane %v8049_v9, %v8039_v47 }
 0x687   : > { %v8064_v26 = vcombine.low %v8056_v20, %v8063_v10 }
 0x689   : > { %8068 = vst [vmem:[%s11436_s22 + $0x8] sm:$0x3f] %v8064_v26 }
 0x68a   : > { %10378 = shalt.err (!%p10375_p10)
}
 0x68b   : > { %s10379_s21 = scalar_lea.hbm %s11450_s3, 224  ;;  %s10383_s9 = scalar_lea.hbm %s11550_s12, 448 }
 0x68c   : > { %p10380_p12 = scmp.ne.s32.totalorder %s11450_s3, %s10379_s21  ;;  %p10384_p3 = scmp.lt.u32.totalorder %s11450_s3, %s11550_s12 }
 0x68d   : > { %p10385_p0 = scmp.lt.u32.totalorder %s10383_s9, %s10379_s21  ;;  %p10387_p9 = scmp.lt.u32.totalorder %s10379_s21, %s11450_s3 }
 0x68e   : > { %p10381_p2 = pnand %p10380_p12, %p11551_p13 }
 0x68f   : > { %p10386_p5 = por %p10385_p0, %p10384_p3 }
 0x690   : > { %p10382_p6 = pneg %p10381_p2 }
 0x691   : > { %p10388_p8 = por %p10387_p9, %p10386_p5 }
 0x693   : > { %p10389_p11 = pnand %p10388_p8, %p10382_p6 }
 0x695   : > { %10392 = shalt.err (!%p10389_p11)
}
 0x696   : > { %9439 = dma.vmem_to_hbm [thread:$0]  (%p11551_p13), %s11452_s20, 224, %s11450_s3, %s8070_s18  }
 0x697 PF: > { %s11552_s5 = sld [smem:[#allocation20_spill]]  ;;  %s11553_s14 = sld [smem:[#allocation21_spill]] }
 0x698   : > { %p11555_p4 = scmp.ge.s32.totalorder %s10443_s27, 2 }
 0x69d   : > { %s8096_s30 = sand.u32 1, %s11552_s5   ;;  %p11554_p1 = scmp.ne.s32.totalorder %s11553_s14, 0 }
 0x69e   : > { %s8097_s13 = scalar_lea.sflag [#allocation4], %s8096_s30 }
 0x69f   : > { %p9465_p7 = pnand %p11555_p4, %p11554_p1 }
 0x6a1   : > { %10426 = dma.done.wait (!%p9465_p7), %s8097_s13, 224  }
 0x6a2   : > { %10428 = vsyncadd (!%p9465_p7), %s8097_s13, 4294967072  ;;  %s11556_s27 = sld [smem:[#allocation22_spill]]  ;;  %s11557_s17 = sld [smem:[#allocation23_spill]] }
 0x6a3   : > { %s11558_s24 = smov %s10435_s25  ;;  %s11559_s25 = smov %s10439_s26 }
 0x6a8   : > { %p23_p10 = scmp.ge.s32.totalorder %s11556_s27, 4   ;;  %s11560_s26 = smov %s11557_s17 }
 0x6aa   :  { %25 = sbr.rel (!%p23_p10) target bundleno = 13 (0xd), region = 125 }
 0x6b1   :  { %8102 = vsyncpa [#allocation3], 1 }
 0x6b2   :  { %8104 = vsyncpa [#allocation3 + $0x1], 1 }
 0x6b3   :  { %8105 = vsyncpa [#allocation6], 1 }
 0x6b4   :  { %8106 = vsyncpa [#allocation9], 1 }
 0x6b5   :  { %8107 = vsyncpa [#allocation12], 1 }
 0x6b6   :  { %8109 = vsyncpa [#allocation12 + $0x1], 1 }
 0x6b7   :  { %8110 = vsyncpa [#allocation4], 1 }
 0x6b8   :  { %8112 = vsyncpa [#allocation4 + $0x1], 1 }

</bundles_post_ra>
